<compile_context>
chip_gen: v5e
topology: v5e:2x2
jax: 0.10.0
libtpu: 0.0.40
codegen_flags: <defaults>
</compile_context>

<pallas_src>
import functools

import jax
import jax.numpy as jnp
import numpy as np
from jax.experimental import pallas as pl
from jax.experimental.pallas import tpu as pltpu


# ---------------------------------------------------------------------------
# One-time host-side factorization:
#   layer(X) = act( sum_t  L[t] @ (X @ Rcat)[:, t-th slice]  + B )
# with X in row layout (C*N*H, W): channels/batch/height on sublanes, W on lanes.
# ---------------------------------------------------------------------------
def _conv_factors(w, b, N, H_in, W_in, stride, padding):
    """nn.Conv2d  (weight layout (Cout, Cin, kh, kw))."""
    Cout, Cin, kh, kw = w.shape
    sh, sw = stride
    ph, pw = padding
    H_out = (H_in + 2 * ph - kh) // sh + 1
    W_out = (W_in + 2 * pw - kw) // sw + 1
    R_in, R_out = Cin * N * H_in, Cout * N * H_out
    L = np.zeros((kw * R_out, R_in), np.float32)
    R = np.zeros((W_in, kw * W_out), np.float32)
    for dw in range(kw):
        for wo in range(W_out):
            wi = sw * wo + dw - pw
            if 0 <= wi < W_in:
                R[wi, dw * W_out + wo] = 1.0
        for co in range(Cout):
            for ci in range(Cin):
                for dh in range(kh):
                    for n in range(N):
                        for ho in range(H_out):
                            hi = sh * ho + dh - ph
                            if 0 <= hi < H_in:
                                L[dw * R_out + (co * N + n) * H_out + ho,
                                  (ci * N + n) * H_in + hi] += w[co, ci, dh, dw]
    B = np.zeros((R_out, W_out), np.float32)
    if b is not None:
        for co in range(Cout):
            B[co * N * H_out:(co + 1) * N * H_out, :] = b[co]
    return L, R, B, (kw, R_out, W_out), H_out, W_out


def _convT_factors(w, b, N, H_in, W_in, stride, padding, output_padding):
    """nn.ConvTranspose2d  (weight layout (Cin, Cout, kh, kw)).
    Stride "dilation", padding and output_padding are folded into L/R, so no
    zero-stuffed temporaries exist at runtime."""
    Cin, Cout, kh, kw = w.shape
    sh, sw = stride
    ph, pw = padding
    oph, opw = output_padding
    H_out = (H_in - 1) * sh - 2 * ph + kh + oph
    W_out = (W_in - 1) * sw - 2 * pw + kw + opw
    R_in, R_out = Cin * N * H_in, Cout * N * H_out
    L = np.zeros((kw * R_out, R_in), np.float32)
    R = np.zeros((W_in, kw * W_out), np.float32)
    for dw in range(kw):
        for wi in range(W_in):
            wo = sw * wi - pw + dw
            if 0 <= wo < W_out:
                R[wi, dw * W_out + wo] = 1.0
        for ci in range(Cin):
            for co in range(Cout):
                for dh in range(kh):
                    for n in range(N):
                        for hi in range(H_in):
                            ho = sh * hi - ph + dh
                            if 0 <= ho < H_out:
                                L[dw * R_out + (co * N + n) * H_out + ho,
                                  (ci * N + n) * H_in + hi] += w[ci, co, dh, dw]
    B = np.zeros((R_out, W_out), np.float32)
    if b is not None:
        for co in range(Cout):
            B[co * N * H_out:(co + 1) * N * H_out, :] = b[co]
    return L, R, B, (kw, R_out, W_out), H_out, W_out


def _fc_enc_factors(fc_w, fc_b, N, H, W):
    """Flatten + Linear(H*W -> F): row layout (N*H, W) -> (N, F)."""
    F = fc_w.shape[0]
    P = np.zeros((H * N, N * H), np.float32)
    Q = np.zeros((W, H * F), np.float32)
    for h in range(H):
        for n in range(N):
            P[h * N + n, n * H + h] = 1.0
        for wv in range(W):
            for j in range(F):
                Q[wv, h * F + j] = fc_w[j, h * W + wv]
    B = np.tile(np.asarray(fc_b, np.float32)[None, :], (N, 1))
    return P, Q, B, (H, N, F)


def _fc_dec_factors(fc_w, fc_b, N, H, W):
    """Linear(F -> H*W) + Unflatten: (N, F) -> row layout (N*H, W)."""
    HW, F = fc_w.shape
    assert HW == H * W
    U = np.zeros((H * N * H, N), np.float32)
    for h in range(H):
        for n in range(N):
            U[h * (N * H) + n * H + h, n] = 1.0
    V = np.asarray(fc_w, np.float32).T.copy()                 # (F, H*W)
    B = np.tile(np.asarray(fc_b, np.float32).reshape(H, W), (N, 1))
    return U, V, B, (H, N * H, W)


def prepare_params(params, N, n_clusters, alpha=1.0):
    """One-time prep: every conv / transposed conv / linear layer is factored
    into (L, Rcat, B) operators. Nothing here re-runs per forward step."""
    p = {k: np.asarray(v, np.float32) for k, v in params.items()}
    ops = []
    layers = {}

    def add(*arrs):
        for a in arrs:
            ops.append(jnp.asarray(a, jnp.float32))

    # ---- Encoder convs: Conv2d(1->8),(8->8),(8->8), k=(2,4), s=(1,2), p=1 ----
    H, W = 4, 101
    L, R, B, dims, H, W = _conv_factors(p["e_conv1_w"], p["e_conv1_b"], N, H, W, (1, 2), (1, 1))
    add(L, R, B); layers["conv1"] = dims
    L, R, B, dims, H, W = _conv_factors(p["e_conv2_w"], p["e_conv2_b"], N, H, W, (1, 2), (1, 1))
    add(L, R, B); layers["conv2"] = dims
    L, R, B, dims, H, W = _conv_factors(p["e_conv3_w"], p["e_conv3_b"], N, H, W, (1, 2), (1, 1))
    add(L, R, B); layers["conv3"] = dims
    C_enc, H_enc, W_enc = int(p["e_conv3_w"].shape[0]), H, W      # (8, 7, 12)

    # ---- Spatial attention conv (2->1, 3x3, pad 1, no bias): one L per input channel ----
    Lm, Rsa, _, dims_sa, _, _ = _conv_factors(p["sa_conv_w"][:, 0:1], None, N, H, W, (1, 1), (1, 1))
    Lx, _, _, _, _, _ = _conv_factors(p["sa_conv_w"][:, 1:2], None, N, H, W, (1, 1), (1, 1))
    add(Lm, Lx, Rsa); layers["sa"] = dims_sa

    # ---- Encoder Linear(84 -> 9) ----
    P, Q, Bz, dims_fc = _fc_enc_factors(p["e_fc_w"], p["e_fc_b"], N, H, W)
    add(P, Q, Bz); layers["efc"] = dims_fc

    # ---- Clustering centroids ----
    mu = p["cluster_w"]
    add(mu.T.copy(), np.sum(mu * mu, axis=1)[None, :])

    # ---- Decoder Linear(9 -> 84) -> (1, 7, 12) ----
    U, V, Bd, dims_dfc = _fc_dec_factors(p["d_fc_w"], p["d_fc_b"], N, 7, 12)
    add(U, V, Bd); layers["dfc"] = dims_dfc

    # ---- Decoder transposed convs ----
    H, W = 7, 12
    L, R, _, dims, H, W = _convT_factors(p["d_ct1_w"], None, N, H, W, (1, 1), (1, 1), (0, 0))
    add(L, R); layers["ct1"] = dims
    L, R, B, dims, H, W = _convT_factors(p["d_ct2_w"], p["d_ct2_b"], N, H, W, (1, 2), (1, 1), (0, 1))
    add(L, R, B); layers["ct2"] = dims
    L, R, B, dims, H, W = _convT_factors(p["d_ct3_w"], p["d_ct3_b"], N, H, W, (1, 2), (1, 1), (0, 0))
    add(L, R, B); layers["ct3"] = dims
    L, R, B, dims, H, W = _convT_factors(p["d_ct4_w"], p["d_ct4_b"], N, H, W, (1, 2), (1, 1), (0, 1))
    add(L, R, B); layers["ct4"] = dims

    meta = {
        "N": int(N), "K": int(n_clusters), "alpha": float(alpha),
        "F": int(p["e_fc_w"].shape[0]),
        "C_enc": C_enc, "H_enc": int(H_enc), "W_enc": int(W_enc),
        "H_in": 4, "W_in": 101, "H_out": int(H), "W_out": int(W),
        "layers": layers,
    }
    return tuple(ops), meta


# ---------------------------------------------------------------------------
# Fused Pallas kernel
# ---------------------------------------------------------------------------
def _factored_layer(x, l_ref, r_ref, k, r_out, w_out):
    """sum_t  L[t] @ (x @ Rcat)[:, t*w_out:(t+1)*w_out]  -- all 2-D MXU matmuls.
    Per-tap L blocks are read through static ref slices (free views)."""
    y = jnp.dot(x, r_ref[...], preferred_element_type=jnp.float32)
    acc = None
    for t in range(k):
        part = jnp.dot(l_ref[pl.ds(t * r_out, r_out), :],
                       y[:, t * w_out:(t + 1) * w_out],
                       preferred_element_type=jnp.float32)
        acc = part if acc is None else acc + part
    return acc


def _make_kernel(meta):
    N = meta["N"]
    alpha = meta["alpha"]
    C_enc, H_enc = meta["C_enc"], meta["H_enc"]
    ly = meta["layers"]

    def kernel(*refs):
        (x_ref,
         l1, r1, b1, l2, r2, b2, l3, r3, b3,
         lm, lx, rsa,
         fp, fq, fb,
         mut, musq,
         du, dv, db,
         lt1, rt1, lt2, rt2, bt2, lt3, rt3, bt3, lt4, rt4, bt4,
         q_ref, xrec_ref, z_ref) = refs

        def relu(v):
            return jnp.maximum(v, 0.0)

        # -------- Encoder: three strided convs --------
        h = relu(_factored_layer(x_ref[...], l1, r1, *ly["conv1"]) + b1[...])
        h = relu(_factored_layer(h, l2, r2, *ly["conv2"]) + b2[...])
        h = relu(_factored_layer(h, l3, r3, *ly["conv3"]) + b3[...])

        # -------- Spatial attention: channel mean/max (contiguous row blocks) --------
        nh = N * H_enc
        mean_r = h[0:nh, :]
        max_r = h[0:nh, :]
        for c in range(1, C_enc):
            blk = h[c * nh:(c + 1) * nh, :]
            mean_r = mean_r + blk
            max_r = jnp.maximum(max_r, blk)
        mean_r = mean_r * (1.0 / C_enc)
        sa = (_factored_layer(mean_r, lm, rsa, *ly["sa"]) +
              _factored_layer(max_r, lx, rsa, *ly["sa"]))
        att = sa * pl.reciprocal(1.0 + jnp.exp(-sa), approx=True)          # SiLU

        # -------- Encoder FC -> latent z (N, F) --------
        z = relu(_factored_layer(att, fp, fq, *ly["efc"]) + fb[...])

        # -------- Clustering: Student-t soft assignments --------
        zz = jnp.sum(z * z, axis=1, keepdims=True)
        dist = (zz - 2.0 * jnp.dot(z, mut[...], preferred_element_type=jnp.float32)
                + musq[...])
        qv = pl.reciprocal(1.0 + dist * (1.0 / alpha), approx=True)
        expo = (alpha + 1.0) / 2.0
        if abs(expo - 1.0) > 1e-12:                     # skipped for alpha == 1
            qv = jnp.power(qv, expo)
        s = jnp.sum(qv, axis=1, keepdims=True)
        r = pl.reciprocal(s, approx=True)
        r = r * (2.0 - s * r)           # one Newton step -> near-exact row normalization
        qv = qv * r

        # -------- Decoder: FC + four transposed convs --------
        d = relu(_factored_layer(z, du, dv, *ly["dfc"]) + db[...])
        d = relu(_factored_layer(d, lt1, rt1, *ly["ct1"]))
        d = relu(_factored_layer(d, lt2, rt2, *ly["ct2"]) + bt2[...])
        d = relu(_factored_layer(d, lt3, rt3, *ly["ct3"]) + bt3[...])
        xr = relu(_factored_layer(d, lt4, rt4, *ly["ct4"]) + bt4[...])

        q_ref[...] = qv
        z_ref[...] = z
        xrec_ref[...] = xr

    return kernel


def dec_forward(x, ops, meta):
    N, C, H0, W0 = x.shape
    assert (N, C, H0, W0) == (meta["N"], 1, meta["H_in"], meta["W_in"])
    x_rows = x.reshape(N * H0, W0).astype(jnp.float32)        # row layout (C == 1)

    inputs = (x_rows,) + tuple(ops)
    out_shape = (
        jax.ShapeDtypeStruct((N, meta["K"]), jnp.float32),                      # q
        jax.ShapeDtypeStruct((N * meta["H_out"], meta["W_out"]), jnp.float32),  # xrec rows
        jax.ShapeDtypeStruct((N, meta["F"]), jnp.float32),                      # z
    )

    def full_spec(shape):
        nd = len(shape)
        return pl.BlockSpec(tuple(shape), lambda i, nd=nd: (0,) * nd)

    q, xrec_rows, z = pl.pallas_call(
        _make_kernel(meta),
        out_shape=out_shape,
        grid=(1,),
        in_specs=[full_spec(a.shape) for a in inputs],
        out_specs=tuple(full_spec(s.shape) for s in out_shape),
        compiler_params=pltpu.CompilerParams(dimension_semantics=("arbitrary",)),
    )(*inputs)
    return q, xrec_rows.reshape(N, 1, meta["H_out"], meta["W_out"]), z


# ---------------------------------------------------------------------------
# Deterministic parameter init (shapes match the PyTorch module)
# ---------------------------------------------------------------------------
def init_params(key, n_clusters):
    keys = jax.random.split(key, 20)

    def u(k, shape, fan_in):
        bound = float(fan_in) ** -0.5
        return jax.random.uniform(k, shape, jnp.float32, -bound, bound)

    p = {}
    p["e_conv1_w"] = u(keys[0], (8, 1, 2, 4), 1 * 2 * 4)
    p["e_conv1_b"] = u(keys[1], (8,), 1 * 2 * 4)
    p["e_conv2_w"] = u(keys[2], (8, 8, 2, 4), 8 * 2 * 4)
    p["e_conv2_b"] = u(keys[3], (8,), 8 * 2 * 4)
    p["e_conv3_w"] = u(keys[4], (8, 8, 2, 4), 8 * 2 * 4)
    p["e_conv3_b"] = u(keys[5], (8,), 8 * 2 * 4)
    p["sa_conv_w"] = u(keys[6], (1, 2, 3, 3), 2 * 3 * 3)       # bias=False
    p["e_fc_w"] = u(keys[7], (9, 84), 84)
    p["e_fc_b"] = u(keys[8], (9,), 84)
    p["d_fc_w"] = u(keys[9], (84, 9), 9)
    p["d_fc_b"] = u(keys[10], (84,), 9)
    p["d_ct1_w"] = u(keys[11], (1, 8, 3, 3), 8 * 3 * 3)        # bias=False
    p["d_ct2_w"] = u(keys[12], (8, 8, 2, 4), 8 * 2 * 4)
    p["d_ct2_b"] = u(keys[13], (8,), 8 * 2 * 4)
    p["d_ct3_w"] = u(keys[14], (8, 8, 2, 4), 8 * 2 * 4)
    p["d_ct3_b"] = u(keys[15], (8,), 8 * 2 * 4)
    p["d_ct4_w"] = u(keys[16], (8, 1, 2, 4), 1 * 2 * 4)
    p["d_ct4_b"] = u(keys[17], (1,), 1 * 2 * 4)
    gain = (6.0 / (n_clusters + 9)) ** 0.5
    p["cluster_w"] = jax.random.uniform(keys[18], (n_clusters, 9), jnp.float32, -gain, gain)
    return p


if __name__ == "__main__":
    n_clusters = 5
    key = jax.random.PRNGKey(0)
    k_x, k_p = jax.random.split(key)

    # Input spatial shape (4, 101) is forced by the module: three (2,4)/(1,2)
    # convs + 3x3 attention conv must land on (7, 12) = 84 = Linear(84, 9) input.
    x = jax.random.normal(k_x, (2, 1, 4, 101), dtype=jnp.float32)
    params = init_params(k_p, n_clusters)

    # One-time preparation: all weight reshaping / geometry folding hoisted here.
    ops, meta = prepare_params(params, N=x.shape[0], n_clusters=n_clusters, alpha=1.0)

    fwd = jax.jit(functools.partial(dec_forward, meta=meta))
    q, xrec, z = fwd(x, ops)
    q, xrec, z = jax.block_until_ready((q, xrec, z))

    assert q.shape == (2, n_clusters)
    assert xrec.shape == (2, 1, 4, 101)
    assert z.shape == (2, 9)
    # soft assignments: non-negative and summing to 1 per sample
    assert bool(jnp.all(q >= 0.0))
    assert bool(jnp.all(jnp.abs(jnp.sum(q, axis=1) - 1.0) < 1e-4))
    assert bool(jnp.all(jnp.isfinite(xrec))) and bool(jnp.all(jnp.isfinite(z)))

    print("KERNEL_OK")
</pallas_src>

<mosaic_0001>
module attributes {stable_mosaic.version = 11 : i64} {
  func.func @kernel(%arg0: i32, %arg1: memref<8x101xf32, #tpu.memory_space<vmem>>, %arg2: memref<320x8xf32, #tpu.memory_space<vmem>>, %arg3: memref<101x200xf32, #tpu.memory_space<vmem>>, %arg4: memref<80x50xf32, #tpu.memory_space<vmem>>, %arg5: memref<384x80xf32, #tpu.memory_space<vmem>>, %arg6: memref<50x100xf32, #tpu.memory_space<vmem>>, %arg7: memref<96x25xf32, #tpu.memory_space<vmem>>, %arg8: memref<448x96xf32, #tpu.memory_space<vmem>>, %arg9: memref<25x48xf32, #tpu.memory_space<vmem>>, %arg10: memref<112x12xf32, #tpu.memory_space<vmem>>, %arg11: memref<42x14xf32, #tpu.memory_space<vmem>>, %arg12: memref<42x14xf32, #tpu.memory_space<vmem>>, %arg13: memref<12x36xf32, #tpu.memory_space<vmem>>, %arg14: memref<14x14xf32, #tpu.memory_space<vmem>>, %arg15: memref<12x63xf32, #tpu.memory_space<vmem>>, %arg16: memref<2x9xf32, #tpu.memory_space<vmem>>, %arg17: memref<9x5xf32, #tpu.memory_space<vmem>>, %arg18: memref<1x5xf32, #tpu.memory_space<vmem>>, %arg19: memref<98x2xf32, #tpu.memory_space<vmem>>, %arg20: memref<9x84xf32, #tpu.memory_space<vmem>>, %arg21: memref<14x12xf32, #tpu.memory_space<vmem>>, %arg22: memref<336x14xf32, #tpu.memory_space<vmem>>, %arg23: memref<12x36xf32, #tpu.memory_space<vmem>>, %arg24: memref<384x112xf32, #tpu.memory_space<vmem>>, %arg25: memref<12x100xf32, #tpu.memory_space<vmem>>, %arg26: memref<96x25xf32, #tpu.memory_space<vmem>>, %arg27: memref<320x96xf32, #tpu.memory_space<vmem>>, %arg28: memref<25x200xf32, #tpu.memory_space<vmem>>, %arg29: memref<80x50xf32, #tpu.memory_space<vmem>>, %arg30: memref<32x80xf32, #tpu.memory_space<vmem>>, %arg31: memref<50x404xf32, #tpu.memory_space<vmem>>, %arg32: memref<8x101xf32, #tpu.memory_space<vmem>>, %arg33: memref<2x5xf32, #tpu.memory_space<vmem>>, %arg34: memref<8x101xf32, #tpu.memory_space<vmem>>, %arg35: memref<2x9xf32, #tpu.memory_space<vmem>>) attributes {dimension_semantics = [#tpu.dimension_semantics<arbitrary>], iteration_bounds = array<i64: 1>, scalar_prefetch = 0 : i64, scratch_operands = 0 : i64, tpu.core_type = #tpu.core_type<tc>, window_params = [{pipeline_mode = #tpu.pipeline_mode<synchronous>, transform_indices = @transform_0, window_bounds = array<i64: 8, 101>}, {pipeline_mode = #tpu.pipeline_mode<synchronous>, transform_indices = @transform_1, window_bounds = array<i64: 320, 8>}, {pipeline_mode = #tpu.pipeline_mode<synchronous>, transform_indices = @transform_2, window_bounds = array<i64: 101, 200>}, {pipeline_mode = #tpu.pipeline_mode<synchronous>, transform_indices = @transform_3, window_bounds = array<i64: 80, 50>}, {pipeline_mode = #tpu.pipeline_mode<synchronous>, transform_indices = @transform_4, window_bounds = array<i64: 384, 80>}, {pipeline_mode = #tpu.pipeline_mode<synchronous>, transform_indices = @transform_5, window_bounds = array<i64: 50, 100>}, {pipeline_mode = #tpu.pipeline_mode<synchronous>, transform_indices = @transform_6, window_bounds = array<i64: 96, 25>}, {pipeline_mode = #tpu.pipeline_mode<synchronous>, transform_indices = @transform_7, window_bounds = array<i64: 448, 96>}, {pipeline_mode = #tpu.pipeline_mode<synchronous>, transform_indices = @transform_8, window_bounds = array<i64: 25, 48>}, {pipeline_mode = #tpu.pipeline_mode<synchronous>, transform_indices = @transform_9, window_bounds = array<i64: 112, 12>}, {pipeline_mode = #tpu.pipeline_mode<synchronous>, transform_indices = @transform_10, window_bounds = array<i64: 42, 14>}, {pipeline_mode = #tpu.pipeline_mode<synchronous>, transform_indices = @transform_11, window_bounds = array<i64: 42, 14>}, {pipeline_mode = #tpu.pipeline_mode<synchronous>, transform_indices = @transform_12, window_bounds = array<i64: 12, 36>}, {pipeline_mode = #tpu.pipeline_mode<synchronous>, transform_indices = @transform_13, window_bounds = array<i64: 14, 14>}, {pipeline_mode = #tpu.pipeline_mode<synchronous>, transform_indices = @transform_14, window_bounds = array<i64: 12, 63>}, {pipeline_mode = #tpu.pipeline_mode<synchronous>, transform_indices = @transform_15, window_bounds = array<i64: 2, 9>}, {pipeline_mode = #tpu.pipeline_mode<synchronous>, transform_indices = @transform_16, window_bounds = array<i64: 9, 5>}, {pipeline_mode = #tpu.pipeline_mode<synchronous>, transform_indices = @transform_17, window_bounds = array<i64: 1, 5>}, {pipeline_mode = #tpu.pipeline_mode<synchronous>, transform_indices = @transform_18, window_bounds = array<i64: 98, 2>}, {pipeline_mode = #tpu.pipeline_mode<synchronous>, transform_indices = @transform_19, window_bounds = array<i64: 9, 84>}, {pipeline_mode = #tpu.pipeline_mode<synchronous>, transform_indices = @transform_20, window_bounds = array<i64: 14, 12>}, {pipeline_mode = #tpu.pipeline_mode<synchronous>, transform_indices = @transform_21, window_bounds = array<i64: 336, 14>}, {pipeline_mode = #tpu.pipeline_mode<synchronous>, transform_indices = @transform_22, window_bounds = array<i64: 12, 36>}, {pipeline_mode = #tpu.pipeline_mode<synchronous>, transform_indices = @transform_23, window_bounds = array<i64: 384, 112>}, {pipeline_mode = #tpu.pipeline_mode<synchronous>, transform_indices = @transform_24, window_bounds = array<i64: 12, 100>}, {pipeline_mode = #tpu.pipeline_mode<synchronous>, transform_indices = @transform_25, window_bounds = array<i64: 96, 25>}, {pipeline_mode = #tpu.pipeline_mode<synchronous>, transform_indices = @transform_26, window_bounds = array<i64: 320, 96>}, {pipeline_mode = #tpu.pipeline_mode<synchronous>, transform_indices = @transform_27, window_bounds = array<i64: 25, 200>}, {pipeline_mode = #tpu.pipeline_mode<synchronous>, transform_indices = @transform_28, window_bounds = array<i64: 80, 50>}, {pipeline_mode = #tpu.pipeline_mode<synchronous>, transform_indices = @transform_29, window_bounds = array<i64: 32, 80>}, {pipeline_mode = #tpu.pipeline_mode<synchronous>, transform_indices = @transform_30, window_bounds = array<i64: 50, 404>}, {pipeline_mode = #tpu.pipeline_mode<synchronous>, transform_indices = @transform_31, window_bounds = array<i64: 8, 101>}, {pipeline_mode = #tpu.pipeline_mode<synchronous>, transform_indices = @transform_32, window_bounds = array<i64: 2, 5>}, {pipeline_mode = #tpu.pipeline_mode<synchronous>, transform_indices = @transform_33, window_bounds = array<i64: 8, 101>}, {pipeline_mode = #tpu.pipeline_mode<synchronous>, transform_indices = @transform_34, window_bounds = array<i64: 2, 9>}]} {
    %c0 = arith.constant 0 : index
    %c0_0 = arith.constant 0 : index
    %0 = vector.load %arg1[%c0, %c0_0] : memref<8x101xf32, #tpu.memory_space<vmem>>, vector<8x101xf32>
    %c0_1 = arith.constant 0 : index
    %c0_2 = arith.constant 0 : index
    %1 = vector.load %arg3[%c0_1, %c0_2] : memref<101x200xf32, #tpu.memory_space<vmem>>, vector<101x200xf32>
    %cst = arith.constant dense<0.000000e+00> : vector<8x200xf32>
    %2 = tpu.matmul %0, %1, %cst {dimension_numbers = #tpu.dot_dimension_numbers<[1], [0], [0], [1], [0, 0, 1, 1], [], []>} : vector<8x101xf32>, vector<101x200xf32>, vector<8x200xf32> -> vector<8x200xf32>
    %c0_3 = arith.constant 0 : index
    %c0_4 = arith.constant 0 : index
    %3 = vector.load %arg2[%c0_3, %c0_4] : memref<320x8xf32, #tpu.memory_space<vmem>>, vector<80x8xf32>
    %4 = vector.extract_strided_slice %2 {offsets = [0, 0], sizes = [8, 50], strides = [1, 1]} : vector<8x200xf32> to vector<8x50xf32>
    %cst_5 = arith.constant dense<0.000000e+00> : vector<80x50xf32>
    %5 = tpu.matmul %3, %4, %cst_5 {dimension_numbers = #tpu.dot_dimension_numbers<[1], [0], [0], [1], [0, 0, 1, 1], [], []>} : vector<80x8xf32>, vector<8x50xf32>, vector<80x50xf32> -> vector<80x50xf32>
    %c80 = arith.constant 80 : index
    %c0_6 = arith.constant 0 : index
    %6 = vector.load %arg2[%c80, %c0_6] : memref<320x8xf32, #tpu.memory_space<vmem>>, vector<80x8xf32>
    %7 = vector.extract_strided_slice %2 {offsets = [0, 50], sizes = [8, 50], strides = [1, 1]} : vector<8x200xf32> to vector<8x50xf32>
    %cst_7 = arith.constant dense<0.000000e+00> : vector<80x50xf32>
    %8 = tpu.matmul %6, %7, %cst_7 {dimension_numbers = #tpu.dot_dimension_numbers<[1], [0], [0], [1], [0, 0, 1, 1], [], []>} : vector<80x8xf32>, vector<8x50xf32>, vector<80x50xf32> -> vector<80x50xf32>
    %9 = arith.addf %5, %8 : vector<80x50xf32>
    %c160 = arith.constant 160 : index
    %c0_8 = arith.constant 0 : index
    %10 = vector.load %arg2[%c160, %c0_8] : memref<320x8xf32, #tpu.memory_space<vmem>>, vector<80x8xf32>
    %11 = vector.extract_strided_slice %2 {offsets = [0, 100], sizes = [8, 50], strides = [1, 1]} : vector<8x200xf32> to vector<8x50xf32>
    %cst_9 = arith.constant dense<0.000000e+00> : vector<80x50xf32>
    %12 = tpu.matmul %10, %11, %cst_9 {dimension_numbers = #tpu.dot_dimension_numbers<[1], [0], [0], [1], [0, 0, 1, 1], [], []>} : vector<80x8xf32>, vector<8x50xf32>, vector<80x50xf32> -> vector<80x50xf32>
    %13 = arith.addf %9, %12 : vector<80x50xf32>
    %c240 = arith.constant 240 : index
    %c0_10 = arith.constant 0 : index
    %14 = vector.load %arg2[%c240, %c0_10] : memref<320x8xf32, #tpu.memory_space<vmem>>, vector<80x8xf32>
    %15 = vector.extract_strided_slice %2 {offsets = [0, 150], sizes = [8, 50], strides = [1, 1]} : vector<8x200xf32> to vector<8x50xf32>
    %cst_11 = arith.constant dense<0.000000e+00> : vector<80x50xf32>
    %16 = tpu.matmul %14, %15, %cst_11 {dimension_numbers = #tpu.dot_dimension_numbers<[1], [0], [0], [1], [0, 0, 1, 1], [], []>} : vector<80x8xf32>, vector<8x50xf32>, vector<80x50xf32> -> vector<80x50xf32>
    %17 = arith.addf %13, %16 : vector<80x50xf32>
    %c0_12 = arith.constant 0 : index
    %c0_13 = arith.constant 0 : index
    %18 = vector.load %arg4[%c0_12, %c0_13] : memref<80x50xf32, #tpu.memory_space<vmem>>, vector<80x50xf32>
    %19 = arith.addf %17, %18 : vector<80x50xf32>
    %cst_14 = arith.constant 0.000000e+00 : f32
    %20 = vector.broadcast %cst_14 : f32 to vector<80x50xf32>
    %21 = arith.maximumf %19, %20 : vector<80x50xf32>
    %c0_15 = arith.constant 0 : index
    %c0_16 = arith.constant 0 : index
    %22 = vector.load %arg6[%c0_15, %c0_16] : memref<50x100xf32, #tpu.memory_space<vmem>>, vector<50x100xf32>
    %cst_17 = arith.constant dense<0.000000e+00> : vector<80x100xf32>
    %23 = tpu.matmul %21, %22, %cst_17 {dimension_numbers = #tpu.dot_dimension_numbers<[1], [0], [0], [1], [0, 0, 1, 1], [], []>} : vector<80x50xf32>, vector<50x100xf32>, vector<80x100xf32> -> vector<80x100xf32>
    %c0_18 = arith.constant 0 : index
    %c0_19 = arith.constant 0 : index
    %24 = vector.load %arg5[%c0_18, %c0_19] : memref<384x80xf32, #tpu.memory_space<vmem>>, vector<96x80xf32>
    %25 = vector.extract_strided_slice %23 {offsets = [0, 0], sizes = [80, 25], strides = [1, 1]} : vector<80x100xf32> to vector<80x25xf32>
    %cst_20 = arith.constant dense<0.000000e+00> : vector<96x25xf32>
    %26 = tpu.matmul %24, %25, %cst_20 {dimension_numbers = #tpu.dot_dimension_numbers<[1], [0], [0], [1], [0, 0, 1, 1], [], []>} : vector<96x80xf32>, vector<80x25xf32>, vector<96x25xf32> -> vector<96x25xf32>
    %c96 = arith.constant 96 : index
    %c0_21 = arith.constant 0 : index
    %27 = vector.load %arg5[%c96, %c0_21] : memref<384x80xf32, #tpu.memory_space<vmem>>, vector<96x80xf32>
    %28 = vector.extract_strided_slice %23 {offsets = [0, 25], sizes = [80, 25], strides = [1, 1]} : vector<80x100xf32> to vector<80x25xf32>
    %cst_22 = arith.constant dense<0.000000e+00> : vector<96x25xf32>
    %29 = tpu.matmul %27, %28, %cst_22 {dimension_numbers = #tpu.dot_dimension_numbers<[1], [0], [0], [1], [0, 0, 1, 1], [], []>} : vector<96x80xf32>, vector<80x25xf32>, vector<96x25xf32> -> vector<96x25xf32>
    %30 = arith.addf %26, %29 : vector<96x25xf32>
    %c192 = arith.constant 192 : index
    %c0_23 = arith.constant 0 : index
    %31 = vector.load %arg5[%c192, %c0_23] : memref<384x80xf32, #tpu.memory_space<vmem>>, vector<96x80xf32>
    %32 = vector.extract_strided_slice %23 {offsets = [0, 50], sizes = [80, 25], strides = [1, 1]} : vector<80x100xf32> to vector<80x25xf32>
    %cst_24 = arith.constant dense<0.000000e+00> : vector<96x25xf32>
    %33 = tpu.matmul %31, %32, %cst_24 {dimension_numbers = #tpu.dot_dimension_numbers<[1], [0], [0], [1], [0, 0, 1, 1], [], []>} : vector<96x80xf32>, vector<80x25xf32>, vector<96x25xf32> -> vector<96x25xf32>
    %34 = arith.addf %30, %33 : vector<96x25xf32>
    %c288 = arith.constant 288 : index
    %c0_25 = arith.constant 0 : index
    %35 = vector.load %arg5[%c288, %c0_25] : memref<384x80xf32, #tpu.memory_space<vmem>>, vector<96x80xf32>
    %36 = vector.extract_strided_slice %23 {offsets = [0, 75], sizes = [80, 25], strides = [1, 1]} : vector<80x100xf32> to vector<80x25xf32>
    %cst_26 = arith.constant dense<0.000000e+00> : vector<96x25xf32>
    %37 = tpu.matmul %35, %36, %cst_26 {dimension_numbers = #tpu.dot_dimension_numbers<[1], [0], [0], [1], [0, 0, 1, 1], [], []>} : vector<96x80xf32>, vector<80x25xf32>, vector<96x25xf32> -> vector<96x25xf32>
    %38 = arith.addf %34, %37 : vector<96x25xf32>
    %c0_27 = arith.constant 0 : index
    %c0_28 = arith.constant 0 : index
    %39 = vector.load %arg7[%c0_27, %c0_28] : memref<96x25xf32, #tpu.memory_space<vmem>>, vector<96x25xf32>
    %40 = arith.addf %38, %39 : vector<96x25xf32>
    %cst_29 = arith.constant 0.000000e+00 : f32
    %41 = vector.broadcast %cst_29 : f32 to vector<96x25xf32>
    %42 = arith.maximumf %40, %41 : vector<96x25xf32>
    %c0_30 = arith.constant 0 : index
    %c0_31 = arith.constant 0 : index
    %43 = vector.load %arg9[%c0_30, %c0_31] : memref<25x48xf32, #tpu.memory_space<vmem>>, vector<25x48xf32>
    %cst_32 = arith.constant dense<0.000000e+00> : vector<96x48xf32>
    %44 = tpu.matmul %42, %43, %cst_32 {dimension_numbers = #tpu.dot_dimension_numbers<[1], [0], [0], [1], [0, 0, 1, 1], [], []>} : vector<96x25xf32>, vector<25x48xf32>, vector<96x48xf32> -> vector<96x48xf32>
    %c0_33 = arith.constant 0 : index
    %c0_34 = arith.constant 0 : index
    %45 = vector.load %arg8[%c0_33, %c0_34] : memref<448x96xf32, #tpu.memory_space<vmem>>, vector<112x96xf32>
    %46 = vector.extract_strided_slice %44 {offsets = [0, 0], sizes = [96, 12], strides = [1, 1]} : vector<96x48xf32> to vector<96x12xf32>
    %cst_35 = arith.constant dense<0.000000e+00> : vector<112x12xf32>
    %47 = tpu.matmul %45, %46, %cst_35 {dimension_numbers = #tpu.dot_dimension_numbers<[1], [0], [0], [1], [0, 0, 1, 1], [], []>} : vector<112x96xf32>, vector<96x12xf32>, vector<112x12xf32> -> vector<112x12xf32>
    %c112 = arith.constant 112 : index
    %c0_36 = arith.constant 0 : index
    %48 = vector.load %arg8[%c112, %c0_36] : memref<448x96xf32, #tpu.memory_space<vmem>>, vector<112x96xf32>
    %49 = vector.extract_strided_slice %44 {offsets = [0, 12], sizes = [96, 12], strides = [1, 1]} : vector<96x48xf32> to vector<96x12xf32>
    %cst_37 = arith.constant dense<0.000000e+00> : vector<112x12xf32>
    %50 = tpu.matmul %48, %49, %cst_37 {dimension_numbers = #tpu.dot_dimension_numbers<[1], [0], [0], [1], [0, 0, 1, 1], [], []>} : vector<112x96xf32>, vector<96x12xf32>, vector<112x12xf32> -> vector<112x12xf32>
    %51 = arith.addf %47, %50 : vector<112x12xf32>
    %c224 = arith.constant 224 : index
    %c0_38 = arith.constant 0 : index
    %52 = vector.load %arg8[%c224, %c0_38] : memref<448x96xf32, #tpu.memory_space<vmem>>, vector<112x96xf32>
    %53 = vector.extract_strided_slice %44 {offsets = [0, 24], sizes = [96, 12], strides = [1, 1]} : vector<96x48xf32> to vector<96x12xf32>
    %cst_39 = arith.constant dense<0.000000e+00> : vector<112x12xf32>
    %54 = tpu.matmul %52, %53, %cst_39 {dimension_numbers = #tpu.dot_dimension_numbers<[1], [0], [0], [1], [0, 0, 1, 1], [], []>} : vector<112x96xf32>, vector<96x12xf32>, vector<112x12xf32> -> vector<112x12xf32>
    %55 = arith.addf %51, %54 : vector<112x12xf32>
    %c336 = arith.constant 336 : index
    %c0_40 = arith.constant 0 : index
    %56 = vector.load %arg8[%c336, %c0_40] : memref<448x96xf32, #tpu.memory_space<vmem>>, vector<112x96xf32>
    %57 = vector.extract_strided_slice %44 {offsets = [0, 36], sizes = [96, 12], strides = [1, 1]} : vector<96x48xf32> to vector<96x12xf32>
    %cst_41 = arith.constant dense<0.000000e+00> : vector<112x12xf32>
    %58 = tpu.matmul %56, %57, %cst_41 {dimension_numbers = #tpu.dot_dimension_numbers<[1], [0], [0], [1], [0, 0, 1, 1], [], []>} : vector<112x96xf32>, vector<96x12xf32>, vector<112x12xf32> -> vector<112x12xf32>
    %59 = arith.addf %55, %58 : vector<112x12xf32>
    %c0_42 = arith.constant 0 : index
    %c0_43 = arith.constant 0 : index
    %60 = vector.load %arg10[%c0_42, %c0_43] : memref<112x12xf32, #tpu.memory_space<vmem>>, vector<112x12xf32>
    %61 = arith.addf %59, %60 : vector<112x12xf32>
    %cst_44 = arith.constant 0.000000e+00 : f32
    %62 = vector.broadcast %cst_44 : f32 to vector<112x12xf32>
    %63 = arith.maximumf %61, %62 : vector<112x12xf32>
    %64 = vector.extract_strided_slice %63 {offsets = [0, 0], sizes = [14, 12], strides = [1, 1]} : vector<112x12xf32> to vector<14x12xf32>
    %65 = vector.extract_strided_slice %63 {offsets = [0, 0], sizes = [14, 12], strides = [1, 1]} : vector<112x12xf32> to vector<14x12xf32>
    %66 = vector.extract_strided_slice %63 {offsets = [14, 0], sizes = [14, 12], strides = [1, 1]} : vector<112x12xf32> to vector<14x12xf32>
    %67 = arith.addf %64, %66 : vector<14x12xf32>
    %68 = arith.maximumf %65, %66 : vector<14x12xf32>
    %69 = vector.extract_strided_slice %63 {offsets = [28, 0], sizes = [14, 12], strides = [1, 1]} : vector<112x12xf32> to vector<14x12xf32>
    %70 = arith.addf %67, %69 : vector<14x12xf32>
    %71 = arith.maximumf %68, %69 : vector<14x12xf32>
    %72 = vector.extract_strided_slice %63 {offsets = [42, 0], sizes = [14, 12], strides = [1, 1]} : vector<112x12xf32> to vector<14x12xf32>
    %73 = arith.addf %70, %72 : vector<14x12xf32>
    %74 = arith.maximumf %71, %72 : vector<14x12xf32>
    %75 = vector.extract_strided_slice %63 {offsets = [56, 0], sizes = [14, 12], strides = [1, 1]} : vector<112x12xf32> to vector<14x12xf32>
    %76 = arith.addf %73, %75 : vector<14x12xf32>
    %77 = arith.maximumf %74, %75 : vector<14x12xf32>
    %78 = vector.extract_strided_slice %63 {offsets = [70, 0], sizes = [14, 12], strides = [1, 1]} : vector<112x12xf32> to vector<14x12xf32>
    %79 = arith.addf %76, %78 : vector<14x12xf32>
    %80 = arith.maximumf %77, %78 : vector<14x12xf32>
    %81 = vector.extract_strided_slice %63 {offsets = [84, 0], sizes = [14, 12], strides = [1, 1]} : vector<112x12xf32> to vector<14x12xf32>
    %82 = arith.addf %79, %81 : vector<14x12xf32>
    %83 = arith.maximumf %80, %81 : vector<14x12xf32>
    %84 = vector.extract_strided_slice %63 {offsets = [98, 0], sizes = [14, 12], strides = [1, 1]} : vector<112x12xf32> to vector<14x12xf32>
    %85 = arith.addf %82, %84 : vector<14x12xf32>
    %86 = arith.maximumf %83, %84 : vector<14x12xf32>
    %cst_45 = arith.constant 1.250000e-01 : f32
    %87 = vector.broadcast %cst_45 : f32 to vector<14x12xf32>
    %88 = arith.mulf %85, %87 : vector<14x12xf32>
    %c0_46 = arith.constant 0 : index
    %c0_47 = arith.constant 0 : index
    %89 = vector.load %arg13[%c0_46, %c0_47] : memref<12x36xf32, #tpu.memory_space<vmem>>, vector<12x36xf32>
    %cst_48 = arith.constant dense<0.000000e+00> : vector<14x36xf32>
    %90 = tpu.matmul %88, %89, %cst_48 {dimension_numbers = #tpu.dot_dimension_numbers<[1], [0], [0], [1], [0, 0, 1, 1], [], []>} : vector<14x12xf32>, vector<12x36xf32>, vector<14x36xf32> -> vector<14x36xf32>
    %c0_49 = arith.constant 0 : index
    %c0_50 = arith.constant 0 : index
    %91 = vector.load %arg11[%c0_49, %c0_50] : memref<42x14xf32, #tpu.memory_space<vmem>>, vector<14x14xf32>
    %92 = vector.extract_strided_slice %90 {offsets = [0, 0], sizes = [14, 12], strides = [1, 1]} : vector<14x36xf32> to vector<14x12xf32>
    %cst_51 = arith.constant dense<0.000000e+00> : vector<14x12xf32>
    %93 = tpu.matmul %91, %92, %cst_51 {dimension_numbers = #tpu.dot_dimension_numbers<[1], [0], [0], [1], [0, 0, 1, 1], [], []>} : vector<14x14xf32>, vector<14x12xf32>, vector<14x12xf32> -> vector<14x12xf32>
    %c14 = arith.constant 14 : index
    %c0_52 = arith.constant 0 : index
    %94 = vector.load %arg11[%c14, %c0_52] : memref<42x14xf32, #tpu.memory_space<vmem>>, vector<14x14xf32>
    %95 = vector.extract_strided_slice %90 {offsets = [0, 12], sizes = [14, 12], strides = [1, 1]} : vector<14x36xf32> to vector<14x12xf32>
    %cst_53 = arith.constant dense<0.000000e+00> : vector<14x12xf32>
    %96 = tpu.matmul %94, %95, %cst_53 {dimension_numbers = #tpu.dot_dimension_numbers<[1], [0], [0], [1], [0, 0, 1, 1], [], []>} : vector<14x14xf32>, vector<14x12xf32>, vector<14x12xf32> -> vector<14x12xf32>
    %97 = arith.addf %93, %96 : vector<14x12xf32>
    %c28 = arith.constant 28 : index
    %c0_54 = arith.constant 0 : index
    %98 = vector.load %arg11[%c28, %c0_54] : memref<42x14xf32, #tpu.memory_space<vmem>>, vector<14x14xf32>
    %99 = vector.extract_strided_slice %90 {offsets = [0, 24], sizes = [14, 12], strides = [1, 1]} : vector<14x36xf32> to vector<14x12xf32>
    %cst_55 = arith.constant dense<0.000000e+00> : vector<14x12xf32>
    %100 = tpu.matmul %98, %99, %cst_55 {dimension_numbers = #tpu.dot_dimension_numbers<[1], [0], [0], [1], [0, 0, 1, 1], [], []>} : vector<14x14xf32>, vector<14x12xf32>, vector<14x12xf32> -> vector<14x12xf32>
    %101 = arith.addf %97, %100 : vector<14x12xf32>
    %c0_56 = arith.constant 0 : index
    %c0_57 = arith.constant 0 : index
    %102 = vector.load %arg13[%c0_56, %c0_57] : memref<12x36xf32, #tpu.memory_space<vmem>>, vector<12x36xf32>
    %cst_58 = arith.constant dense<0.000000e+00> : vector<14x36xf32>
    %103 = tpu.matmul %86, %102, %cst_58 {dimension_numbers = #tpu.dot_dimension_numbers<[1], [0], [0], [1], [0, 0, 1, 1], [], []>} : vector<14x12xf32>, vector<12x36xf32>, vector<14x36xf32> -> vector<14x36xf32>
    %c0_59 = arith.constant 0 : index
    %c0_60 = arith.constant 0 : index
    %104 = vector.load %arg12[%c0_59, %c0_60] : memref<42x14xf32, #tpu.memory_space<vmem>>, vector<14x14xf32>
    %105 = vector.extract_strided_slice %103 {offsets = [0, 0], sizes = [14, 12], strides = [1, 1]} : vector<14x36xf32> to vector<14x12xf32>
    %cst_61 = arith.constant dense<0.000000e+00> : vector<14x12xf32>
    %106 = tpu.matmul %104, %105, %cst_61 {dimension_numbers = #tpu.dot_dimension_numbers<[1], [0], [0], [1], [0, 0, 1, 1], [], []>} : vector<14x14xf32>, vector<14x12xf32>, vector<14x12xf32> -> vector<14x12xf32>
    %c14_62 = arith.constant 14 : index
    %c0_63 = arith.constant 0 : index
    %107 = vector.load %arg12[%c14_62, %c0_63] : memref<42x14xf32, #tpu.memory_space<vmem>>, vector<14x14xf32>
    %108 = vector.extract_strided_slice %103 {offsets = [0, 12], sizes = [14, 12], strides = [1, 1]} : vector<14x36xf32> to vector<14x12xf32>
    %cst_64 = arith.constant dense<0.000000e+00> : vector<14x12xf32>
    %109 = tpu.matmul %107, %108, %cst_64 {dimension_numbers = #tpu.dot_dimension_numbers<[1], [0], [0], [1], [0, 0, 1, 1], [], []>} : vector<14x14xf32>, vector<14x12xf32>, vector<14x12xf32> -> vector<14x12xf32>
    %110 = arith.addf %106, %109 : vector<14x12xf32>
    %c28_65 = arith.constant 28 : index
    %c0_66 = arith.constant 0 : index
    %111 = vector.load %arg12[%c28_65, %c0_66] : memref<42x14xf32, #tpu.memory_space<vmem>>, vector<14x14xf32>
    %112 = vector.extract_strided_slice %103 {offsets = [0, 24], sizes = [14, 12], strides = [1, 1]} : vector<14x36xf32> to vector<14x12xf32>
    %cst_67 = arith.constant dense<0.000000e+00> : vector<14x12xf32>
    %113 = tpu.matmul %111, %112, %cst_67 {dimension_numbers = #tpu.dot_dimension_numbers<[1], [0], [0], [1], [0, 0, 1, 1], [], []>} : vector<14x14xf32>, vector<14x12xf32>, vector<14x12xf32> -> vector<14x12xf32>
    %114 = arith.addf %110, %113 : vector<14x12xf32>
    %115 = arith.addf %101, %114 : vector<14x12xf32>
    %cst_68 = arith.constant 0.000000e+00 : f32
    %116 = vector.broadcast %cst_68 : f32 to vector<14x12xf32>
    %117 = arith.subf %116, %115 : vector<14x12xf32>
    %118 = math.exp %117 : vector<14x12xf32>
    %cst_69 = arith.constant 1.000000e+00 : f32
    %119 = vector.broadcast %cst_69 : f32 to vector<14x12xf32>
    %120 = arith.addf %119, %118 : vector<14x12xf32>
    %121 = tpu.reciprocal %120 {approx = true} : vector<14x12xf32> -> vector<14x12xf32>
    %122 = arith.mulf %115, %121 : vector<14x12xf32>
    %c0_70 = arith.constant 0 : index
    %c0_71 = arith.constant 0 : index
    %123 = vector.load %arg15[%c0_70, %c0_71] : memref<12x63xf32, #tpu.memory_space<vmem>>, vector<12x63xf32>
    %cst_72 = arith.constant dense<0.000000e+00> : vector<14x63xf32>
    %124 = tpu.matmul %122, %123, %cst_72 {dimension_numbers = #tpu.dot_dimension_numbers<[1], [0], [0], [1], [0, 0, 1, 1], [], []>} : vector<14x12xf32>, vector<12x63xf32>, vector<14x63xf32> -> vector<14x63xf32>
    %c0_73 = arith.constant 0 : index
    %c0_74 = arith.constant 0 : index
    %125 = vector.load %arg14[%c0_73, %c0_74] : memref<14x14xf32, #tpu.memory_space<vmem>>, vector<2x14xf32>
    %126 = vector.extract_strided_slice %124 {offsets = [0, 0], sizes = [14, 9], strides = [1, 1]} : vector<14x63xf32> to vector<14x9xf32>
    %cst_75 = arith.constant dense<0.000000e+00> : vector<2x9xf32>
    %127 = tpu.matmul %125, %126, %cst_75 {dimension_numbers = #tpu.dot_dimension_numbers<[1], [0], [0], [1], [0, 0, 1, 1], [], []>} : vector<2x14xf32>, vector<14x9xf32>, vector<2x9xf32> -> vector<2x9xf32>
    %c2 = arith.constant 2 : index
    %c0_76 = arith.constant 0 : index
    %128 = vector.load %arg14[%c2, %c0_76] : memref<14x14xf32, #tpu.memory_space<vmem>>, vector<2x14xf32>
    %129 = vector.extract_strided_slice %124 {offsets = [0, 9], sizes = [14, 9], strides = [1, 1]} : vector<14x63xf32> to vector<14x9xf32>
    %cst_77 = arith.constant dense<0.000000e+00> : vector<2x9xf32>
    %130 = tpu.matmul %128, %129, %cst_77 {dimension_numbers = #tpu.dot_dimension_numbers<[1], [0], [0], [1], [0, 0, 1, 1], [], []>} : vector<2x14xf32>, vector<14x9xf32>, vector<2x9xf32> -> vector<2x9xf32>
    %131 = arith.addf %127, %130 : vector<2x9xf32>
    %c4 = arith.constant 4 : index
    %c0_78 = arith.constant 0 : index
    %132 = vector.load %arg14[%c4, %c0_78] : memref<14x14xf32, #tpu.memory_space<vmem>>, vector<2x14xf32>
    %133 = vector.extract_strided_slice %124 {offsets = [0, 18], sizes = [14, 9], strides = [1, 1]} : vector<14x63xf32> to vector<14x9xf32>
    %cst_79 = arith.constant dense<0.000000e+00> : vector<2x9xf32>
    %134 = tpu.matmul %132, %133, %cst_79 {dimension_numbers = #tpu.dot_dimension_numbers<[1], [0], [0], [1], [0, 0, 1, 1], [], []>} : vector<2x14xf32>, vector<14x9xf32>, vector<2x9xf32> -> vector<2x9xf32>
    %135 = arith.addf %131, %134 : vector<2x9xf32>
    %c6 = arith.constant 6 : index
    %c0_80 = arith.constant 0 : index
    %136 = vector.load %arg14[%c6, %c0_80] : memref<14x14xf32, #tpu.memory_space<vmem>>, vector<2x14xf32>
    %137 = vector.extract_strided_slice %124 {offsets = [0, 27], sizes = [14, 9], strides = [1, 1]} : vector<14x63xf32> to vector<14x9xf32>
    %cst_81 = arith.constant dense<0.000000e+00> : vector<2x9xf32>
    %138 = tpu.matmul %136, %137, %cst_81 {dimension_numbers = #tpu.dot_dimension_numbers<[1], [0], [0], [1], [0, 0, 1, 1], [], []>} : vector<2x14xf32>, vector<14x9xf32>, vector<2x9xf32> -> vector<2x9xf32>
    %139 = arith.addf %135, %138 : vector<2x9xf32>
    %c8 = arith.constant 8 : index
    %c0_82 = arith.constant 0 : index
    %140 = vector.load %arg14[%c8, %c0_82] : memref<14x14xf32, #tpu.memory_space<vmem>>, vector<2x14xf32>
    %141 = vector.extract_strided_slice %124 {offsets = [0, 36], sizes = [14, 9], strides = [1, 1]} : vector<14x63xf32> to vector<14x9xf32>
    %cst_83 = arith.constant dense<0.000000e+00> : vector<2x9xf32>
    %142 = tpu.matmul %140, %141, %cst_83 {dimension_numbers = #tpu.dot_dimension_numbers<[1], [0], [0], [1], [0, 0, 1, 1], [], []>} : vector<2x14xf32>, vector<14x9xf32>, vector<2x9xf32> -> vector<2x9xf32>
    %143 = arith.addf %139, %142 : vector<2x9xf32>
    %c10 = arith.constant 10 : index
    %c0_84 = arith.constant 0 : index
    %144 = vector.load %arg14[%c10, %c0_84] : memref<14x14xf32, #tpu.memory_space<vmem>>, vector<2x14xf32>
    %145 = vector.extract_strided_slice %124 {offsets = [0, 45], sizes = [14, 9], strides = [1, 1]} : vector<14x63xf32> to vector<14x9xf32>
    %cst_85 = arith.constant dense<0.000000e+00> : vector<2x9xf32>
    %146 = tpu.matmul %144, %145, %cst_85 {dimension_numbers = #tpu.dot_dimension_numbers<[1], [0], [0], [1], [0, 0, 1, 1], [], []>} : vector<2x14xf32>, vector<14x9xf32>, vector<2x9xf32> -> vector<2x9xf32>
    %147 = arith.addf %143, %146 : vector<2x9xf32>
    %c12 = arith.constant 12 : index
    %c0_86 = arith.constant 0 : index
    %148 = vector.load %arg14[%c12, %c0_86] : memref<14x14xf32, #tpu.memory_space<vmem>>, vector<2x14xf32>
    %149 = vector.extract_strided_slice %124 {offsets = [0, 54], sizes = [14, 9], strides = [1, 1]} : vector<14x63xf32> to vector<14x9xf32>
    %cst_87 = arith.constant dense<0.000000e+00> : vector<2x9xf32>
    %150 = tpu.matmul %148, %149, %cst_87 {dimension_numbers = #tpu.dot_dimension_numbers<[1], [0], [0], [1], [0, 0, 1, 1], [], []>} : vector<2x14xf32>, vector<14x9xf32>, vector<2x9xf32> -> vector<2x9xf32>
    %151 = arith.addf %147, %150 : vector<2x9xf32>
    %c0_88 = arith.constant 0 : index
    %c0_89 = arith.constant 0 : index
    %152 = vector.load %arg16[%c0_88, %c0_89] : memref<2x9xf32, #tpu.memory_space<vmem>>, vector<2x9xf32>
    %153 = arith.addf %151, %152 : vector<2x9xf32>
    %cst_90 = arith.constant 0.000000e+00 : f32
    %154 = vector.broadcast %cst_90 : f32 to vector<2x9xf32>
    %155 = arith.maximumf %153, %154 : vector<2x9xf32>
    %156 = arith.mulf %155, %155 : vector<2x9xf32>
    %cst_91 = arith.constant dense<0.000000e+00> : vector<2xf32>
    %157 = vector.multi_reduction <add>, %156, %cst_91 [1] : vector<2x9xf32> to vector<2xf32>
    %158 = vector.shape_cast %157 : vector<2xf32> to vector<2x1xf32>
    %c0_92 = arith.constant 0 : index
    %c0_93 = arith.constant 0 : index
    %159 = vector.load %arg17[%c0_92, %c0_93] : memref<9x5xf32, #tpu.memory_space<vmem>>, vector<9x5xf32>
    %cst_94 = arith.constant dense<0.000000e+00> : vector<2x5xf32>
    %160 = tpu.matmul %155, %159, %cst_94 {dimension_numbers = #tpu.dot_dimension_numbers<[1], [0], [0], [1], [0, 0, 1, 1], [], []>} : vector<2x9xf32>, vector<9x5xf32>, vector<2x5xf32> -> vector<2x5xf32>
    %cst_95 = arith.constant 2.000000e+00 : f32
    %161 = vector.broadcast %cst_95 : f32 to vector<2x5xf32>
    %162 = arith.mulf %161, %160 : vector<2x5xf32>
    %163 = vector.broadcast %158 : vector<2x1xf32> to vector<2x5xf32>
    %164 = arith.subf %163, %162 : vector<2x5xf32>
    %c0_96 = arith.constant 0 : index
    %c0_97 = arith.constant 0 : index
    %165 = vector.load %arg18[%c0_96, %c0_97] : memref<1x5xf32, #tpu.memory_space<vmem>>, vector<1x5xf32>
    %166 = vector.broadcast %165 : vector<1x5xf32> to vector<2x5xf32>
    %167 = arith.addf %164, %166 : vector<2x5xf32>
    %cst_98 = arith.constant 1.000000e+00 : f32
    %168 = vector.broadcast %cst_98 : f32 to vector<2x5xf32>
    %169 = arith.mulf %167, %168 : vector<2x5xf32>
    %cst_99 = arith.constant 1.000000e+00 : f32
    %170 = vector.broadcast %cst_99 : f32 to vector<2x5xf32>
    %171 = arith.addf %170, %169 : vector<2x5xf32>
    %172 = tpu.reciprocal %171 {approx = true} : vector<2x5xf32> -> vector<2x5xf32>
    %cst_100 = arith.constant dense<0.000000e+00> : vector<2xf32>
    %173 = vector.multi_reduction <add>, %172, %cst_100 [1] : vector<2x5xf32> to vector<2xf32>
    %174 = vector.shape_cast %173 : vector<2xf32> to vector<2x1xf32>
    %175 = tpu.reciprocal %174 {approx = true} : vector<2x1xf32> -> vector<2x1xf32>
    %176 = arith.mulf %174, %175 : vector<2x1xf32>
    %cst_101 = arith.constant 2.000000e+00 : f32
    %177 = vector.broadcast %cst_101 : f32 to vector<2x1xf32>
    %178 = arith.subf %177, %176 : vector<2x1xf32>
    %179 = arith.mulf %175, %178 : vector<2x1xf32>
    %180 = vector.broadcast %179 : vector<2x1xf32> to vector<2x5xf32>
    %181 = arith.mulf %172, %180 : vector<2x5xf32>
    %c0_102 = arith.constant 0 : index
    %c0_103 = arith.constant 0 : index
    %182 = vector.load %arg20[%c0_102, %c0_103] : memref<9x84xf32, #tpu.memory_space<vmem>>, vector<9x84xf32>
    %cst_104 = arith.constant dense<0.000000e+00> : vector<2x84xf32>
    %183 = tpu.matmul %155, %182, %cst_104 {dimension_numbers = #tpu.dot_dimension_numbers<[1], [0], [0], [1], [0, 0, 1, 1], [], []>} : vector<2x9xf32>, vector<9x84xf32>, vector<2x84xf32> -> vector<2x84xf32>
    %c0_105 = arith.constant 0 : index
    %c0_106 = arith.constant 0 : index
    %184 = vector.load %arg19[%c0_105, %c0_106] : memref<98x2xf32, #tpu.memory_space<vmem>>, vector<14x2xf32>
    %185 = vector.extract_strided_slice %183 {offsets = [0, 0], sizes = [2, 12], strides = [1, 1]} : vector<2x84xf32> to vector<2x12xf32>
    %cst_107 = arith.constant dense<0.000000e+00> : vector<14x12xf32>
    %186 = tpu.matmul %184, %185, %cst_107 {dimension_numbers = #tpu.dot_dimension_numbers<[1], [0], [0], [1], [0, 0, 1, 1], [], []>} : vector<14x2xf32>, vector<2x12xf32>, vector<14x12xf32> -> vector<14x12xf32>
    %c14_108 = arith.constant 14 : index
    %c0_109 = arith.constant 0 : index
    %187 = vector.load %arg19[%c14_108, %c0_109] : memref<98x2xf32, #tpu.memory_space<vmem>>, vector<14x2xf32>
    %188 = vector.extract_strided_slice %183 {offsets = [0, 12], sizes = [2, 12], strides = [1, 1]} : vector<2x84xf32> to vector<2x12xf32>
    %cst_110 = arith.constant dense<0.000000e+00> : vector<14x12xf32>
    %189 = tpu.matmul %187, %188, %cst_110 {dimension_numbers = #tpu.dot_dimension_numbers<[1], [0], [0], [1], [0, 0, 1, 1], [], []>} : vector<14x2xf32>, vector<2x12xf32>, vector<14x12xf32> -> vector<14x12xf32>
    %190 = arith.addf %186, %189 : vector<14x12xf32>
    %c28_111 = arith.constant 28 : index
    %c0_112 = arith.constant 0 : index
    %191 = vector.load %arg19[%c28_111, %c0_112] : memref<98x2xf32, #tpu.memory_space<vmem>>, vector<14x2xf32>
    %192 = vector.extract_strided_slice %183 {offsets = [0, 24], sizes = [2, 12], strides = [1, 1]} : vector<2x84xf32> to vector<2x12xf32>
    %cst_113 = arith.constant dense<0.000000e+00> : vector<14x12xf32>
    %193 = tpu.matmul %191, %192, %cst_113 {dimension_numbers = #tpu.dot_dimension_numbers<[1], [0], [0], [1], [0, 0, 1, 1], [], []>} : vector<14x2xf32>, vector<2x12xf32>, vector<14x12xf32> -> vector<14x12xf32>
    %194 = arith.addf %190, %193 : vector<14x12xf32>
    %c42 = arith.constant 42 : index
    %c0_114 = arith.constant 0 : index
    %195 = vector.load %arg19[%c42, %c0_114] : memref<98x2xf32, #tpu.memory_space<vmem>>, vector<14x2xf32>
    %196 = vector.extract_strided_slice %183 {offsets = [0, 36], sizes = [2, 12], strides = [1, 1]} : vector<2x84xf32> to vector<2x12xf32>
    %cst_115 = arith.constant dense<0.000000e+00> : vector<14x12xf32>
    %197 = tpu.matmul %195, %196, %cst_115 {dimension_numbers = #tpu.dot_dimension_numbers<[1], [0], [0], [1], [0, 0, 1, 1], [], []>} : vector<14x2xf32>, vector<2x12xf32>, vector<14x12xf32> -> vector<14x12xf32>
    %198 = arith.addf %194, %197 : vector<14x12xf32>
    %c56 = arith.constant 56 : index
    %c0_116 = arith.constant 0 : index
    %199 = vector.load %arg19[%c56, %c0_116] : memref<98x2xf32, #tpu.memory_space<vmem>>, vector<14x2xf32>
    %200 = vector.extract_strided_slice %183 {offsets = [0, 48], sizes = [2, 12], strides = [1, 1]} : vector<2x84xf32> to vector<2x12xf32>
    %cst_117 = arith.constant dense<0.000000e+00> : vector<14x12xf32>
    %201 = tpu.matmul %199, %200, %cst_117 {dimension_numbers = #tpu.dot_dimension_numbers<[1], [0], [0], [1], [0, 0, 1, 1], [], []>} : vector<14x2xf32>, vector<2x12xf32>, vector<14x12xf32> -> vector<14x12xf32>
    %202 = arith.addf %198, %201 : vector<14x12xf32>
    %c70 = arith.constant 70 : index
    %c0_118 = arith.constant 0 : index
    %203 = vector.load %arg19[%c70, %c0_118] : memref<98x2xf32, #tpu.memory_space<vmem>>, vector<14x2xf32>
    %204 = vector.extract_strided_slice %183 {offsets = [0, 60], sizes = [2, 12], strides = [1, 1]} : vector<2x84xf32> to vector<2x12xf32>
    %cst_119 = arith.constant dense<0.000000e+00> : vector<14x12xf32>
    %205 = tpu.matmul %203, %204, %cst_119 {dimension_numbers = #tpu.dot_dimension_numbers<[1], [0], [0], [1], [0, 0, 1, 1], [], []>} : vector<14x2xf32>, vector<2x12xf32>, vector<14x12xf32> -> vector<14x12xf32>
    %206 = arith.addf %202, %205 : vector<14x12xf32>
    %c84 = arith.constant 84 : index
    %c0_120 = arith.constant 0 : index
    %207 = vector.load %arg19[%c84, %c0_120] : memref<98x2xf32, #tpu.memory_space<vmem>>, vector<14x2xf32>
    %208 = vector.extract_strided_slice %183 {offsets = [0, 72], sizes = [2, 12], strides = [1, 1]} : vector<2x84xf32> to vector<2x12xf32>
    %cst_121 = arith.constant dense<0.000000e+00> : vector<14x12xf32>
    %209 = tpu.matmul %207, %208, %cst_121 {dimension_numbers = #tpu.dot_dimension_numbers<[1], [0], [0], [1], [0, 0, 1, 1], [], []>} : vector<14x2xf32>, vector<2x12xf32>, vector<14x12xf32> -> vector<14x12xf32>
    %210 = arith.addf %206, %209 : vector<14x12xf32>
    %c0_122 = arith.constant 0 : index
    %c0_123 = arith.constant 0 : index
    %211 = vector.load %arg21[%c0_122, %c0_123] : memref<14x12xf32, #tpu.memory_space<vmem>>, vector<14x12xf32>
    %212 = arith.addf %210, %211 : vector<14x12xf32>
    %cst_124 = arith.constant 0.000000e+00 : f32
    %213 = vector.broadcast %cst_124 : f32 to vector<14x12xf32>
    %214 = arith.maximumf %212, %213 : vector<14x12xf32>
    %c0_125 = arith.constant 0 : index
    %c0_126 = arith.constant 0 : index
    %215 = vector.load %arg23[%c0_125, %c0_126] : memref<12x36xf32, #tpu.memory_space<vmem>>, vector<12x36xf32>
    %cst_127 = arith.constant dense<0.000000e+00> : vector<14x36xf32>
    %216 = tpu.matmul %214, %215, %cst_127 {dimension_numbers = #tpu.dot_dimension_numbers<[1], [0], [0], [1], [0, 0, 1, 1], [], []>} : vector<14x12xf32>, vector<12x36xf32>, vector<14x36xf32> -> vector<14x36xf32>
    %c0_128 = arith.constant 0 : index
    %c0_129 = arith.constant 0 : index
    %217 = vector.load %arg22[%c0_128, %c0_129] : memref<336x14xf32, #tpu.memory_space<vmem>>, vector<112x14xf32>
    %218 = vector.extract_strided_slice %216 {offsets = [0, 0], sizes = [14, 12], strides = [1, 1]} : vector<14x36xf32> to vector<14x12xf32>
    %cst_130 = arith.constant dense<0.000000e+00> : vector<112x12xf32>
    %219 = tpu.matmul %217, %218, %cst_130 {dimension_numbers = #tpu.dot_dimension_numbers<[1], [0], [0], [1], [0, 0, 1, 1], [], []>} : vector<112x14xf32>, vector<14x12xf32>, vector<112x12xf32> -> vector<112x12xf32>
    %c112_131 = arith.constant 112 : index
    %c0_132 = arith.constant 0 : index
    %220 = vector.load %arg22[%c112_131, %c0_132] : memref<336x14xf32, #tpu.memory_space<vmem>>, vector<112x14xf32>
    %221 = vector.extract_strided_slice %216 {offsets = [0, 12], sizes = [14, 12], strides = [1, 1]} : vector<14x36xf32> to vector<14x12xf32>
    %cst_133 = arith.constant dense<0.000000e+00> : vector<112x12xf32>
    %222 = tpu.matmul %220, %221, %cst_133 {dimension_numbers = #tpu.dot_dimension_numbers<[1], [0], [0], [1], [0, 0, 1, 1], [], []>} : vector<112x14xf32>, vector<14x12xf32>, vector<112x12xf32> -> vector<112x12xf32>
    %223 = arith.addf %219, %222 : vector<112x12xf32>
    %c224_134 = arith.constant 224 : index
    %c0_135 = arith.constant 0 : index
    %224 = vector.load %arg22[%c224_134, %c0_135] : memref<336x14xf32, #tpu.memory_space<vmem>>, vector<112x14xf32>
    %225 = vector.extract_strided_slice %216 {offsets = [0, 24], sizes = [14, 12], strides = [1, 1]} : vector<14x36xf32> to vector<14x12xf32>
    %cst_136 = arith.constant dense<0.000000e+00> : vector<112x12xf32>
    %226 = tpu.matmul %224, %225, %cst_136 {dimension_numbers = #tpu.dot_dimension_numbers<[1], [0], [0], [1], [0, 0, 1, 1], [], []>} : vector<112x14xf32>, vector<14x12xf32>, vector<112x12xf32> -> vector<112x12xf32>
    %227 = arith.addf %223, %226 : vector<112x12xf32>
    %cst_137 = arith.constant 0.000000e+00 : f32
    %228 = vector.broadcast %cst_137 : f32 to vector<112x12xf32>
    %229 = arith.maximumf %227, %228 : vector<112x12xf32>
    %c0_138 = arith.constant 0 : index
    %c0_139 = arith.constant 0 : index
    %230 = vector.load %arg25[%c0_138, %c0_139] : memref<12x100xf32, #tpu.memory_space<vmem>>, vector<12x100xf32>
    %cst_140 = arith.constant dense<0.000000e+00> : vector<112x100xf32>
    %231 = tpu.matmul %229, %230, %cst_140 {dimension_numbers = #tpu.dot_dimension_numbers<[1], [0], [0], [1], [0, 0, 1, 1], [], []>} : vector<112x12xf32>, vector<12x100xf32>, vector<112x100xf32> -> vector<112x100xf32>
    %c0_141 = arith.constant 0 : index
    %c0_142 = arith.constant 0 : index
    %232 = vector.load %arg24[%c0_141, %c0_142] : memref<384x112xf32, #tpu.memory_space<vmem>>, vector<96x112xf32>
    %233 = vector.extract_strided_slice %231 {offsets = [0, 0], sizes = [112, 25], strides = [1, 1]} : vector<112x100xf32> to vector<112x25xf32>
    %cst_143 = arith.constant dense<0.000000e+00> : vector<96x25xf32>
    %234 = tpu.matmul %232, %233, %cst_143 {dimension_numbers = #tpu.dot_dimension_numbers<[1], [0], [0], [1], [0, 0, 1, 1], [], []>} : vector<96x112xf32>, vector<112x25xf32>, vector<96x25xf32> -> vector<96x25xf32>
    %c96_144 = arith.constant 96 : index
    %c0_145 = arith.constant 0 : index
    %235 = vector.load %arg24[%c96_144, %c0_145] : memref<384x112xf32, #tpu.memory_space<vmem>>, vector<96x112xf32>
    %236 = vector.extract_strided_slice %231 {offsets = [0, 25], sizes = [112, 25], strides = [1, 1]} : vector<112x100xf32> to vector<112x25xf32>
    %cst_146 = arith.constant dense<0.000000e+00> : vector<96x25xf32>
    %237 = tpu.matmul %235, %236, %cst_146 {dimension_numbers = #tpu.dot_dimension_numbers<[1], [0], [0], [1], [0, 0, 1, 1], [], []>} : vector<96x112xf32>, vector<112x25xf32>, vector<96x25xf32> -> vector<96x25xf32>
    %238 = arith.addf %234, %237 : vector<96x25xf32>
    %c192_147 = arith.constant 192 : index
    %c0_148 = arith.constant 0 : index
    %239 = vector.load %arg24[%c192_147, %c0_148] : memref<384x112xf32, #tpu.memory_space<vmem>>, vector<96x112xf32>
    %240 = vector.extract_strided_slice %231 {offsets = [0, 50], sizes = [112, 25], strides = [1, 1]} : vector<112x100xf32> to vector<112x25xf32>
    %cst_149 = arith.constant dense<0.000000e+00> : vector<96x25xf32>
    %241 = tpu.matmul %239, %240, %cst_149 {dimension_numbers = #tpu.dot_dimension_numbers<[1], [0], [0], [1], [0, 0, 1, 1], [], []>} : vector<96x112xf32>, vector<112x25xf32>, vector<96x25xf32> -> vector<96x25xf32>
    %242 = arith.addf %238, %241 : vector<96x25xf32>
    %c288_150 = arith.constant 288 : index
    %c0_151 = arith.constant 0 : index
    %243 = vector.load %arg24[%c288_150, %c0_151] : memref<384x112xf32, #tpu.memory_space<vmem>>, vector<96x112xf32>
    %244 = vector.extract_strided_slice %231 {offsets = [0, 75], sizes = [112, 25], strides = [1, 1]} : vector<112x100xf32> to vector<112x25xf32>
    %cst_152 = arith.constant dense<0.000000e+00> : vector<96x25xf32>
    %245 = tpu.matmul %243, %244, %cst_152 {dimension_numbers = #tpu.dot_dimension_numbers<[1], [0], [0], [1], [0, 0, 1, 1], [], []>} : vector<96x112xf32>, vector<112x25xf32>, vector<96x25xf32> -> vector<96x25xf32>
    %246 = arith.addf %242, %245 : vector<96x25xf32>
    %c0_153 = arith.constant 0 : index
    %c0_154 = arith.constant 0 : index
    %247 = vector.load %arg26[%c0_153, %c0_154] : memref<96x25xf32, #tpu.memory_space<vmem>>, vector<96x25xf32>
    %248 = arith.addf %246, %247 : vector<96x25xf32>
    %cst_155 = arith.constant 0.000000e+00 : f32
    %249 = vector.broadcast %cst_155 : f32 to vector<96x25xf32>
    %250 = arith.maximumf %248, %249 : vector<96x25xf32>
    %c0_156 = arith.constant 0 : index
    %c0_157 = arith.constant 0 : index
    %251 = vector.load %arg28[%c0_156, %c0_157] : memref<25x200xf32, #tpu.memory_space<vmem>>, vector<25x200xf32>
    %cst_158 = arith.constant dense<0.000000e+00> : vector<96x200xf32>
    %252 = tpu.matmul %250, %251, %cst_158 {dimension_numbers = #tpu.dot_dimension_numbers<[1], [0], [0], [1], [0, 0, 1, 1], [], []>} : vector<96x25xf32>, vector<25x200xf32>, vector<96x200xf32> -> vector<96x200xf32>
    %c0_159 = arith.constant 0 : index
    %c0_160 = arith.constant 0 : index
    %253 = vector.load %arg27[%c0_159, %c0_160] : memref<320x96xf32, #tpu.memory_space<vmem>>, vector<80x96xf32>
    %254 = vector.extract_strided_slice %252 {offsets = [0, 0], sizes = [96, 50], strides = [1, 1]} : vector<96x200xf32> to vector<96x50xf32>
    %cst_161 = arith.constant dense<0.000000e+00> : vector<80x50xf32>
    %255 = tpu.matmul %253, %254, %cst_161 {dimension_numbers = #tpu.dot_dimension_numbers<[1], [0], [0], [1], [0, 0, 1, 1], [], []>} : vector<80x96xf32>, vector<96x50xf32>, vector<80x50xf32> -> vector<80x50xf32>
    %c80_162 = arith.constant 80 : index
    %c0_163 = arith.constant 0 : index
    %256 = vector.load %arg27[%c80_162, %c0_163] : memref<320x96xf32, #tpu.memory_space<vmem>>, vector<80x96xf32>
    %257 = vector.extract_strided_slice %252 {offsets = [0, 50], sizes = [96, 50], strides = [1, 1]} : vector<96x200xf32> to vector<96x50xf32>
    %cst_164 = arith.constant dense<0.000000e+00> : vector<80x50xf32>
    %258 = tpu.matmul %256, %257, %cst_164 {dimension_numbers = #tpu.dot_dimension_numbers<[1], [0], [0], [1], [0, 0, 1, 1], [], []>} : vector<80x96xf32>, vector<96x50xf32>, vector<80x50xf32> -> vector<80x50xf32>
    %259 = arith.addf %255, %258 : vector<80x50xf32>
    %c160_165 = arith.constant 160 : index
    %c0_166 = arith.constant 0 : index
    %260 = vector.load %arg27[%c160_165, %c0_166] : memref<320x96xf32, #tpu.memory_space<vmem>>, vector<80x96xf32>
    %261 = vector.extract_strided_slice %252 {offsets = [0, 100], sizes = [96, 50], strides = [1, 1]} : vector<96x200xf32> to vector<96x50xf32>
    %cst_167 = arith.constant dense<0.000000e+00> : vector<80x50xf32>
    %262 = tpu.matmul %260, %261, %cst_167 {dimension_numbers = #tpu.dot_dimension_numbers<[1], [0], [0], [1], [0, 0, 1, 1], [], []>} : vector<80x96xf32>, vector<96x50xf32>, vector<80x50xf32> -> vector<80x50xf32>
    %263 = arith.addf %259, %262 : vector<80x50xf32>
    %c240_168 = arith.constant 240 : index
    %c0_169 = arith.constant 0 : index
    %264 = vector.load %arg27[%c240_168, %c0_169] : memref<320x96xf32, #tpu.memory_space<vmem>>, vector<80x96xf32>
    %265 = vector.extract_strided_slice %252 {offsets = [0, 150], sizes = [96, 50], strides = [1, 1]} : vector<96x200xf32> to vector<96x50xf32>
    %cst_170 = arith.constant dense<0.000000e+00> : vector<80x50xf32>
    %266 = tpu.matmul %264, %265, %cst_170 {dimension_numbers = #tpu.dot_dimension_numbers<[1], [0], [0], [1], [0, 0, 1, 1], [], []>} : vector<80x96xf32>, vector<96x50xf32>, vector<80x50xf32> -> vector<80x50xf32>
    %267 = arith.addf %263, %266 : vector<80x50xf32>
    %c0_171 = arith.constant 0 : index
    %c0_172 = arith.constant 0 : index
    %268 = vector.load %arg29[%c0_171, %c0_172] : memref<80x50xf32, #tpu.memory_space<vmem>>, vector<80x50xf32>
    %269 = arith.addf %267, %268 : vector<80x50xf32>
    %cst_173 = arith.constant 0.000000e+00 : f32
    %270 = vector.broadcast %cst_173 : f32 to vector<80x50xf32>
    %271 = arith.maximumf %269, %270 : vector<80x50xf32>
    %c0_174 = arith.constant 0 : index
    %c0_175 = arith.constant 0 : index
    %272 = vector.load %arg31[%c0_174, %c0_175] : memref<50x404xf32, #tpu.memory_space<vmem>>, vector<50x404xf32>
    %cst_176 = arith.constant dense<0.000000e+00> : vector<80x404xf32>
    %273 = tpu.matmul %271, %272, %cst_176 {dimension_numbers = #tpu.dot_dimension_numbers<[1], [0], [0], [1], [0, 0, 1, 1], [], []>} : vector<80x50xf32>, vector<50x404xf32>, vector<80x404xf32> -> vector<80x404xf32>
    %c0_177 = arith.constant 0 : index
    %c0_178 = arith.constant 0 : index
    %274 = vector.load %arg30[%c0_177, %c0_178] : memref<32x80xf32, #tpu.memory_space<vmem>>, vector<8x80xf32>
    %275 = vector.extract_strided_slice %273 {offsets = [0, 0], sizes = [80, 101], strides = [1, 1]} : vector<80x404xf32> to vector<80x101xf32>
    %cst_179 = arith.constant dense<0.000000e+00> : vector<8x101xf32>
    %276 = tpu.matmul %274, %275, %cst_179 {dimension_numbers = #tpu.dot_dimension_numbers<[1], [0], [0], [1], [0, 0, 1, 1], [], []>} : vector<8x80xf32>, vector<80x101xf32>, vector<8x101xf32> -> vector<8x101xf32>
    %c8_180 = arith.constant 8 : index
    %c0_181 = arith.constant 0 : index
    %277 = vector.load %arg30[%c8_180, %c0_181] : memref<32x80xf32, #tpu.memory_space<vmem>>, vector<8x80xf32>
    %278 = vector.extract_strided_slice %273 {offsets = [0, 101], sizes = [80, 101], strides = [1, 1]} : vector<80x404xf32> to vector<80x101xf32>
    %cst_182 = arith.constant dense<0.000000e+00> : vector<8x101xf32>
    %279 = tpu.matmul %277, %278, %cst_182 {dimension_numbers = #tpu.dot_dimension_numbers<[1], [0], [0], [1], [0, 0, 1, 1], [], []>} : vector<8x80xf32>, vector<80x101xf32>, vector<8x101xf32> -> vector<8x101xf32>
    %280 = arith.addf %276, %279 : vector<8x101xf32>
    %c16 = arith.constant 16 : index
    %c0_183 = arith.constant 0 : index
    %281 = vector.load %arg30[%c16, %c0_183] : memref<32x80xf32, #tpu.memory_space<vmem>>, vector<8x80xf32>
    %282 = vector.extract_strided_slice %273 {offsets = [0, 202], sizes = [80, 101], strides = [1, 1]} : vector<80x404xf32> to vector<80x101xf32>
    %cst_184 = arith.constant dense<0.000000e+00> : vector<8x101xf32>
    %283 = tpu.matmul %281, %282, %cst_184 {dimension_numbers = #tpu.dot_dimension_numbers<[1], [0], [0], [1], [0, 0, 1, 1], [], []>} : vector<8x80xf32>, vector<80x101xf32>, vector<8x101xf32> -> vector<8x101xf32>
    %284 = arith.addf %280, %283 : vector<8x101xf32>
    %c24 = arith.constant 24 : index
    %c0_185 = arith.constant 0 : index
    %285 = vector.load %arg30[%c24, %c0_185] : memref<32x80xf32, #tpu.memory_space<vmem>>, vector<8x80xf32>
    %286 = vector.extract_strided_slice %273 {offsets = [0, 303], sizes = [80, 101], strides = [1, 1]} : vector<80x404xf32> to vector<80x101xf32>
    %cst_186 = arith.constant dense<0.000000e+00> : vector<8x101xf32>
    %287 = tpu.matmul %285, %286, %cst_186 {dimension_numbers = #tpu.dot_dimension_numbers<[1], [0], [0], [1], [0, 0, 1, 1], [], []>} : vector<8x80xf32>, vector<80x101xf32>, vector<8x101xf32> -> vector<8x101xf32>
    %288 = arith.addf %284, %287 : vector<8x101xf32>
    %c0_187 = arith.constant 0 : index
    %c0_188 = arith.constant 0 : index
    %289 = vector.load %arg32[%c0_187, %c0_188] : memref<8x101xf32, #tpu.memory_space<vmem>>, vector<8x101xf32>
    %290 = arith.addf %288, %289 : vector<8x101xf32>
    %cst_189 = arith.constant 0.000000e+00 : f32
    %291 = vector.broadcast %cst_189 : f32 to vector<8x101xf32>
    %292 = arith.maximumf %290, %291 : vector<8x101xf32>
    %c0_190 = arith.constant 0 : index
    %c0_191 = arith.constant 0 : index
    %293 = vector.load %arg33[%c0_190, %c0_191] : memref<2x5xf32, #tpu.memory_space<vmem>>, vector<2x5xf32>
    tpu.vector_store %arg33[%c0_190, %c0_191], %181 {strides = array<i32>} : memref<2x5xf32, #tpu.memory_space<vmem>>, vector<2x5xf32>,
    %c0_192 = arith.constant 0 : index
    %c0_193 = arith.constant 0 : index
    %294 = vector.load %arg35[%c0_192, %c0_193] : memref<2x9xf32, #tpu.memory_space<vmem>>, vector<2x9xf32>
    tpu.vector_store %arg35[%c0_192, %c0_193], %155 {strides = array<i32>} : memref<2x9xf32, #tpu.memory_space<vmem>>, vector<2x9xf32>,
    %c0_194 = arith.constant 0 : index
    %c0_195 = arith.constant 0 : index
    %295 = vector.load %arg34[%c0_194, %c0_195] : memref<8x101xf32, #tpu.memory_space<vmem>>, vector<8x101xf32>
    tpu.vector_store %arg34[%c0_194, %c0_195], %292 {strides = array<i32>} : memref<8x101xf32, #tpu.memory_space<vmem>>, vector<8x101xf32>,
    return
  }
  func.func @transform_0(%arg0: i32) -> (i32, i32) {
    %c0_i32 = arith.constant 0 : i32
    %c0_i32_0 = arith.constant 0 : i32
    %c0_i32_1 = arith.constant 0 : i32
    return %c0_i32, %c0_i32_0 : i32, i32
  }
  func.func @transform_1(%arg0: i32) -> (i32, i32) {
    %c0_i32 = arith.constant 0 : i32
    %c0_i32_0 = arith.constant 0 : i32
    %c0_i32_1 = arith.constant 0 : i32
    return %c0_i32, %c0_i32_0 : i32, i32
  }
  func.func @transform_2(%arg0: i32) -> (i32, i32) {
    %c0_i32 = arith.constant 0 : i32
    %c0_i32_0 = arith.constant 0 : i32
    %c0_i32_1 = arith.constant 0 : i32
    return %c0_i32, %c0_i32_0 : i32, i32
  }
  func.func @transform_3(%arg0: i32) -> (i32, i32) {
    %c0_i32 = arith.constant 0 : i32
    %c0_i32_0 = arith.constant 0 : i32
    %c0_i32_1 = arith.constant 0 : i32
    return %c0_i32, %c0_i32_0 : i32, i32
  }
  func.func @transform_4(%arg0: i32) -> (i32, i32) {
    %c0_i32 = arith.constant 0 : i32
    %c0_i32_0 = arith.constant 0 : i32
    %c0_i32_1 = arith.constant 0 : i32
    return %c0_i32, %c0_i32_0 : i32, i32
  }
  func.func @transform_5(%arg0: i32) -> (i32, i32) {
    %c0_i32 = arith.constant 0 : i32
    %c0_i32_0 = arith.constant 0 : i32
    %c0_i32_1 = arith.constant 0 : i32
    return %c0_i32, %c0_i32_0 : i32, i32
  }
  func.func @transform_6(%arg0: i32) -> (i32, i32) {
    %c0_i32 = arith.constant 0 : i32
    %c0_i32_0 = arith.constant 0 : i32
    %c0_i32_1 = arith.constant 0 : i32
    return %c0_i32, %c0_i32_0 : i32, i32
  }
  func.func @transform_7(%arg0: i32) -> (i32, i32) {
    %c0_i32 = arith.constant 0 : i32
    %c0_i32_0 = arith.constant 0 : i32
    %c0_i32_1 = arith.constant 0 : i32
    return %c0_i32, %c0_i32_0 : i32, i32
  }
  func.func @transform_8(%arg0: i32) -> (i32, i32) {
    %c0_i32 = arith.constant 0 : i32
    %c0_i32_0 = arith.constant 0 : i32
    %c0_i32_1 = arith.constant 0 : i32
    return %c0_i32, %c0_i32_0 : i32, i32
  }
  func.func @transform_9(%arg0: i32) -> (i32, i32) {
    %c0_i32 = arith.constant 0 : i32
    %c0_i32_0 = arith.constant 0 : i32
    %c0_i32_1 = arith.constant 0 : i32
    return %c0_i32, %c0_i32_0 : i32, i32
  }
  func.func @transform_10(%arg0: i32) -> (i32, i32) {
    %c0_i32 = arith.constant 0 : i32
    %c0_i32_0 = arith.constant 0 : i32
    %c0_i32_1 = arith.constant 0 : i32
    return %c0_i32, %c0_i32_0 : i32, i32
  }
  func.func @transform_11(%arg0: i32) -> (i32, i32) {
    %c0_i32 = arith.constant 0 : i32
    %c0_i32_0 = arith.constant 0 : i32
    %c0_i32_1 = arith.constant 0 : i32
    return %c0_i32, %c0_i32_0 : i32, i32
  }
  func.func @transform_12(%arg0: i32) -> (i32, i32) {
    %c0_i32 = arith.constant 0 : i32
    %c0_i32_0 = arith.constant 0 : i32
    %c0_i32_1 = arith.constant 0 : i32
    return %c0_i32, %c0_i32_0 : i32, i32
  }
  func.func @transform_13(%arg0: i32) -> (i32, i32) {
    %c0_i32 = arith.constant 0 : i32
    %c0_i32_0 = arith.constant 0 : i32
    %c0_i32_1 = arith.constant 0 : i32
    return %c0_i32, %c0_i32_0 : i32, i32
  }
  func.func @transform_14(%arg0: i32) -> (i32, i32) {
    %c0_i32 = arith.constant 0 : i32
    %c0_i32_0 = arith.constant 0 : i32
    %c0_i32_1 = arith.constant 0 : i32
    return %c0_i32, %c0_i32_0 : i32, i32
  }
  func.func @transform_15(%arg0: i32) -> (i32, i32) {
    %c0_i32 = arith.constant 0 : i32
    %c0_i32_0 = arith.constant 0 : i32
    %c0_i32_1 = arith.constant 0 : i32
    return %c0_i32, %c0_i32_0 : i32, i32
  }
  func.func @transform_16(%arg0: i32) -> (i32, i32) {
    %c0_i32 = arith.constant 0 : i32
    %c0_i32_0 = arith.constant 0 : i32
    %c0_i32_1 = arith.constant 0 : i32
    return %c0_i32, %c0_i32_0 : i32, i32
  }
  func.func @transform_17(%arg0: i32) -> (i32, i32) {
    %c0_i32 = arith.constant 0 : i32
    %c0_i32_0 = arith.constant 0 : i32
    %c0_i32_1 = arith.constant 0 : i32
    return %c0_i32, %c0_i32_0 : i32, i32
  }
  func.func @transform_18(%arg0: i32) -> (i32, i32) {
    %c0_i32 = arith.constant 0 : i32
    %c0_i32_0 = arith.constant 0 : i32
    %c0_i32_1 = arith.constant 0 : i32
    return %c0_i32, %c0_i32_0 : i32, i32
  }
  func.func @transform_19(%arg0: i32) -> (i32, i32) {
    %c0_i32 = arith.constant 0 : i32
    %c0_i32_0 = arith.constant 0 : i32
    %c0_i32_1 = arith.constant 0 : i32
    return %c0_i32, %c0_i32_0 : i32, i32
  }
  func.func @transform_20(%arg0: i32) -> (i32, i32) {
    %c0_i32 = arith.constant 0 : i32
    %c0_i32_0 = arith.constant 0 : i32
    %c0_i32_1 = arith.constant 0 : i32
    return %c0_i32, %c0_i32_0 : i32, i32
  }
  func.func @transform_21(%arg0: i32) -> (i32, i32) {
    %c0_i32 = arith.constant 0 : i32
    %c0_i32_0 = arith.constant 0 : i32
    %c0_i32_1 = arith.constant 0 : i32
    return %c0_i32, %c0_i32_0 : i32, i32
  }
  func.func @transform_22(%arg0: i32) -> (i32, i32) {
    %c0_i32 = arith.constant 0 : i32
    %c0_i32_0 = arith.constant 0 : i32
    %c0_i32_1 = arith.constant 0 : i32
    return %c0_i32, %c0_i32_0 : i32, i32
  }
  func.func @transform_23(%arg0: i32) -> (i32, i32) {
    %c0_i32 = arith.constant 0 : i32
    %c0_i32_0 = arith.constant 0 : i32
    %c0_i32_1 = arith.constant 0 : i32
    return %c0_i32, %c0_i32_0 : i32, i32
  }
  func.func @transform_24(%arg0: i32) -> (i32, i32) {
    %c0_i32 = arith.constant 0 : i32
    %c0_i32_0 = arith.constant 0 : i32
    %c0_i32_1 = arith.constant 0 : i32
    return %c0_i32, %c0_i32_0 : i32, i32
  }
  func.func @transform_25(%arg0: i32) -> (i32, i32) {
    %c0_i32 = arith.constant 0 : i32
    %c0_i32_0 = arith.constant 0 : i32
    %c0_i32_1 = arith.constant 0 : i32
    return %c0_i32, %c0_i32_0 : i32, i32
  }
  func.func @transform_26(%arg0: i32) -> (i32, i32) {
    %c0_i32 = arith.constant 0 : i32
    %c0_i32_0 = arith.constant 0 : i32
    %c0_i32_1 = arith.constant 0 : i32
    return %c0_i32, %c0_i32_0 : i32, i32
  }
  func.func @transform_27(%arg0: i32) -> (i32, i32) {
    %c0_i32 = arith.constant 0 : i32
    %c0_i32_0 = arith.constant 0 : i32
    %c0_i32_1 = arith.constant 0 : i32
    return %c0_i32, %c0_i32_0 : i32, i32
  }
  func.func @transform_28(%arg0: i32) -> (i32, i32) {
    %c0_i32 = arith.constant 0 : i32
    %c0_i32_0 = arith.constant 0 : i32
    %c0_i32_1 = arith.constant 0 : i32
    return %c0_i32, %c0_i32_0 : i32, i32
  }
  func.func @transform_29(%arg0: i32) -> (i32, i32) {
    %c0_i32 = arith.constant 0 : i32
    %c0_i32_0 = arith.constant 0 : i32
    %c0_i32_1 = arith.constant 0 : i32
    return %c0_i32, %c0_i32_0 : i32, i32
  }
  func.func @transform_30(%arg0: i32) -> (i32, i32) {
    %c0_i32 = arith.constant 0 : i32
    %c0_i32_0 = arith.constant 0 : i32
    %c0_i32_1 = arith.constant 0 : i32
    return %c0_i32, %c0_i32_0 : i32, i32
  }
  func.func @transform_31(%arg0: i32) -> (i32, i32) {
    %c0_i32 = arith.constant 0 : i32
    %c0_i32_0 = arith.constant 0 : i32
    %c0_i32_1 = arith.constant 0 : i32
    return %c0_i32, %c0_i32_0 : i32, i32
  }
  func.func @transform_32(%arg0: i32) -> (i32, i32) {
    %c0_i32 = arith.constant 0 : i32
    %c0_i32_0 = arith.constant 0 : i32
    %c0_i32_1 = arith.constant 0 : i32
    return %c0_i32, %c0_i32_0 : i32, i32
  }
  func.func @transform_33(%arg0: i32) -> (i32, i32) {
    %c0_i32 = arith.constant 0 : i32
    %c0_i32_0 = arith.constant 0 : i32
    %c0_i32_1 = arith.constant 0 : i32
    return %c0_i32, %c0_i32_0 : i32, i32
  }
  func.func @transform_34(%arg0: i32) -> (i32, i32) {
    %c0_i32 = arith.constant 0 : i32
    %c0_i32_0 = arith.constant 0 : i32
    %c0_i32_1 = arith.constant 0 : i32
    return %c0_i32, %c0_i32_0 : i32, i32
  }
}

</mosaic_0001>

<bundles_post_ra>
// kernel: dec_forward.1
= control target key start
LH: loop header
LB: loop body
LE: loop exit
PB: predicated region body
PF: predicated region fallthrough
CT: control target
= control target key end

     0   :  { %s6696_s6 = smov 1   ;;  %s6697_s10 = smov 2   ;;  %s8398_s0 = inlined_call_operand.smem [shape: u32[35], index: -1, kind: input, shape index: {}] }
   0x1   :  { %s6760_s5 = sld [smem:[%s8398_s0]]   ;;  %s6698_s14 = smov 3  }
   0x2   :  { %s6765_s9 = sld [smem:[%s8398_s0 + %s6696_s6]]   ;;  %s6699_s18 = smov 4  }
   0x3   :  { %s6770_s13 = sld [smem:[%s8398_s0 + %s6697_s10]]   ;;  %s6700_s22 = smov 5  }
   0x4   :  { %s6775_s17 = sld [smem:[%s8398_s0 + %s6698_s14]]   ;;  %s6701_s26 = smov 6  }
   0x5   :  { %s6780_s21 = sld [smem:[%s8398_s0 + %s6699_s18]]   ;;  %s6702_s30 = smov 7  }
   0x6   :  { %s6785_s25 = sld [smem:[%s8398_s0 + %s6700_s22]]   ;;  %s6703_s4 = smov 8  }
   0x7   :  { %s6790_s29 = sld [smem:[%s8398_s0 + %s6701_s26]]   ;;  %s6704_s10 = smov 9  }
   0x8   :  { %s6795_s3 = sld [smem:[%s8398_s0 + %s6702_s30]]   ;;  %s6705_s15 = smov 10  }
   0x9   :  { %s6800_s8 = sld [smem:[%s8398_s0 + %s6703_s4]]   ;;  %s6706_s20 = smov 11  }
   0xa   :  { %s6805_s14 = sld [smem:[%s8398_s0 + %s6704_s10]]   ;;  %s6707_s26 = smov 12  }
   0xb   :  { %s6810_s19 = sld [smem:[%s8398_s0 + %s6705_s15]]   ;;  %s6708_s1 = smov 13  }
   0xc   :  { %s6815_s24 = sld [smem:[%s8398_s0 + %s6706_s20]]   ;;  %s6709_s7 = smov 14  }
   0xd   :  { %s6820_s30 = sld [smem:[%s8398_s0 + %s6707_s26]]   ;;  %s6710_s15 = smov 15  }
   0xe   :  { %s6825_s6 = sld [smem:[%s8398_s0 + %s6708_s1]]   ;;  %s6711_s22 = smov 16  }
   0xf   :  { %s6830_s12 = sld [smem:[%s8398_s0 + %s6709_s7]]   ;;  %s6712_s28 = smov 17  }
  0x10   :  { %s6835_s20 = sld [smem:[%s8398_s0 + %s6710_s15]]   ;;  %s6713_s7 = smov 18  }
  0x11   :  { %s6840_s27 = sld [smem:[%s8398_s0 + %s6711_s22]]   ;;  %s6714_s15 = smov 19  }
  0x12   :  { %s6845_s4 = sld [smem:[%s8398_s0 + %s6712_s28]]   ;;  %s6715_s22 = smov 20  }
  0x13   :  { %s6716_s28 = smov 21  }
  0x14   :  { %8414 = sst [smem:[#allocation9_spill]] %s6825_s6 }
  0x15   :  { %s6850_s6 = sld [smem:[%s8398_s0 + %s6713_s7]]   ;;  %s6717_s7 = smov 22  }
  0x16   :  { %8415 = sst [smem:[#allocation10_spill]] %s6835_s20 }
  0x17   :  { %8416 = sst [smem:[#allocation11_spill]] %s6840_s27 }
  0x18   :  { %8417 = sst [smem:[#allocation12_spill]] %s6845_s4 }
  0x19   :  { %s6855_s20 = sld [smem:[%s8398_s0 + %s6714_s15]]   ;;  %s6718_s15 = smov 23  }
  0x1a   :  { %s6860_s27 = sld [smem:[%s8398_s0 + %s6715_s22]]   ;;  %s6719_s22 = smov 24  }
  0x1b   :  { %8418 = sst [smem:[#allocation13_spill]] %s6850_s6 }
  0x1c   :  { %s6865_s4 = sld [smem:[%s8398_s0 + %s6716_s28]]   ;;  %s6720_s28 = smov 25  }
  0x1d   :  { %s6870_s6 = sld [smem:[%s8398_s0 + %s6717_s7]]   ;;  %s6721_s7 = smov 26  }
  0x1f   :  { %8419 = sst [smem:[#allocation14_spill]] %s6855_s20 }
  0x20   :  { %8420 = sst [smem:[#allocation15_spill]] %s6860_s27 }
  0x21   :  { %s6875_s20 = sld [smem:[%s8398_s0 + %s6718_s15]]   ;;  %s6722_s15 = smov 27  }
  0x22   :  { %8421 = sst [smem:[#allocation16_spill]] %s6865_s4 }
  0x23   :  { %8422 = sst [smem:[#allocation17_spill]] %s6870_s6 }
  0x24   :  { %s6880_s27 = sld [smem:[%s8398_s0 + %s6719_s22]]   ;;  %s6723_s22 = smov 28  }
  0x25   :  { %s6885_s4 = sld [smem:[%s8398_s0 + %s6720_s28]]   ;;  %s6724_s28 = smov 29  }
  0x26   :  { %s6890_s6 = sld [smem:[%s8398_s0 + %s6721_s7]]   ;;  %s6725_s7 = smov 30  }
  0x27   :  { %8423 = sst [smem:[#allocation18_spill]] %s6875_s20 }
  0x28   :  { %s6895_s20 = sld [smem:[%s8398_s0 + %s6722_s15]]   ;;  %s6726_s15 = smov 31  }
  0x2a   :  { %8424 = sst [smem:[#allocation19_spill]] %s6880_s27 }
  0x2b   :  { %8425 = sst [smem:[#allocation20_spill]] %s6885_s4 }
  0x2c   :  { %8426 = sst [smem:[#allocation21_spill]] %s6890_s6 }
  0x2d   :  { %s6900_s27 = sld [smem:[%s8398_s0 + %s6723_s22]]   ;;  %s6727_s22 = smov 32  }
  0x2e   :  { %8427 = sst [smem:[#allocation22_spill]] %s6895_s20 }
  0x2f   :  { %s6905_s4 = sld [smem:[%s8398_s0 + %s6724_s28]]   ;;  %s6728_s28 = smov 33  }
  0x30   :  { %s6910_s6 = sld [smem:[%s8398_s0 + %s6725_s7]]   ;;  %s6729_s7 = smov 34  }
  0x31   :  { %s6915_s20 = sld [smem:[%s8398_s0 + %s6726_s15]]  }
  0x33   :  { %8428 = sst [smem:[#allocation23_spill]] %s6900_s27 }
  0x34   :  { %s6920_s27 = sld [smem:[%s8398_s0 + %s6727_s22]]  }
  0x35   :  { %8429 = sst [smem:[#allocation24_spill]] %s6905_s4 }
  0x36   :  { %8430 = sst [smem:[#allocation25_spill]] %s6910_s6 }
  0x37   :  { %s6925_s4 = sld [smem:[%s8398_s0 + %s6728_s28]]  }
  0x38   :  { %s6930_s6 = sld [smem:[%s8398_s0 + %s6729_s7]]  }
  0x39   :  { %75 = vsyncpa [#allocation3], 0  ;;  %v166_v0 = vld [vmem:[%s6770_s13 + $0xc0] sm:$0x1f]  ;;  %vm172_vm0 = vcmask 1044480   ;;  %v164_v2 = vld [vmem:[%s6770_s13 + $0xb0] sm:$0xff] }
  0x3a   :  { %v167_v1 = vld [vmem:[%s6770_s13 + $0xc8] sm:$0x1f]  ;;  %5541 = vmatpush.msk.msra.mxu0 %vm172_vm0, %v166_v0  ;;  %v165_v3 = vld [vmem:[%s6770_s13 + $0xb8] sm:$0xff]  ;;  %v162_v4 = vld [vmem:[%s6770_s13 + $0xa0] sm:$0xff] }
  0x3b   :  { %5543 = vmatpush.msk.msra.mxu1 %vm172_vm0, %v167_v1  ;;  %v163_v5 = vld [vmem:[%s6770_s13 + $0xa8] sm:$0xff]  ;;  %v160_v6 = vld [vmem:[%s6770_s13 + $0x90] sm:$0xff]  ;;  %v161_v7 = vld [vmem:[%s6770_s13 + $0x98] sm:$0xff] }
  0x3c   :  { %183 = vmatpush.msra.mxu0 %v164_v2  ;;  %v158_v8 = vld [vmem:[%s6770_s13 + $0x80] sm:$0xff]  ;;  %v159_v9 = vld [vmem:[%s6770_s13 + $0x88] sm:$0xff]  ;;  %v156_v10 = vld [vmem:[%s6770_s13 + $0x70] sm:$0xff] }
  0x3d   :  { %203 = vmatpush.msra.mxu1 %v165_v3  ;;  %v157_v11 = vld [vmem:[%s6770_s13 + $0x78] sm:$0xff] }
  0x3e   :  { %184 = vmatpush.msra.mxu0 %v162_v4 }
  0x3f   :  { %204 = vmatpush.msra.mxu1 %v163_v5 }
  0x40   :  { %185 = vmatpush.msra.mxu0 %v160_v6 }
  0x41   :  { %205 = vmatpush.msra.mxu1 %v161_v7 }
  0x42   :  { %186 = vmatpush.msra.mxu0 %v158_v8 }
  0x43   :  { %206 = vmatpush.msra.mxu1 %v159_v9 }
  0x44   :  { %76 = vsyncpa [#allocation5], 0  ;;  %v154_v12 = vld [vmem:[%s6770_s13 + $0x60] sm:$0xff]  ;;  %v155_v13 = vld [vmem:[%s6770_s13 + $0x68] sm:$0xff]  ;;  %187 = vmatpush.msra.mxu0 %v156_v10  ;;  %vm168_vm1 = vcmask 826368   ;;  %s6730_s0 = smov 78  }
  0x45   :  { %207 = vmatpush.msra.mxu1 %v157_v11  ;;  %v152_v14 = vld [vmem:[%s6770_s13 + $0x50] sm:$0xff]  ;;  %v153_v15 = vld [vmem:[%s6770_s13 + $0x58] sm:$0xff]  ;;  %v150_v16 = vld [vmem:[%s6770_s13 + $0x40] sm:$0xff]  ;;  %vm243_vm2 = vcmask 64512   ;;  %vm413_vm3 = vcmask 228352   ;;  %vm671_vm4 = vcmask 1041408  }
  0x46   :  { %188 = vmatpush.msra.mxu0 %v154_v12  ;;  %v151_v17 = vld [vmem:[%s6770_s13 + $0x48] sm:$0xff]  ;;  %v148_v18 = vld [vmem:[%s6770_s13 + $0x30] sm:$0xff]  ;;  %v149_v19 = vld [vmem:[%s6770_s13 + $0x38] sm:$0xff]  ;;  %vm640_vm5 = vcmask 408576   ;;  %vm786_vm6 = vcmask 654336   ;;  %vm1328_vm7 = vcmask 1040384  }
  0x47   :  { %208 = vmatpush.msra.mxu1 %v155_v13  ;;  %v146_v20 = vld [vmem:[%s6770_s13 + $0x20] sm:$0xff]  ;;  %v147_v21 = vld [vmem:[%s6770_s13 + $0x28] sm:$0xff]  ;;  %v144_v22 = vld [vmem:[%s6770_s13 + $0x10] sm:$0xff]  ;;  %vm1291_vm8 = vcmask 203776   ;;  %vm1461_vm9 = vcmask 785408   ;;  %vm2052_vm10 = vcmask 1043456  }
  0x48   :  { %189 = vmatpush.msra.mxu0 %v152_v14  ;;  %v145_v23 = vld [vmem:[%s6770_s13 + $0x18] sm:$0xff]  ;;  %v142_v24 = vld [vmem:[%s6770_s13] sm:$0xff]  ;;  %v143_v25 = vld [vmem:[%s6770_s13 + $0x8] sm:$0xff]  ;;  %s6731_s13 = smov 106   ;;  %vm2065_vm11 = vcmask 1045504   ;;  %vm2120_vm12 = vcmask 97280  }
  0x49   :  { %209 = vmatpush.msra.mxu1 %v153_v15  ;;  %v141_v26 = vld [vmem:[%s6760_s5] sm:$0xff]  ;;  %s6732_s5 = smov 28   ;;  %v221_v30 = vld [vmem:[%s6765_s9 + $0x10] sm:$0xff]  ;;  %v222_v31 = vld [vmem:[%s6765_s9 + $0x18] sm:$0xff]  ;;  %vm2164_vm13 = vcmask 113664   ;;  %s8433_s15 = sld [smem:[#allocation11_spill]] }
  0x4a   :  { %190 = vmatpush.msra.mxu0 %v150_v16  ;;  %v229_v32 = vld [vmem:[%s6765_s9 + $0x50] sm:$0xff]  ;;  %v223_v34 = vld [vmem:[%s6765_s9 + $0x20] sm:$0xff]  ;;  %v230_v35 = vld [vmem:[%s6765_s9 + $0x58] sm:$0xff]  ;;  %s8434_s16 = sld [smem:[#allocation10_spill]]  ;;  %vm2686_vm14 = vcmask 72704   ;;  %vm2680_vm15 = vcmask 66560  }
  0x4b   :  { %210 = vmatpush.msra.mxu1 %v151_v17  ;;  %v398_v39 = vld [vmem:[%s6765_s9 + $0xa0] sm:$0xff]  ;;  %v405_v40 = vld [vmem:[%s6765_s9 + $0xd8] sm:$0xff]  ;;  %v224_v41 = vld [vmem:[%s6765_s9 + $0x28] sm:$0xff]  ;;  %s8435_s18 = sld [smem:[#allocation13_spill]]  ;;  %s6743_s22 = smov 68   ;;  %vm2763_vm0 = vcmask 15360  }
  0x4c   :  { %191 = vmatpush.msra.mxu0 %v148_v18  ;;  %v231_v44 = vld [vmem:[%s6765_s9 + $0x60] sm:$0xff]  ;;  %v399_v45 = vld [vmem:[%s6765_s9 + $0xa8] sm:$0xff]  ;;  %v225_v47 = vld [vmem:[%s6765_s9 + $0x30] sm:$0xff]  ;;  %s6744_s23 = smov 80   ;;  %s6745_s26 = smov 56  }
  0x4d   :  { %211 = vmatpush.msra.mxu1 %v149_v19  ;;  %v406_v46 = vld [vmem:[%s6765_s9 + $0xe0] sm:$0xff]  ;;  %v232_v48 = vld [vmem:[%s6765_s9 + $0x68] sm:$0xff]  ;;  %v400_v49 = vld [vmem:[%s6765_s9 + $0xb0] sm:$0xff]  ;;  %s8436_s28 = sld [smem:[#allocation17_spill]] }
  0x4e   :  { %192 = vmatpush.msra.mxu0 %v146_v20  ;;  %v407_v50 = vld [vmem:[%s6765_s9 + $0xe8] sm:$0xff]  ;;  %v226_v51 = vld [vmem:[%s6765_s9 + $0x38] sm:$0xff]  ;;  %v233_v52 = vld [vmem:[%s6765_s9 + $0x70] sm:$0xff]  ;;  %s8437_s1 = sld [smem:[#allocation15_spill]] }
  0x4f   :  { %212 = vmatpush.msra.mxu1 %v147_v21  ;;  %v401_v53 = vld [vmem:[%s6765_s9 + $0xb8] sm:$0xff]  ;;  %v503_v54 = vld [vmem:[%s6765_s9 + $0xf0] sm:$0xff]  ;;  %v227_v55 = vld [vmem:[%s6765_s9 + $0x40] sm:$0xff]  ;;  %s8438_s2 = sld [smem:[#allocation16_spill]] }
  0x50   :  { %193 = vmatpush.msra.mxu0 %v144_v22  ;;  %v234_v56 = vld [vmem:[%s6765_s9 + $0x78] sm:$0xff]  ;;  %v402_v57 = vld [vmem:[%s6765_s9 + $0xc0] sm:$0xff]  ;;  %v228_v59 = vld [vmem:[%s6765_s9 + $0x48] sm:$0xff]  ;;  %s8439_s7 = sld [smem:[#allocation19_spill]] }
  0x51   :  { %213 = vmatpush.msra.mxu1 %v145_v23  ;;  %v504_v58 = vld [vmem:[%s6765_s9 + $0xf8] sm:$0xff]  ;;  %v235_v60 = vld [vmem:[%s6765_s9 + $0x80] sm:$0xff]  ;;  %v403_v61 = vld [vmem:[%s6765_s9 + $0xc8] sm:$0xff]  ;;  %s8440_s10 = sld [smem:[#allocation18_spill]] }
  0x52   :  { %194 = vmatpush.msra.mxu0 %v142_v24  ;;  %v505_v62 = vld [vmem:[%s6765_s9 + $0x100] sm:$0xff]  ;;  %v236_v63 = vld [vmem:[%s6765_s9 + $0x88] sm:$0xff]  ;;  %v404_v0 = vld [vmem:[%s6765_s9 + $0xd0] sm:$0xff]  ;;  %s8441_s11 = sld [smem:[#allocation22_spill]] }
  0x53   :  { %214 = vmatpush.msra.mxu1 %v143_v25  ;;  %5542 = vmatmul.msk.f32.vlgmr.msra.gmra.mxu0 %vm168_vm1, %v141_v26  ;;  %v506_v1 = vld [vmem:[%s6765_s9 + $0x108] sm:$0xff]  ;;  %v237_v2 = vld [vmem:[%s6765_s9 + $0x90] sm:$0xff]  ;;  %v238_v4 = vld [vmem:[%s6765_s9 + $0x98] sm:$0xff] }
  0x54   :  { %5544 = vmatmul.msk.f32.vlgmr.msra.gmra.mxu1 %vm168_vm1, %v141_v26  ;;  %v507_v3 = vld [vmem:[%s6765_s9 + $0x110] sm:$0xff]  ;;  %v508_v5 = vld [vmem:[%s6765_s9 + $0x118] sm:$0xff]  ;;  %v219_v6 = vld [vmem:[%s6765_s9] sm:$0xff] }
  0x55   :  { %v509_v7 = vld [vmem:[%s6765_s9 + $0x120] sm:$0xff]  ;;  %v220_v8 = vld [vmem:[%s6765_s9 + $0x8] sm:$0xff]  ;;  %v511_v10 = vld [vmem:[%s6765_s9 + $0x130] sm:$0xff] }
  0x56   :  { %v510_v9 = vld [vmem:[%s6765_s9 + $0x128] sm:$0xff]  ;;  %v512_v11 = vld [vmem:[%s6765_s9 + $0x138] sm:$0xff]  ;;  %v639_v20 = vld [vmem:[%s6785_s25 + $0x30] sm:$0x3]  ;;  %s6733_s9 = smov 103  }
  0x57   :  { %v638_v22 = vld [vmem:[%s6785_s25 + $0x28] sm:$0xff]  ;;  %v637_v24 = vld [vmem:[%s6785_s25 + $0x20] sm:$0xff]  ;;  %v636_v25 = vld [vmem:[%s6785_s25 + $0x18] sm:$0xff] }
  0x58   :  { %v635_v26 = vld [vmem:[%s6785_s25 + $0x10] sm:$0xff] }
  0xd0   :  { %v196_v27 = vpop.f32.mrf.mxu0 }
  0xd1   :  { %v216_v28 = vpop.f32.mrf.mxu1  ;;  %240 = vrot.lane.b32.xlu0 %v196_v27, %s6730_s0  ;;  %6004 = vmatpush.msra.mxu3 %v196_v27 }
  0xd2   :  { %513 = vrot.lane.b32.xlu1 %v216_v28, %s6731_s13  ;;  %v6062_v29 = vpack.i.bf16 %v216_v28, %v196_v27  ;;  %5557 = vmatmul.msk.f32.vlgmr.msra.gmra.mxu3 %vm243_vm2, %v221_v30  ;;  %v634_v28 = vld [vmem:[%s6785_s25 + $0x8] sm:$0xff] }
  0xd9   :  { %6063 = vrot.lane.b32.xlu0 %v6062_v29, %s6732_s5  ;;  %v633_v29 = vld [vmem:[%s6785_s25] sm:$0xff]  ;;  %s6736_s25 = smov 92  }
  0xda   :  { %5558 = vmatmul.msk.f32.gmra.mxu3 %vm243_vm2, %v222_v31 }
  0xe2   :  { %5559 = vmatmul.msk.f32.gmra.mxu3 %vm243_vm2, %v223_v34 }
  0xea   :  { %5560 = vmatmul.msk.f32.gmra.mxu3 %vm243_vm2, %v224_v41 }
  0xf2   :  { %5561 = vmatmul.msk.f32.gmra.mxu3 %vm243_vm2, %v225_v47 }
  0xfa   :  { %5562 = vmatmul.msk.f32.gmra.mxu3 %vm243_vm2, %v226_v51  ;;  %v604_v51 = vld [vmem:[%s6775_s17 + $0x8] sm:$0xff] }
 0x102   :  { %5563 = vmatmul.msk.f32.gmra.mxu3 %vm243_vm2, %v227_v55 }
 0x10a   :  { %5564 = vmatmul.msk.f32.gmra.mxu3 %vm243_vm2, %v228_v59 }
 0x143   :  { %v241_v33 = vpop.permute.xlu0 %240 }
 0x144   :  { %289 = vmatpush.msra.mxu2 %v241_v33  ;;  %v514_v43 = vpop.permute.xlu1 %513 }
 0x145   :  { %5545 = vmatmul.msk.f32.vlgmr.msra.gmra.mxu2 %vm243_vm2, %v229_v32 }
 0x146   :  { %366 = vmatpush.msrb.mxu2 %v196_v27 }
 0x148   :  { %5585 = vmatpush.msk.msra.mxu2 %vm671_vm4, %v639_v20 }
 0x14a   :  { %685 = vmatpush.msra.mxu2 %v638_v22 }
 0x14b   :  { %v6064_v36 = vpop.permute.xlu0 %6063 }
 0x14c   :  { %v6066_v37 = vunpack.i.h.bf16 %v6064_v36  ;;  %v6065_v38 = vunpack.i.l.bf16 %v6064_v36  ;;  %686 = vmatpush.msra.mxu2 %v637_v24 }
 0x14d   :  { %5546 = vmatmul.msk.f32.gmra.mxu2 %vm243_vm2, %v230_v35 }
 0x14e   :  { %v414_v42 = vsel %vm413_vm3, %v6065_v38, %v6066_v37  ;;  %687 = vmatpush.msra.mxu2 %v636_v25 }
 0x14f   :  { %461 = vmatpush.msrb.mxu0 %v414_v42  ;;  %6005 = vmatpush.msrb.mxu1 %v414_v42 }
 0x150   :  { %5565 = vmatmul.msk.f32.vlgmr.msrb.gmra.mxu0 %vm243_vm2, %v398_v39  ;;  %5572 = vmatmul.msk.f32.vlgmr.msrb.gmra.mxu1 %vm243_vm2, %v405_v40 }
 0x151   :  { %561 = vmatpush.msra.mxu1 %v514_v43  ;;  %688 = vmatpush.msra.mxu2 %v635_v26  ;;  %v603_v43 = vld [vmem:[%s6775_s17] sm:$0xff] }
 0x153   :  { %689 = vmatpush.msra.mxu2 %v634_v28 }
 0x155   :  { %5547 = vmatmul.msk.f32.gmra.mxu2 %vm243_vm2, %v231_v44  ;;  %v374_v36 = vpop.f32.mrf.mxu3 }
 0x156   :  { %690 = vmatpush.msra.mxu2 %v633_v29 }
 0x158   :  { %5566 = vmatmul.msk.f32.gmra.mxu0 %vm243_vm2, %v399_v45  ;;  %5573 = vmatmul.msk.f32.gmra.mxu1 %vm243_vm2, %v406_v46 }
 0x15d   :  { %5548 = vmatmul.msk.f32.gmra.mxu2 %vm243_vm2, %v232_v48  ;;  %v377_v42 = vpop.f32.mrf.mxu3 }
 0x160   :  { %5567 = vmatmul.msk.f32.gmra.mxu0 %vm243_vm2, %v400_v49  ;;  %5574 = vmatmul.msk.f32.gmra.mxu1 %vm243_vm2, %v407_v50 }
 0x165   :  { %5549 = vmatmul.msk.f32.gmra.mxu2 %vm243_vm2, %v233_v52  ;;  %v380_v55 = vpop.f32.mrf.mxu3 }
 0x168   :  { %5568 = vmatmul.msk.f32.gmra.mxu0 %vm243_vm2, %v401_v53  ;;  %5575 = vmatmul.msk.f32.vlgmr.msra.gmra.mxu1 %vm243_vm2, %v503_v54 }
 0x16d   :  { %5550 = vmatmul.msk.f32.gmra.mxu2 %vm243_vm2, %v234_v56 }
 0x170   :  { %5569 = vmatmul.msk.f32.gmra.mxu0 %vm243_vm2, %v402_v57  ;;  %5576 = vmatmul.msk.f32.gmra.mxu1 %vm243_vm2, %v504_v58 }
 0x175   :  { %5551 = vmatmul.msk.f32.gmra.mxu2 %vm243_vm2, %v235_v60  ;;  %v605_v60 = vld [vmem:[%s6775_s17 + $0x10] sm:$0xff] }
 0x178   :  { %5570 = vmatmul.msk.f32.gmra.mxu0 %vm243_vm2, %v403_v61  ;;  %5577 = vmatmul.msk.f32.gmra.mxu1 %vm243_vm2, %v505_v62 }
 0x17d   :  { %5552 = vmatmul.msk.f32.gmra.mxu2 %vm243_vm2, %v236_v63 }
 0x180   :  { %5571 = vmatmul.msk.f32.gmra.mxu0 %vm243_vm2, %v404_v0  ;;  %5578 = vmatmul.msk.f32.gmra.mxu1 %vm243_vm2, %v506_v1 }
 0x185   :  { %5553 = vmatmul.msk.f32.gmra.mxu2 %vm243_vm2, %v237_v2  ;;  %v383_v2 = vpop.f32.mrf.mxu3 }
 0x188   :  { %5579 = vmatmul.msk.f32.gmra.mxu1 %vm243_vm2, %v507_v3 }
 0x18d   :  { %5554 = vmatmul.msk.f32.gmra.mxu2 %vm243_vm2, %v238_v4 }
 0x190   :  { %5580 = vmatmul.msk.f32.gmra.mxu1 %vm243_vm2, %v508_v5  ;;  %v606_v5 = vld [vmem:[%s6775_s17 + $0x18] sm:$0xff] }
 0x195   :  { %5555 = vmatmul.msk.f32.vlgmr.msrb.gmra.mxu2 %vm243_vm2, %v219_v6 }
 0x198   :  { %5581 = vmatmul.msk.f32.gmra.mxu1 %vm243_vm2, %v509_v7 }
 0x19d   :  { %5556 = vmatmul.msk.f32.gmra.mxu2 %vm243_vm2, %v220_v8 }
 0x1a0   :  { %5582 = vmatmul.msk.f32.gmra.mxu1 %vm243_vm2, %v510_v9 }
 0x1a8   :  { %5583 = vmatmul.msk.f32.gmra.mxu1 %vm243_vm2, %v511_v10 }
 0x1b0   :  { %5584 = vmatmul.msk.f32.gmra.mxu1 %vm243_vm2, %v512_v11  ;;  %vm3628_vm2 = vcmask 916480  }
 0x1c8   :  { %v291_v12 = vpop.f32.mrf.mxu2 }
 0x1cd   :  { %v7045_v16 = vpop.f32.mrf.mxu1  ;;  %v463_v31 = vpop.f32.mrf.mxu0 }
 0x1d0   :  { %v294_v13 = vpop.f32.mrf.mxu2 }
 0x1d5   :  { %v7049_v18 = vpop.f32.mrf.mxu1  ;;  %v466_v35 = vpop.f32.mrf.mxu0 }
 0x1d8   :  { %v297_v14 = vpop.f32.mrf.mxu2 }
 0x1d9   :  { %v375_v52 = vadd.f32 %v374_v36, %v297_v14  ;;  %v607_v14 = vld [vmem:[%s6775_s17 + $0x20] sm:$0xff] }
 0x1dd   :  { %v7058_v23 = vpop.f32.mrf.mxu1  ;;  %v469_v41 = vpop.f32.mrf.mxu0 }
 0x1de   :  { %v495_v56 = vadd.f32 %v469_v41, %v375_v52 }
 0x1e0   :  { %v300_v15 = vpop.f32.mrf.mxu2 }
 0x1e1   :  { %v378_v62 = vadd.f32 %v377_v42, %v300_v15 }
 0x1e5   :  { %v563_v30 = vpop.f32.mrf.mxu1  ;;  %v472_v54 = vpop.f32.mrf.mxu0 }
 0x1e6   :  { %v496_v0 = vadd.f32 %v472_v54, %v378_v62 }
 0x1e8   :  { %v7047_v17 = vpop.f32.mrf.mxu2 }
 0x1e9   :  { %v381_v6 = vadd.f32 %v380_v55, %v7047_v17  ;;  %v608_v17 = vld [vmem:[%s6775_s17 + $0x28] sm:$0xff] }
 0x1ea   :  { %v612_v55 = vld [vmem:[%s6775_s17 + $0x48] sm:$0xff] }
 0x1ed   :  { %v566_v33 = vpop.f32.mrf.mxu1  ;;  %v475_v1 = vpop.f32.mrf.mxu0 }
 0x1ee   :  { %v497_v9 = vadd.f32 %v475_v1, %v381_v6 }
 0x1f0   :  { %v7051_v19 = vpop.f32.mrf.mxu2 }
 0x1f1   :  { %v384_v15 = vadd.f32 %v383_v2, %v7051_v19 }
 0x1f5   :  { %v569_v37 = vpop.f32.mrf.mxu1 }
 0x1f6   :  { %v595_v58 = vadd.f32 %v569_v37, %v495_v56  ;;  %v609_v37 = vld [vmem:[%s6775_s17 + $0x30] sm:$0xff] }
 0x1f8   :  { %v7055_v21 = vpop.f32.mrf.mxu2  ;;  %v615_v63 = vadd.f32 %v605_v60, %v595_v58 }
 0x1fa   :  { %v625_v4 = vmax.f32 %v615_v63, 0.0 }
 0x1fd   :  { %v572_v49 = vpop.f32.mrf.mxu1 }
 0x1fe   :  { %v596_v3 = vadd.f32 %v572_v49, %v496_v0 }
 0x200   :  { %v7063_v27 = vpop.f32.mrf.mxu2  ;;  %v616_v7 = vadd.f32 %v606_v5, %v596_v3 }
 0x202   :  { %v626_v11 = vmax.f32 %v616_v7, 0.0 }
 0x205   :  { %v575_v61 = vpop.f32.mrf.mxu1 }
 0x206   :  { %v597_v10 = vadd.f32 %v575_v61, %v497_v9 }
 0x208   :  { %v7067_v32 = vpop.f32.mrf.mxu2  ;;  %v617_v20 = vadd.f32 %v607_v14, %v597_v10 }
 0x20a   :  { %v627_v26 = vmax.f32 %v617_v20, 0.0 }
 0x20d   :  { %v578_v8 = vpop.f32.mrf.mxu1 }
 0x210   :  { %v7069_v34 = vpop.f32.mrf.mxu2 }
 0x215   :  { %v581_v24 = vpop.f32.mrf.mxu1 }
 0x218   :  { %v368_v38 = vpop.f32.mrf.mxu2 }
 0x219   :  { %v369_v39 = vadd.f32 %v368_v38, %v291_v12  ;;  %v478_v12 = vpop.f32.mrf.mxu0 }
 0x21a   :  { %v498_v22 = vadd.f32 %v478_v12, %v384_v15 }
 0x21b   :  { %v493_v40 = vadd.f32 %v463_v31, %v369_v39 }
 0x21c   :  { %v598_v25 = vadd.f32 %v578_v8, %v498_v22 }
 0x21d   :  { %v593_v44 = vadd.f32 %v563_v30, %v493_v40  ;;  %v584_v38 = vpop.f32.mrf.mxu1 }
 0x21e   :  { %v618_v31 = vadd.f32 %v608_v17, %v598_v25 }
 0x21f   :  { %v613_v45 = vadd.f32 %v603_v43, %v593_v44  ;;  %v610_v44 = vld [vmem:[%s6775_s17 + $0x38] sm:$0xff] }
 0x220   :  { %v371_v46 = vpop.f32.mrf.mxu2  ;;  %v628_v36 = vmax.f32 %v618_v31, 0.0 }
 0x221   :  { %v623_v47 = vmax.f32 %v613_v45, 0.0  ;;  %v372_v48 = vadd.f32 %v371_v46, %v294_v13  ;;  %v386_v13 = vpop.f32.mrf.mxu3  ;;  %v481_v28 = vpop.f32.mrf.mxu0 }
 0x222   :  { %v387_v30 = vadd.f32 %v386_v13, %v7055_v21 }
 0x223   :  { %v494_v50 = vadd.f32 %v466_v35, %v372_v48  ;;  %5586 = vmatmul.msk.f32.vlgmr.msra.gmra.mxu2 %vm640_vm5, %v623_v47 }
 0x225   :  { %v594_v53 = vadd.f32 %v566_v33, %v494_v50  ;;  %v499_v33 = vadd.f32 %v481_v28, %v387_v30  ;;  %v587_v45 = vpop.f32.mrf.mxu1  ;;  %v611_v50 = vld [vmem:[%s6775_s17 + $0x40] sm:$0xff]  ;;  %s6734_s17 = smov 53  }
 0x226   :  { %v722_v28 = vld [vmem:[%s6780_s21] sm:$0xff] }
 0x227   :  { %v614_v57 = vadd.f32 %v604_v51, %v594_v53  ;;  %v599_v35 = vadd.f32 %v581_v24, %v499_v33 }
 0x229   :  { %v624_v59 = vmax.f32 %v614_v57, 0.0  ;;  %v389_v29 = vpop.f32.mrf.mxu3  ;;  %v619_v39 = vadd.f32 %v609_v37, %v599_v35  ;;  %v723_v35 = vld [vmem:[%s6780_s21 + $0x8] sm:$0xff] }
 0x22a   :  { %v390_v19 = vadd.f32 %v389_v29, %v7063_v27 }
 0x22b   :  { %5587 = vmatmul.msk.f32.gmra.mxu2 %vm640_vm5, %v624_v59  ;;  %v629_v43 = vmax.f32 %v619_v39, 0.0 }
 0x22c   :  { %v500_v41 = vadd.f32 %v7045_v16, %v390_v19 }
 0x22d   :  { %v590_v52 = vpop.f32.mrf.mxu1 }
 0x22e   :  { %v600_v42 = vadd.f32 %v584_v38, %v500_v41 }
 0x230   :  { %v620_v46 = vadd.f32 %v610_v44, %v600_v42  ;;  %v724_v44 = vld [vmem:[%s6780_s21 + $0x10] sm:$0xff] }
 0x231   :  { %v392_v40 = vpop.f32.mrf.mxu3 }
 0x232   :  { %v393_v21 = vadd.f32 %v392_v40, %v7067_v32  ;;  %v630_v49 = vmax.f32 %v620_v46, 0.0 }
 0x233   :  { %5588 = vmatmul.msk.f32.gmra.mxu2 %vm640_vm5, %v625_v4 }
 0x234   :  { %v501_v47 = vadd.f32 %v7049_v18, %v393_v21 }
 0x236   :  { %v601_v48 = vadd.f32 %v587_v45, %v501_v47 }
 0x238   :  { %v621_v16 = vadd.f32 %v611_v50, %v601_v48 }
 0x239   :  { %v395_v27 = vpop.f32.mrf.mxu3 }
 0x23a   :  { %v396_v51 = vadd.f32 %v395_v27, %v7069_v34  ;;  %v631_v54 = vmax.f32 %v621_v16, 0.0 }
 0x23b   :  { %5589 = vmatmul.msk.f32.gmra.mxu2 %vm640_vm5, %v626_v11 }
 0x23c   :  { %v502_v53 = vadd.f32 %v7058_v23, %v396_v51  ;;  %v734_v51 = vld [vmem:[%s6780_s21 + $0x60] sm:$0xff] }
 0x23e   :  { %v602_v32 = vadd.f32 %v590_v52, %v502_v53  ;;  %v725_v53 = vld [vmem:[%s6780_s21 + $0x18] sm:$0xff] }
 0x240   :  { %v622_v56 = vadd.f32 %v612_v55, %v602_v32 }
 0x242   :  { %v632_v57 = vmax.f32 %v622_v56, 0.0 }
 0x243   :  { %5590 = vmatmul.msk.f32.gmra.mxu2 %vm640_vm5, %v627_v26 }
 0x24b   :  { %5591 = vmatmul.msk.f32.gmra.mxu2 %vm640_vm5, %v628_v36 }
 0x253   :  { %5592 = vmatmul.msk.f32.gmra.mxu2 %vm640_vm5, %v629_v43 }
 0x25b   :  { %5593 = vmatmul.msk.f32.gmra.mxu2 %vm640_vm5, %v630_v49 }
 0x263   :  { %5594 = vmatmul.msk.f32.gmra.mxu2 %vm640_vm5, %v631_v54 }
 0x26b   :  { %5595 = vmatmul.msk.f32.gmra.mxu2 %vm640_vm5, %v632_v57 }
 0x2a6   :  { %v692_v18 = vpop.f32.mrf.mxu2 }
 0x2ae   :  { %v695_v58 = vpop.f32.mrf.mxu2 }
 0x2af   :  { %v6107_v0 = vpack.i.bf16 %v692_v18, %v695_v58 }
 0x2b6   :  { %v698_v59 = vpop.f32.mrf.mxu2 }
 0x2be   :  { %v701_v60 = vpop.f32.mrf.mxu2 }
 0x2bf   :  { %v6067_v34 = vpack.i.bf16 %v698_v59, %v701_v60 }
 0x2c1   :  { %6068 = vrot.lane.b32.xlu0 %v6067_v34, %s6733_s9 }
 0x2c6   :  { %v704_v61 = vpop.f32.mrf.mxu2 }
 0x2ce   :  { %v707_v62 = vpop.f32.mrf.mxu2 }
 0x2cf   :  { %v6072_v23 = vpack.i.bf16 %v704_v61, %v707_v62 }
 0x2d1   :  { %6073 = vrot.lane.b32.xlu0 %v6072_v23, %s6733_s9 }
 0x2d6   :  { %v710_v63 = vpop.f32.mrf.mxu2 }
 0x2d9   :  { %6108 = vrot.lane.b32.xlu0 %v6107_v0, %s6733_s9 }
 0x2de   :  { %v713_v1 = vpop.f32.mrf.mxu2 }
 0x2df   :  { %v6087_v2 = vpack.i.bf16 %v710_v63, %v713_v1 }
 0x2e1   :  { %6128 = vrot.lane.b32.xlu0 %v6067_v34, %s6730_s0  ;;  %6088 = vrot.lane.b32.xlu1 %v6087_v2, %s6730_s0 }
 0x2e2   :  { %6078 = vrot.lane.b32.xlu2 %v6087_v2, %s6733_s9 }
 0x2e6   :  { %v716_v3 = vpop.f32.mrf.mxu2 }
 0x2ea   :  { %6083 = vrot.lane.b32.xlu2 %v6087_v2, %s6734_s17  ;;  %v967_v2 = vld [vmem:[%s6780_s21 + $0xd0] sm:$0xff] }
 0x2ee   :  { %v719_v4 = vpop.f32.mrf.mxu2 }
 0x2ef   :  { %918 = vmatpush.msra.mxu0 %v719_v4  ;;  %v6097_v5 = vpack.i.bf16 %v716_v3, %v719_v4  ;;  %v1111_v4 = vld [vmem:[%s6780_s21 + $0x138] sm:$0xff] }
 0x2f1   :  { %6093 = vrot.lane.b32.xlu1 %v6097_v5, %s6733_s9  ;;  %919 = vmatpush.msra.mxu0 %v716_v3  ;;  %v728_v3 = vld [vmem:[%s6780_s21 + $0x30] sm:$0xff] }
 0x2f2   :  { %6098 = vrot.lane.b32.xlu2 %v6097_v5, %s6734_s17 }
 0x2f3   :  { %920 = vmatpush.msra.mxu0 %v713_v1  ;;  %v737_v1 = vld [vmem:[%s6780_s21 + $0x78] sm:$0xff] }
 0x2f5   :  { %921 = vmatpush.msra.mxu0 %v710_v63  ;;  %v727_v63 = vld [vmem:[%s6780_s21 + $0x28] sm:$0xff] }
 0x2f7   :  { %922 = vmatpush.msra.mxu0 %v707_v62  ;;  %v736_v62 = vld [vmem:[%s6780_s21 + $0x70] sm:$0xff] }
 0x2f9   :  { %6113 = vrot.lane.b32.xlu1 %v6097_v5, %s6730_s0  ;;  %923 = vmatpush.msra.mxu0 %v704_v61  ;;  %v1109_v61 = vld [vmem:[%s6780_s21 + $0x128] sm:$0xff]  ;;  %v738_v5 = vld [vmem:[%s6780_s21 + $0x80] sm:$0xff] }
 0x2fa   :  { %6103 = vrot.lane.b32.xlu2 %v6072_v23, %s6734_s17 }
 0x2fb   :  { %924 = vmatpush.msra.mxu0 %v701_v60  ;;  %v965_v60 = vld [vmem:[%s6780_s21 + $0xc0] sm:$0xff] }
 0x2fd   :  { %925 = vmatpush.msra.mxu0 %v698_v59  ;;  %v735_v59 = vld [vmem:[%s6780_s21 + $0x68] sm:$0xff] }
 0x2ff   :  { %926 = vmatpush.msra.mxu0 %v695_v58  ;;  %v1108_v58 = vld [vmem:[%s6780_s21 + $0x120] sm:$0xff] }
 0x301   :  { %6118 = vrot.lane.b32.xlu1 %v6072_v23, %s6730_s0  ;;  %927 = vmatpush.msra.mxu0 %v692_v18  ;;  %v966_v23 = vld [vmem:[%s6780_s21 + $0xc8] sm:$0xff] }
 0x302   :  { %6123 = vrot.lane.b32.xlu2 %v6067_v34, %s6734_s17  ;;  %5608 = vmatmul.msk.f32.vlgmr.msra.gmra.mxu0 %vm786_vm6, %v722_v28  ;;  %v726_v34 = vld [vmem:[%s6780_s21 + $0x20] sm:$0xff]  ;;  %v972_v28 = vld [vmem:[%s6780_s21 + $0xf8] sm:$0xff] }
 0x309   :  { %6133 = vrot.lane.b32.xlu1 %v6107_v0, %s6734_s17 }
 0x30a   :  { %6138 = vrot.lane.b32.xlu2 %v6107_v0, %s6730_s0  ;;  %5609 = vmatmul.msk.f32.gmra.mxu0 %vm786_vm6, %v723_v35  ;;  %v1110_v0 = vld [vmem:[%s6780_s21 + $0x130] sm:$0xff]  ;;  %v1117_v35 = vld [vmem:[%s6780_s21 + $0x168] sm:$0xff] }
 0x312   :  { %5610 = vmatmul.msk.f32.gmra.mxu0 %vm786_vm6, %v724_v44  ;;  %v1289_v44 = vld [vmem:[%s6800_s8 + $0x10] sm:$0xff] }
 0x31a   :  { %5611 = vmatmul.msk.f32.gmra.mxu0 %vm786_vm6, %v725_v53 }
 0x322   :  { %5612 = vmatmul.msk.f32.gmra.mxu0 %vm786_vm6, %v726_v34 }
 0x32a   :  { %5613 = vmatmul.msk.f32.gmra.mxu0 %vm786_vm6, %v727_v63 }
 0x332   :  { %5614 = vmatmul.msk.f32.gmra.mxu0 %vm786_vm6, %v728_v3  ;;  %v1253_v3 = vld [vmem:[%s6790_s29 + $0x10] sm:$0xff] }
 0x333   :  { %v6069_v20 = vpop.permute.xlu0 %6068 }
 0x334   :  { %v6070_v43 = vunpack.i.l.bf16 %v6069_v20  ;;  %v6071_v45 = vunpack.i.h.bf16 %v6069_v20  ;;  %v1114_v20 = vld [vmem:[%s6780_s21 + $0x150] sm:$0xff] }
 0x33c   :  { %v6079_v6 = vpop.permute.xlu2 %6078 }
 0x33d   :  { %v6080_v33 = vunpack.i.l.bf16 %v6079_v6  ;;  %v6081_v36 = vunpack.i.h.bf16 %v6079_v6  ;;  %v968_v6 = vld [vmem:[%s6780_s21 + $0xd8] sm:$0xff] }
 0x343   :  { %v6074_v17 = vpop.permute.xlu0 %6073 }
 0x344   :  { %v6084_v7 = vpop.permute.xlu2 %6083  ;;  %v6075_v39 = vunpack.i.l.bf16 %v6074_v17  ;;  %v6076_v41 = vunpack.i.h.bf16 %v6074_v17  ;;  %v742_v17 = vld [vmem:[%s6780_s21 + $0xa0] sm:$0xff] }
 0x345   :  { %v6085_v11 = vunpack.i.l.bf16 %v6084_v7  ;;  %v6086_v12 = vunpack.i.h.bf16 %v6084_v7  ;;  %v729_v7 = vld [vmem:[%s6780_s21 + $0x38] sm:$0xff] }
 0x346   :  { %5615 = vmatmul.msk.f32.gmra.mxu0 %vm786_vm6, %v729_v7 }
 0x34b   :  { %v6109_v37 = vpop.permute.xlu0 %6108 }
 0x34c   :  { %v6099_v8 = vpop.permute.xlu2 %6098  ;;  %v6110_v27 = vunpack.i.l.bf16 %v6109_v37  ;;  %v6111_v50 = vunpack.i.h.bf16 %v6109_v37  ;;  %v974_v37 = vld [vmem:[%s6780_s21 + $0x108] sm:$0xff] }
 0x34d   :  { %v6100_v9 = vunpack.i.l.bf16 %v6099_v8  ;;  %v6101_v10 = vunpack.i.h.bf16 %v6099_v8  ;;  %v1112_v8 = vld [vmem:[%s6780_s21 + $0x140] sm:$0xff] }
 0x34f   :  { %1192 = vmatpush.msrb.mxu2 %v6100_v9  ;;  %v739_v9 = vld [vmem:[%s6780_s21 + $0x88] sm:$0xff] }
 0x351   :  { %1193 = vmatpush.msrb.mxu2 %v6101_v10  ;;  %v969_v10 = vld [vmem:[%s6780_s21 + $0xe0] sm:$0xff] }
 0x353   :  { %1194 = vmatpush.msrb.mxu2 %v6085_v11  ;;  %v6089_v22 = vpop.permute.xlu1 %6088  ;;  %v6129_v48 = vpop.permute.xlu0 %6128  ;;  %v730_v11 = vld [vmem:[%s6780_s21 + $0x40] sm:$0xff] }
 0x354   :  { %v6104_v13 = vpop.permute.xlu2 %6103  ;;  %v6090_v42 = vunpack.i.l.bf16 %v6089_v22  ;;  %v6091_v21 = vunpack.i.h.bf16 %v6089_v22  ;;  %v6130_v16 = vunpack.i.l.bf16 %v6129_v48  ;;  %v6131_v32 = vunpack.i.h.bf16 %v6129_v48  ;;  %5616 = vmatmul.msk.f32.gmra.mxu0 %vm786_vm6, %v730_v11  ;;  %v741_v22 = vld [vmem:[%s6780_s21 + $0x98] sm:$0xff] }
 0x355   :  { %v6105_v14 = vunpack.i.l.bf16 %v6104_v13  ;;  %1195 = vmatpush.msrb.mxu2 %v6086_v12  ;;  %v6106_v15 = vunpack.i.h.bf16 %v6104_v13  ;;  %v1113_v12 = vld [vmem:[%s6780_s21 + $0x148] sm:$0xff]  ;;  %v740_v13 = vld [vmem:[%s6780_s21 + $0x90] sm:$0xff] }
 0x357   :  { %1196 = vmatpush.msrb.mxu2 %v6105_v14  ;;  %v970_v14 = vld [vmem:[%s6780_s21 + $0xe8] sm:$0xff] }
 0x359   :  { %1197 = vmatpush.msrb.mxu2 %v6106_v15  ;;  %v731_v15 = vld [vmem:[%s6780_s21 + $0x48] sm:$0xff] }
 0x35c   :  { %v6124_v24 = vpop.permute.xlu2 %6123  ;;  %5617 = vmatmul.msk.f32.gmra.mxu0 %vm786_vm6, %v731_v15 }
 0x35d   :  { %v6125_v25 = vunpack.i.l.bf16 %v6124_v24  ;;  %v6126_v26 = vunpack.i.h.bf16 %v6124_v24  ;;  %v971_v24 = vld [vmem:[%s6780_s21 + $0xf0] sm:$0xff] }
 0x35f   :  { %1198 = vmatpush.msrb.mxu2 %v6125_v25  ;;  %v732_v25 = vld [vmem:[%s6780_s21 + $0x50] sm:$0xff] }
 0x361   :  { %1199 = vmatpush.msrb.mxu2 %v6126_v26  ;;  %v1115_v26 = vld [vmem:[%s6780_s21 + $0x158] sm:$0xff] }
 0x363   :  { %v6094_v29 = vpop.permute.xlu1 %6093 }
 0x364   :  { %v6095_v30 = vunpack.i.l.bf16 %v6094_v29  ;;  %v6096_v31 = vunpack.i.h.bf16 %v6094_v29  ;;  %v6139_v52 = vpop.permute.xlu2 %6138  ;;  %5618 = vmatmul.msk.f32.gmra.mxu0 %vm786_vm6, %v732_v25  ;;  %v733_v29 = vld [vmem:[%s6780_s21 + $0x58] sm:$0xff] }
 0x365   :  { %v6140_v55 = vunpack.i.l.bf16 %v6139_v52  ;;  %v6141_v57 = vunpack.i.h.bf16 %v6139_v52  ;;  %v1251_v52 = vld [vmem:[%s6790_s29] sm:$0xff] }
 0x366   :  { %829 = vmatpush.msrb.mxu3 %v6095_v30  ;;  %v1116_v30 = vld [vmem:[%s6780_s21 + $0x160] sm:$0xff] }
 0x368   :  { %830 = vmatpush.msrb.mxu3 %v6096_v31  ;;  %v743_v31 = vld [vmem:[%s6780_s21 + $0xa8] sm:$0xff] }
 0x36a   :  { %831 = vmatpush.msrb.mxu3 %v6080_v33  ;;  %v973_v33 = vld [vmem:[%s6780_s21 + $0x100] sm:$0xff] }
 0x36b   :  { %v6114_v38 = vpop.permute.xlu1 %6113 }
 0x36c   :  { %v6115_v19 = vunpack.i.l.bf16 %v6114_v38  ;;  %832 = vmatpush.msrb.mxu3 %v6081_v36  ;;  %v6116_v40 = vunpack.i.h.bf16 %v6114_v38  ;;  %5619 = vmatmul.msk.f32.gmra.mxu0 %vm786_vm6, %v733_v29  ;;  %v744_v36 = vld [vmem:[%s6780_s21 + $0xb0] sm:$0xff]  ;;  %v1255_v29 = vld [vmem:[%s6790_s29 + $0x20] sm:$0xff] }
 0x36d   :  { %v1118_v38 = vld [vmem:[%s6780_s21 + $0x170] sm:$0xff] }
 0x36e   :  { %833 = vmatpush.msrb.mxu3 %v6075_v39  ;;  %1049 = vmatpush.msrb.mxu1 %v6115_v19  ;;  %v745_v19 = vld [vmem:[%s6780_s21 + $0xb8] sm:$0xff]  ;;  %v975_v39 = vld [vmem:[%s6780_s21 + $0x110] sm:$0xff] }
 0x370   :  { %834 = vmatpush.msrb.mxu3 %v6076_v41  ;;  %1050 = vmatpush.msrb.mxu1 %v6116_v40  ;;  %v1119_v40 = vld [vmem:[%s6780_s21 + $0x178] sm:$0xff] }
 0x371   :  { %v976_v41 = vld [vmem:[%s6780_s21 + $0x118] sm:$0xff]  ;;  %s6735_s21 = smov 116  }
 0x372   :  { %835 = vmatpush.msrb.mxu3 %v6070_v43  ;;  %1051 = vmatpush.msrb.mxu1 %v6090_v42  ;;  %v1290_v42 = vld [vmem:[%s6800_s8 + $0x18] sm:$0x1] }
 0x373   :  { %v6119_v46 = vpop.permute.xlu1 %6118 }
 0x374   :  { %v6120_v47 = vunpack.i.l.bf16 %v6119_v46  ;;  %836 = vmatpush.msrb.mxu3 %v6071_v45  ;;  %1052 = vmatpush.msrb.mxu1 %v6091_v21  ;;  %v6121_v49 = vunpack.i.h.bf16 %v6119_v46  ;;  %v1288_v21 = vld [vmem:[%s6800_s8 + $0x8] sm:$0xff]  ;;  %v1287_v45 = vld [vmem:[%s6800_s8] sm:$0xff]  ;;  %s6739_s8 = smov 110  }
 0x376   :  { %837 = vmatpush.msrb.mxu3 %v6110_v27  ;;  %1053 = vmatpush.msrb.mxu1 %v6120_v47 }
 0x378   :  { %838 = vmatpush.msrb.mxu3 %v6111_v50  ;;  %1054 = vmatpush.msrb.mxu1 %v6121_v49 }
 0x379   :  { %5596 = vmatmul.msk.f32.vlgmr.msrb.gmra.mxu3 %vm786_vm6, %v734_v51 }
 0x37a   :  { %1055 = vmatpush.msrb.mxu1 %v6130_v16  ;;  %5644 = vmatpush.msk.msra.mxu3 %vm1328_vm7, %v1290_v42 }
 0x37b   :  { %v6134_v54 = vpop.permute.xlu1 %6133 }
 0x37c   :  { %v6135_v56 = vunpack.i.l.bf16 %v6134_v54  ;;  %1056 = vmatpush.msrb.mxu1 %v6131_v32  ;;  %v6136_v18 = vunpack.i.h.bf16 %v6134_v54  ;;  %1345 = vmatpush.msra.mxu3 %v1289_v44 }
 0x37e   :  { %1057 = vmatpush.msrb.mxu1 %v6140_v55  ;;  %1200 = vmatpush.msrb.mxu2 %v6135_v56 }
 0x37f   :  { %v929_v43 = vpop.f32.mrf.mxu0  ;;  %1346 = vmatpush.msra.mxu3 %v1288_v21 }
 0x380   :  { %1058 = vmatpush.msrb.mxu1 %v6141_v57  ;;  %1201 = vmatpush.msrb.mxu2 %v6136_v18 }
 0x381   :  { %5632 = vmatmul.msk.f32.vlgmr.msrb.gmra.mxu2 %vm786_vm6, %v1108_v58  ;;  %5597 = vmatmul.msk.f32.gmra.mxu3 %vm786_vm6, %v735_v59 }
 0x382   :  { %5620 = vmatmul.msk.f32.vlgmr.msrb.gmra.mxu1 %vm786_vm6, %v965_v60  ;;  %1347 = vmatpush.msra.mxu3 %v1287_v45  ;;  %v1252_v60 = vld [vmem:[%s6790_s29 + $0x8] sm:$0xff] }
 0x387   :  { %v932_v46 = vpop.f32.mrf.mxu0 }
 0x389   :  { %5633 = vmatmul.msk.f32.gmra.mxu2 %vm786_vm6, %v1109_v61  ;;  %5598 = vmatmul.msk.f32.gmra.mxu3 %vm786_vm6, %v736_v62 }
 0x38a   :  { %5621 = vmatmul.msk.f32.gmra.mxu1 %vm786_vm6, %v966_v23 }
 0x38f   :  { %v935_v47 = vpop.f32.mrf.mxu0 }
 0x391   :  { %5634 = vmatmul.msk.f32.gmra.mxu2 %vm786_vm6, %v1110_v0  ;;  %5599 = vmatmul.msk.f32.gmra.mxu3 %vm786_vm6, %v737_v1 }
 0x392   :  { %5622 = vmatmul.msk.f32.gmra.mxu1 %vm786_vm6, %v967_v2 }
 0x397   :  { %v938_v51 = vpop.f32.mrf.mxu0 }
 0x399   :  { %5635 = vmatmul.msk.f32.gmra.mxu2 %vm786_vm6, %v1111_v4  ;;  %5600 = vmatmul.msk.f32.gmra.mxu3 %vm786_vm6, %v738_v5 }
 0x39a   :  { %5623 = vmatmul.msk.f32.gmra.mxu1 %vm786_vm6, %v968_v6 }
 0x39f   :  { %v941_v58 = vpop.f32.mrf.mxu0 }
 0x3a1   :  { %5636 = vmatmul.msk.f32.gmra.mxu2 %vm786_vm6, %v1112_v8  ;;  %5601 = vmatmul.msk.f32.gmra.mxu3 %vm786_vm6, %v739_v9 }
 0x3a2   :  { %5624 = vmatmul.msk.f32.gmra.mxu1 %vm786_vm6, %v969_v10 }
 0x3a7   :  { %v944_v7 = vpop.f32.mrf.mxu0 }
 0x3a9   :  { %5637 = vmatmul.msk.f32.gmra.mxu2 %vm786_vm6, %v1113_v12  ;;  %5602 = vmatmul.msk.f32.gmra.mxu3 %vm786_vm6, %v740_v13  ;;  %v1254_v13 = vld [vmem:[%s6790_s29 + $0x18] sm:$0xff] }
 0x3aa   :  { %5625 = vmatmul.msk.f32.gmra.mxu1 %vm786_vm6, %v970_v14 }
 0x3af   :  { %v947_v25 = vpop.f32.mrf.mxu0 }
 0x3b1   :  { %5638 = vmatmul.msk.f32.gmra.mxu2 %vm786_vm6, %v1114_v20  ;;  %5603 = vmatmul.msk.f32.gmra.mxu3 %vm786_vm6, %v741_v22 }
 0x3b2   :  { %5626 = vmatmul.msk.f32.gmra.mxu1 %vm786_vm6, %v971_v24 }
 0x3b9   :  { %5639 = vmatmul.msk.f32.gmra.mxu2 %vm786_vm6, %v1115_v26  ;;  %5604 = vmatmul.msk.f32.gmra.mxu3 %vm786_vm6, %v742_v17 }
 0x3ba   :  { %5627 = vmatmul.msk.f32.gmra.mxu1 %vm786_vm6, %v972_v28 }
 0x3c1   :  { %5640 = vmatmul.msk.f32.gmra.mxu2 %vm786_vm6, %v1116_v30  ;;  %5605 = vmatmul.msk.f32.gmra.mxu3 %vm786_vm6, %v743_v31 }
 0x3c2   :  { %5628 = vmatmul.msk.f32.gmra.mxu1 %vm786_vm6, %v973_v33 }
 0x3c9   :  { %5641 = vmatmul.msk.f32.gmra.mxu2 %vm786_vm6, %v1117_v35  ;;  %5606 = vmatmul.msk.f32.gmra.mxu3 %vm786_vm6, %v744_v36 }
 0x3ca   :  { %5629 = vmatmul.msk.f32.gmra.mxu1 %vm786_vm6, %v974_v37 }
 0x3d1   :  { %5642 = vmatmul.msk.f32.gmra.mxu2 %vm786_vm6, %v1118_v38  ;;  %5607 = vmatmul.msk.f32.gmra.mxu3 %vm786_vm6, %v745_v19  ;;  %v950_v19 = vpop.f32.mrf.mxu0 }
 0x3d2   :  { %5630 = vmatmul.msk.f32.gmra.mxu1 %vm786_vm6, %v975_v39 }
 0x3d9   :  { %5643 = vmatmul.msk.f32.gmra.mxu2 %vm786_vm6, %v1119_v40  ;;  %v1256_v40 = vld [vmem:[%s6790_s29 + $0x28] sm:$0xff] }
 0x3da   :  { %5631 = vmatmul.msk.f32.gmra.mxu1 %vm786_vm6, %v976_v41 }
 0x3fc   :  { %v840_v27 = vpop.f32.mrf.mxu3 }
 0x3fd   :  { %v930_v48 = vadd.f32 %v929_v43, %v840_v27 }
 0x3ff   :  { %v1060_v49 = vpop.f32.mrf.mxu1 }
 0x400   :  { %v1096_v50 = vadd.f32 %v1060_v49, %v930_v48  ;;  %v1257_v48 = vld [vmem:[%s6790_s29 + $0x30] sm:$0xff] }
 0x404   :  { %v1203_v16 = vpop.f32.mrf.mxu2  ;;  %v843_v53 = vpop.f32.mrf.mxu3 }
 0x405   :  { %v1239_v32 = vadd.f32 %v1203_v16, %v1096_v50  ;;  %v933_v54 = vadd.f32 %v932_v46, %v843_v53 }
 0x407   :  { %v1263_v55 = vadd.f32 %v1251_v52, %v1239_v32  ;;  %v1063_v56 = vpop.f32.mrf.mxu1 }
 0x408   :  { %v1097_v18 = vadd.f32 %v1063_v56, %v933_v54 }
 0x409   :  { %v1275_v57 = vmax.f32 %v1263_v55, 0.0  ;;  %v1258_v55 = vld [vmem:[%s6790_s29 + $0x38] sm:$0xff] }
 0x40b   :  { %5645 = vmatmul.msk.f32.vlgmr.msra.gmra.mxu3 %vm1291_vm8, %v1275_v57 }
 0x40c   :  { %v1206_v59 = vpop.f32.mrf.mxu2  ;;  %v846_v34 = vpop.f32.mrf.mxu3 }
 0x40d   :  { %v1240_v61 = vadd.f32 %v1206_v59, %v1097_v18  ;;  %v936_v62 = vadd.f32 %v935_v47, %v846_v34  ;;  %v953_v47 = vpop.f32.mrf.mxu0 }
 0x40f   :  { %v1264_v23 = vadd.f32 %v1252_v60, %v1240_v61  ;;  %v1066_v63 = vpop.f32.mrf.mxu1 }
 0x410   :  { %v1098_v0 = vadd.f32 %v1066_v63, %v936_v62 }
 0x411   :  { %v1276_v1 = vmax.f32 %v1264_v23, 0.0  ;;  %v1259_v23 = vld [vmem:[%s6790_s29 + $0x40] sm:$0xff] }
 0x413   :  { %5646 = vmatmul.msk.f32.gmra.mxu3 %vm1291_vm8, %v1276_v1 }
 0x414   :  { %v1209_v2 = vpop.f32.mrf.mxu2  ;;  %v849_v4 = vpop.f32.mrf.mxu3 }
 0x415   :  { %v1241_v5 = vadd.f32 %v1209_v2, %v1098_v0  ;;  %v939_v6 = vadd.f32 %v938_v51, %v849_v4 }
 0x417   :  { %v1265_v8 = vadd.f32 %v1253_v3, %v1241_v5  ;;  %v1069_v9 = vpop.f32.mrf.mxu1 }
 0x418   :  { %v1099_v10 = vadd.f32 %v1069_v9, %v939_v6 }
 0x419   :  { %v1277_v11 = vmax.f32 %v1265_v8, 0.0  ;;  %v1260_v8 = vld [vmem:[%s6790_s29 + $0x48] sm:$0xff] }
 0x41b   :  { %5647 = vmatmul.msk.f32.gmra.mxu3 %vm1291_vm8, %v1277_v11 }
 0x41c   :  { %v1212_v12 = vpop.f32.mrf.mxu2  ;;  %v852_v14 = vpop.f32.mrf.mxu3 }
 0x41d   :  { %v1242_v15 = vadd.f32 %v1212_v12, %v1099_v10  ;;  %v942_v20 = vadd.f32 %v941_v58, %v852_v14  ;;  %v956_v58 = vpop.f32.mrf.mxu0 }
 0x41f   :  { %v1266_v22 = vadd.f32 %v1254_v13, %v1242_v15  ;;  %v1072_v24 = vpop.f32.mrf.mxu1 }
 0x420   :  { %v1100_v26 = vadd.f32 %v1072_v24, %v942_v20  ;;  %v1261_v24 = vld [vmem:[%s6790_s29 + $0x50] sm:$0xff] }
 0x421   :  { %v1278_v17 = vmax.f32 %v1266_v22, 0.0 }
 0x423   :  { %5648 = vmatmul.msk.f32.gmra.mxu3 %vm1291_vm8, %v1278_v17 }
 0x424   :  { %v1215_v28 = vpop.f32.mrf.mxu2  ;;  %v855_v30 = vpop.f32.mrf.mxu3 }
 0x425   :  { %v1243_v31 = vadd.f32 %v1215_v28, %v1100_v26  ;;  %v945_v33 = vadd.f32 %v944_v7, %v855_v30  ;;  %v959_v4 = vpop.f32.mrf.mxu0 }
 0x427   :  { %v1267_v35 = vadd.f32 %v1255_v29, %v1243_v31  ;;  %v1075_v36 = vpop.f32.mrf.mxu1 }
 0x428   :  { %v1101_v38 = vadd.f32 %v1075_v36, %v945_v33 }
 0x429   :  { %v1279_v37 = vmax.f32 %v1267_v35, 0.0  ;;  %v1262_v35 = vld [vmem:[%s6790_s29 + $0x58] sm:$0xff]  ;;  %s6737_s29 = smov 104  }
 0x42b   :  { %5649 = vmatmul.msk.f32.gmra.mxu3 %vm1291_vm8, %v1279_v37 }
 0x42c   :  { %v1218_v39 = vpop.f32.mrf.mxu2  ;;  %v858_v41 = vpop.f32.mrf.mxu3 }
 0x42d   :  { %v1244_v42 = vadd.f32 %v1218_v39, %v1101_v38  ;;  %v948_v43 = vadd.f32 %v947_v25, %v858_v41  ;;  %v962_v20 = vpop.f32.mrf.mxu0 }
 0x42f   :  { %v1268_v44 = vadd.f32 %v1256_v40, %v1244_v42  ;;  %v1078_v21 = vpop.f32.mrf.mxu1 }
 0x430   :  { %v1102_v46 = vadd.f32 %v1078_v21, %v948_v43 }
 0x431   :  { %v1280_v45 = vmax.f32 %v1268_v44, 0.0 }
 0x433   :  { %5650 = vmatmul.msk.f32.gmra.mxu3 %vm1291_vm8, %v1280_v45 }
 0x434   :  { %v1221_v27 = vpop.f32.mrf.mxu2  ;;  %v861_v49 = vpop.f32.mrf.mxu3 }
 0x435   :  { %v1245_v50 = vadd.f32 %v1221_v27, %v1102_v46  ;;  %v951_v51 = vadd.f32 %v950_v19, %v861_v49 }
 0x437   :  { %v1269_v16 = vadd.f32 %v1257_v48, %v1245_v50  ;;  %v1081_v52 = vpop.f32.mrf.mxu1 }
 0x438   :  { %v1103_v32 = vadd.f32 %v1081_v52, %v951_v51 }
 0x439   :  { %v1281_v53 = vmax.f32 %v1269_v16, 0.0 }
 0x43b   :  { %5651 = vmatmul.msk.f32.gmra.mxu3 %vm1291_vm8, %v1281_v53 }
 0x43c   :  { %v1224_v54 = vpop.f32.mrf.mxu2  ;;  %v864_v56 = vpop.f32.mrf.mxu3 }
 0x43d   :  { %v1246_v57 = vadd.f32 %v1224_v54, %v1103_v32  ;;  %v954_v18 = vadd.f32 %v953_v47, %v864_v56 }
 0x43f   :  { %v1270_v59 = vadd.f32 %v1258_v55, %v1246_v57  ;;  %v1084_v60 = vpop.f32.mrf.mxu1 }
 0x440   :  { %v1104_v61 = vadd.f32 %v1084_v60, %v954_v18 }
 0x441   :  { %v1282_v34 = vmax.f32 %v1270_v59, 0.0 }
 0x443   :  { %5652 = vmatmul.msk.f32.gmra.mxu3 %vm1291_vm8, %v1282_v34 }
 0x444   :  { %v1227_v62 = vpop.f32.mrf.mxu2  ;;  %v867_v63 = vpop.f32.mrf.mxu3 }
 0x445   :  { %v1247_v0 = vadd.f32 %v1227_v62, %v1104_v61  ;;  %v957_v1 = vadd.f32 %v956_v58, %v867_v63 }
 0x447   :  { %v1271_v2 = vadd.f32 %v1259_v23, %v1247_v0  ;;  %v1087_v3 = vpop.f32.mrf.mxu1 }
 0x448   :  { %v1105_v6 = vadd.f32 %v1087_v3, %v957_v1 }
 0x449   :  { %v1283_v5 = vmax.f32 %v1271_v2, 0.0 }
 0x44b   :  { %5653 = vmatmul.msk.f32.gmra.mxu3 %vm1291_vm8, %v1283_v5 }
 0x44c   :  { %v1230_v7 = vpop.f32.mrf.mxu2  ;;  %v870_v9 = vpop.f32.mrf.mxu3 }
 0x44d   :  { %v1248_v10 = vadd.f32 %v1230_v7, %v1105_v6  ;;  %v960_v11 = vadd.f32 %v959_v4, %v870_v9  ;;  %v1385_v4 = vld [vmem:[%s6795_s3] sm:$0xff] }
 0x44f   :  { %v1272_v12 = vadd.f32 %v1260_v8, %v1248_v10  ;;  %v1090_v13 = vpop.f32.mrf.mxu1 }
 0x450   :  { %v1106_v15 = vadd.f32 %v1090_v13, %v960_v11  ;;  %v1399_v13 = vld [vmem:[%s6795_s3 + $0x70] sm:$0xff] }
 0x451   :  { %v1284_v14 = vmax.f32 %v1272_v12, 0.0 }
 0x453   :  { %5654 = vmatmul.msk.f32.gmra.mxu3 %vm1291_vm8, %v1284_v14 }
 0x454   :  { %v1233_v22 = vpop.f32.mrf.mxu2  ;;  %v873_v25 = vpop.f32.mrf.mxu3 }
 0x455   :  { %v1249_v26 = vadd.f32 %v1233_v22, %v1106_v15  ;;  %v963_v17 = vadd.f32 %v962_v20, %v873_v25 }
 0x457   :  { %v1273_v28 = vadd.f32 %v1261_v24, %v1249_v26  ;;  %v1093_v29 = vpop.f32.mrf.mxu1  ;;  %v1386_v24 = vld [vmem:[%s6795_s3 + $0x8] sm:$0xff] }
 0x458   :  { %v1107_v31 = vadd.f32 %v1093_v29, %v963_v17 }
 0x459   :  { %v1285_v30 = vmax.f32 %v1273_v28, 0.0 }
 0x45b   :  { %5655 = vmatmul.msk.f32.gmra.mxu3 %vm1291_vm8, %v1285_v30 }
 0x45c   :  { %v1236_v33 = vpop.f32.mrf.mxu2 }
 0x45d   :  { %v1250_v36 = vadd.f32 %v1236_v33, %v1107_v31  ;;  %v1400_v31 = vld [vmem:[%s6795_s3 + $0x78] sm:$0xff] }
 0x45f   :  { %v1274_v37 = vadd.f32 %v1262_v35, %v1250_v36 }
 0x461   :  { %v1286_v38 = vmax.f32 %v1274_v37, 0.0 }
 0x463   :  { %5656 = vmatmul.msk.f32.gmra.mxu3 %vm1291_vm8, %v1286_v38  ;;  %v1387_v38 = vld [vmem:[%s6795_s3 + $0x10] sm:$0xff] }
 0x48e   :  { %v1349_v19 = vpop.f32.mrf.mxu3 }
 0x496   :  { %v1352_v39 = vpop.f32.mrf.mxu3 }
 0x497   :  { %v6227_v52 = vpack.i.bf16 %v1349_v19, %v1352_v39 }
 0x49e   :  { %v1355_v40 = vpop.f32.mrf.mxu3 }
 0x4a6   :  { %v1358_v41 = vpop.f32.mrf.mxu3 }
 0x4a7   :  { %v6212_v16 = vpack.i.bf16 %v1355_v40, %v1358_v41 }
 0x4ae   :  { %v1361_v42 = vpop.f32.mrf.mxu3 }
 0x4b6   :  { %v1364_v43 = vpop.f32.mrf.mxu3 }
 0x4b7   :  { %v6197_v51 = vpack.i.bf16 %v1361_v42, %v1364_v43 }
 0x4be   :  { %v1367_v44 = vpop.f32.mrf.mxu3 }
 0x4c6   :  { %v1370_v21 = vpop.f32.mrf.mxu3 }
 0x4c7   :  { %v6152_v45 = vpack.i.bf16 %v1367_v44, %v1370_v21 }
 0x4c9   :  { %6153 = vrot.lane.b32.xlu2 %v6152_v45, %s6735_s21  ;;  %6148 = vrot.lane.b32.xlu1 %v6152_v45, %s6736_s25 }
 0x4ca   :  { %6143 = vrot.lane.b32.xlu0 %v6152_v45, %s6737_s29  ;;  %v1388_v45 = vld [vmem:[%s6795_s3 + $0x18] sm:$0xff] }
 0x4ce   :  { %v1373_v46 = vpop.f32.mrf.mxu3 }
 0x4d6   :  { %v1376_v47 = vpop.f32.mrf.mxu3 }
 0x4d7   :  { %v6167_v27 = vpack.i.bf16 %v1373_v46, %v1376_v47 }
 0x4d9   :  { %6168 = vrot.lane.b32.xlu2 %v6167_v27, %s6735_s21  ;;  %6163 = vrot.lane.b32.xlu1 %v6167_v27, %s6736_s25 }
 0x4da   :  { %6158 = vrot.lane.b32.xlu0 %v6167_v27, %s6737_s29 }
 0x4de   :  { %v1379_v48 = vpop.f32.mrf.mxu3 }
 0x4e6   :  { %v1382_v49 = vpop.f32.mrf.mxu3 }
 0x4e7   :  { %1609 = vmatpush.msra.mxu1 %v1382_v49  ;;  %v6192_v50 = vpack.i.bf16 %v1379_v48, %v1382_v49 }
 0x4e9   :  { %6193 = vrot.lane.b32.xlu2 %v6192_v50, %s6735_s21  ;;  %6183 = vrot.lane.b32.xlu1 %v6192_v50, %s6736_s25 }
 0x4ea   :  { %6173 = vrot.lane.b32.xlu0 %v6192_v50, %s6737_s29  ;;  %1610 = vmatpush.msra.mxu1 %v1379_v48  ;;  %v1829_v50 = vld [vmem:[%s6795_s3 + $0x150] sm:$0xff] }
 0x4ec   :  { %1611 = vmatpush.msra.mxu1 %v1376_v47 }
 0x4ee   :  { %1612 = vmatpush.msra.mxu1 %v1373_v46 }
 0x4f0   :  { %1613 = vmatpush.msra.mxu1 %v1370_v21 }
 0x4f1   :  { %6198 = vrot.lane.b32.xlu2 %v6197_v51, %s6735_s21  ;;  %6188 = vrot.lane.b32.xlu1 %v6197_v51, %s6736_s25 }
 0x4f2   :  { %6178 = vrot.lane.b32.xlu0 %v6197_v51, %s6737_s29  ;;  %1614 = vmatpush.msra.mxu1 %v1367_v44  ;;  %v1401_v44 = vld [vmem:[%s6795_s3 + $0x80] sm:$0xff] }
 0x4f4   :  { %1615 = vmatpush.msra.mxu1 %v1364_v43 }
 0x4f6   :  { %1616 = vmatpush.msra.mxu1 %v1361_v42 }
 0x4f8   :  { %1617 = vmatpush.msra.mxu1 %v1358_v41 }
 0x4f9   :  { %6213 = vrot.lane.b32.xlu2 %v6212_v16, %s6735_s21  ;;  %6208 = vrot.lane.b32.xlu1 %v6212_v16, %s6736_s25 }
 0x4fa   :  { %6203 = vrot.lane.b32.xlu0 %v6212_v16, %s6737_s29  ;;  %1618 = vmatpush.msra.mxu1 %v1355_v40  ;;  %v1664_v16 = vld [vmem:[%s6795_s3 + $0xe0] sm:$0xff] }
 0x4fc   :  { %1619 = vmatpush.msra.mxu1 %v1352_v39 }
 0x4fe   :  { %1620 = vmatpush.msra.mxu1 %v1349_v19 }
 0x4ff   :  { %5671 = vmatmul.msk.f32.vlgmr.msra.gmra.mxu1 %vm1461_vm9, %v1385_v4  ;;  %v1407_v4 = vld [vmem:[%s6795_s3 + $0xb0] sm:$0xff] }
 0x501   :  { %6228 = vrot.lane.b32.xlu2 %v6227_v52, %s6735_s21  ;;  %6223 = vrot.lane.b32.xlu1 %v6227_v52, %s6736_s25 }
 0x502   :  { %6218 = vrot.lane.b32.xlu0 %v6227_v52, %s6737_s29  ;;  %v1402_v52 = vld [vmem:[%s6795_s3 + $0x88] sm:$0xff] }
 0x507   :  { %5672 = vmatmul.msk.f32.gmra.mxu1 %vm1461_vm9, %v1386_v24  ;;  %v1838_v24 = vld [vmem:[%s6795_s3 + $0x198] sm:$0xff] }
 0x50f   :  { %5673 = vmatmul.msk.f32.gmra.mxu1 %vm1461_vm9, %v1387_v38  ;;  %v1842_v38 = vld [vmem:[%s6795_s3 + $0x1b8] sm:$0xff] }
 0x517   :  { %5674 = vmatmul.msk.f32.gmra.mxu1 %vm1461_vm9, %v1388_v45 }
 0x523   :  { %v6154_v53 = vpop.permute.xlu2 %6153 }
 0x524   :  { %v6155_v60 = vunpack.i.l.bf16 %v6154_v53  ;;  %v6156_v61 = vunpack.i.h.bf16 %v6154_v53  ;;  %v1389_v53 = vld [vmem:[%s6795_s3 + $0x20] sm:$0xff] }
 0x525   :  { %5675 = vmatmul.msk.f32.gmra.mxu1 %vm1461_vm9, %v1389_v53 }
 0x533   :  { %v6169_v32 = vpop.permute.xlu2 %6168 }
 0x534   :  { %v6170_v57 = vunpack.i.l.bf16 %v6169_v32  ;;  %v6171_v18 = vunpack.i.h.bf16 %v6169_v32  ;;  %v1830_v32 = vld [vmem:[%s6795_s3 + $0x158] sm:$0xff] }
 0x53b   :  { %v6149_v58 = vpop.permute.xlu1 %6148 }
 0x53c   :  { %v6144_v34 = vpop.permute.xlu0 %6143  ;;  %v6150_v17 = vunpack.i.l.bf16 %v6149_v58  ;;  %v6151_v30 = vunpack.i.h.bf16 %v6149_v58  ;;  %v1404_v58 = vld [vmem:[%s6795_s3 + $0x98] sm:$0xff] }
 0x53d   :  { %v6145_v29 = vunpack.i.l.bf16 %v6144_v34  ;;  %v6146_v33 = vunpack.i.h.bf16 %v6144_v34  ;;  %v1667_v34 = vld [vmem:[%s6795_s3 + $0xf8] sm:$0xff] }
 0x543   :  { %v6194_v54 = vpop.permute.xlu2 %6193 }
 0x544   :  { %v6195_v55 = vunpack.i.l.bf16 %v6194_v54  ;;  %v6196_v56 = vunpack.i.h.bf16 %v6194_v54  ;;  %v1665_v54 = vld [vmem:[%s6795_s3 + $0xe8] sm:$0xff] }
 0x546   :  { %1508 = vmatpush.msrb.mxu0 %v6195_v55  ;;  %v1403_v55 = vld [vmem:[%s6795_s3 + $0x90] sm:$0xff] }
 0x548   :  { %1509 = vmatpush.msrb.mxu0 %v6196_v56  ;;  %v1390_v56 = vld [vmem:[%s6795_s3 + $0x28] sm:$0xff] }
 0x549   :  { %5676 = vmatmul.msk.f32.gmra.mxu1 %vm1461_vm9, %v1390_v56 }
 0x54a   :  { %1510 = vmatpush.msrb.mxu0 %v6170_v57  ;;  %v1831_v57 = vld [vmem:[%s6795_s3 + $0x160] sm:$0xff] }
 0x54b   :  { %v6199_v59 = vpop.permute.xlu2 %6198  ;;  %v6164_v63 = vpop.permute.xlu1 %6163 }
 0x54c   :  { %1511 = vmatpush.msrb.mxu0 %v6171_v18  ;;  %v6200_v62 = vunpack.i.l.bf16 %v6199_v59  ;;  %v6201_v23 = vunpack.i.h.bf16 %v6199_v59  ;;  %v6159_v1 = vpop.permute.xlu0 %6158  ;;  %v6165_v15 = vunpack.i.l.bf16 %v6164_v63  ;;  %v6166_v22 = vunpack.i.h.bf16 %v6164_v63  ;;  %v1666_v18 = vld [vmem:[%s6795_s3 + $0xf0] sm:$0xff]  ;;  %v1668_v63 = vld [vmem:[%s6795_s3 + $0x100] sm:$0xff] }
 0x54d   :  { %v6160_v20 = vunpack.i.l.bf16 %v6159_v1  ;;  %v6161_v25 = vunpack.i.h.bf16 %v6159_v1  ;;  %v1391_v59 = vld [vmem:[%s6795_s3 + $0x30] sm:$0xff]  ;;  %v1393_v1 = vld [vmem:[%s6795_s3 + $0x40] sm:$0xff] }
 0x54e   :  { %1512 = vmatpush.msrb.mxu0 %v6155_v60  ;;  %v1832_v60 = vld [vmem:[%s6795_s3 + $0x168] sm:$0xff] }
 0x550   :  { %1513 = vmatpush.msrb.mxu0 %v6156_v61  ;;  %v1405_v61 = vld [vmem:[%s6795_s3 + $0xa0] sm:$0xff] }
 0x551   :  { %5677 = vmatmul.msk.f32.gmra.mxu1 %vm1461_vm9, %v1391_v59 }
 0x552   :  { %1514 = vmatpush.msrb.mxu0 %v6200_v62  ;;  %v1392_v62 = vld [vmem:[%s6795_s3 + $0x38] sm:$0xff] }
 0x553   :  { %v6214_v0 = vpop.permute.xlu2 %6213 }
 0x554   :  { %v6215_v2 = vunpack.i.l.bf16 %v6214_v0  ;;  %1515 = vmatpush.msrb.mxu0 %v6201_v23  ;;  %v6216_v3 = vunpack.i.h.bf16 %v6214_v0  ;;  %v1833_v23 = vld [vmem:[%s6795_s3 + $0x170] sm:$0xff]  ;;  %v1406_v0 = vld [vmem:[%s6795_s3 + $0xa8] sm:$0xff] }
 0x556   :  { %1516 = vmatpush.msrb.mxu0 %v6215_v2  ;;  %v1834_v2 = vld [vmem:[%s6795_s3 + $0x178] sm:$0xff] }
 0x558   :  { %1517 = vmatpush.msrb.mxu0 %v6216_v3  ;;  %v1669_v3 = vld [vmem:[%s6795_s3 + $0x108] sm:$0xff] }
 0x559   :  { %5678 = vmatmul.msk.f32.gmra.mxu1 %vm1461_vm9, %v1392_v62 }
 0x55b   :  { %v6229_v5 = vpop.permute.xlu2 %6228  ;;  %v6184_v6 = vpop.permute.xlu1 %6183 }
 0x55c   :  { %v6230_v7 = vunpack.i.l.bf16 %v6229_v5  ;;  %v6185_v8 = vunpack.i.l.bf16 %v6184_v6  ;;  %v6174_v9 = vpop.permute.xlu0 %6173  ;;  %v6231_v11 = vunpack.i.h.bf16 %v6229_v5  ;;  %v6186_v12 = vunpack.i.h.bf16 %v6184_v6  ;;  %v1394_v5 = vld [vmem:[%s6795_s3 + $0x48] sm:$0xff]  ;;  %v1835_v6 = vld [vmem:[%s6795_s3 + $0x180] sm:$0xff] }
 0x55d   :  { %v6175_v10 = vunpack.i.l.bf16 %v6174_v9  ;;  %v6176_v14 = vunpack.i.h.bf16 %v6174_v9  ;;  %v1395_v9 = vld [vmem:[%s6795_s3 + $0x50] sm:$0xff] }
 0x55e   :  { %1518 = vmatpush.msrb.mxu0 %v6230_v7  ;;  %1925 = vmatpush.msrb.mxu3 %v6185_v8  ;;  %v1670_v7 = vld [vmem:[%s6795_s3 + $0x110] sm:$0xff]  ;;  %v1408_v8 = vld [vmem:[%s6795_s3 + $0xb8] sm:$0xff] }
 0x55f   :  { %1760 = vmatpush.msra.mxu2 %v6175_v10  ;;  %v1836_v10 = vld [vmem:[%s6795_s3 + $0x188] sm:$0xff] }
 0x560   :  { %1519 = vmatpush.msrb.mxu0 %v6231_v11  ;;  %1926 = vmatpush.msrb.mxu3 %v6186_v12  ;;  %v1671_v11 = vld [vmem:[%s6795_s3 + $0x118] sm:$0xff]  ;;  %v1409_v12 = vld [vmem:[%s6795_s3 + $0xc0] sm:$0xff] }
 0x561   :  { %1761 = vmatpush.msra.mxu2 %v6176_v14  ;;  %5657 = vmatmul.msk.f32.vlgmr.msrb.gmra.mxu0 %vm1461_vm9, %v1399_v13  ;;  %v1396_v13 = vld [vmem:[%s6795_s3 + $0x58] sm:$0xff]  ;;  %v1837_v14 = vld [vmem:[%s6795_s3 + $0x190] sm:$0xff] }
 0x562   :  { %1927 = vmatpush.msrb.mxu3 %v6165_v15  ;;  %5679 = vmatmul.msk.f32.gmra.mxu1 %vm1461_vm9, %v1393_v1  ;;  %v1672_v15 = vld [vmem:[%s6795_s3 + $0x120] sm:$0xff] }
 0x563   :  { %1762 = vmatpush.msra.mxu2 %v6160_v20  ;;  %v6189_v26 = vpop.permute.xlu1 %6188  ;;  %v1410_v20 = vld [vmem:[%s6795_s3 + $0xc8] sm:$0xff] }
 0x564   :  { %v6179_v28 = vpop.permute.xlu0 %6178  ;;  %1928 = vmatpush.msrb.mxu3 %v6166_v22  ;;  %v6190_v35 = vunpack.i.l.bf16 %v6189_v26  ;;  %v6191_v37 = vunpack.i.h.bf16 %v6189_v26  ;;  %v1397_v22 = vld [vmem:[%s6795_s3 + $0x60] sm:$0xff]  ;;  %v1411_v26 = vld [vmem:[%s6795_s3 + $0xd0] sm:$0xff] }
 0x565   :  { %1763 = vmatpush.msra.mxu2 %v6161_v25  ;;  %v6180_v36 = vunpack.i.l.bf16 %v6179_v28  ;;  %v6181_v19 = vunpack.i.h.bf16 %v6179_v28  ;;  %v1673_v25 = vld [vmem:[%s6795_s3 + $0x128] sm:$0xff]  ;;  %v1839_v28 = vld [vmem:[%s6795_s3 + $0x1a0] sm:$0xff] }
 0x566   :  { %1929 = vmatpush.msrb.mxu3 %v6150_v17  ;;  %v1398_v17 = vld [vmem:[%s6795_s3 + $0x68] sm:$0xff] }
 0x567   :  { %1764 = vmatpush.msra.mxu2 %v6145_v29  ;;  %v1674_v29 = vld [vmem:[%s6795_s3 + $0x130] sm:$0xff] }
 0x568   :  { %1930 = vmatpush.msrb.mxu3 %v6151_v30  ;;  %v1412_v30 = vld [vmem:[%s6795_s3 + $0xd8] sm:$0xff] }
 0x569   :  { %1765 = vmatpush.msra.mxu2 %v6146_v33  ;;  %5658 = vmatmul.msk.f32.gmra.mxu0 %vm1461_vm9, %v1400_v31  ;;  %v1840_v31 = vld [vmem:[%s6795_s3 + $0x1a8] sm:$0xff]  ;;  %v1675_v33 = vld [vmem:[%s6795_s3 + $0x138] sm:$0xff] }
 0x56a   :  { %1931 = vmatpush.msrb.mxu3 %v6190_v35  ;;  %5680 = vmatmul.msk.f32.gmra.mxu1 %vm1461_vm9, %v1394_v5  ;;  %v1841_v35 = vld [vmem:[%s6795_s3 + $0x1b0] sm:$0xff] }
 0x56b   :  { %1766 = vmatpush.msra.mxu2 %v6180_v36  ;;  %v6209_v39 = vpop.permute.xlu1 %6208  ;;  %v1676_v36 = vld [vmem:[%s6795_s3 + $0x140] sm:$0xff] }
 0x56c   :  { %v6210_v40 = vunpack.i.l.bf16 %v6209_v39  ;;  %v6204_v41 = vpop.permute.xlu0 %6203  ;;  %1932 = vmatpush.msrb.mxu3 %v6191_v37  ;;  %v6211_v43 = vunpack.i.h.bf16 %v6209_v39  ;;  %v1677_v39 = vld [vmem:[%s6795_s3 + $0x148] sm:$0xff]  ;;  %s6738_s3 = smov 119  }
 0x56d   :  { %v6205_v42 = vunpack.i.l.bf16 %v6204_v41  ;;  %1767 = vmatpush.msra.mxu2 %v6181_v19  ;;  %v6206_v21 = vunpack.i.h.bf16 %v6204_v41 }
 0x56e   :  { %1933 = vmatpush.msrb.mxu3 %v6210_v40 }
 0x56f   :  { %1768 = vmatpush.msra.mxu2 %v6205_v42 }
 0x570   :  { %1934 = vmatpush.msrb.mxu3 %v6211_v43 }
 0x571   :  { %1769 = vmatpush.msra.mxu2 %v6206_v21  ;;  %5659 = vmatmul.msk.f32.gmra.mxu0 %vm1461_vm9, %v1401_v44 }
 0x572   :  { %5681 = vmatmul.msk.f32.gmra.mxu1 %vm1461_vm9, %v1395_v9  ;;  %v1997_v9 = vld [vmem:[%s6805_s14 + $0x18] sm:$0xff] }
 0x573   :  { %v6224_v46 = vpop.permute.xlu1 %6223 }
 0x574   :  { %v6225_v47 = vunpack.i.l.bf16 %v6224_v46  ;;  %v6219_v27 = vpop.permute.xlu0 %6218  ;;  %v6226_v49 = vunpack.i.h.bf16 %v6224_v46 }
 0x575   :  { %v6220_v48 = vunpack.i.l.bf16 %v6219_v27  ;;  %v6221_v51 = vunpack.i.h.bf16 %v6219_v27 }
 0x576   :  { %1935 = vmatpush.msrb.mxu3 %v6225_v47 }
 0x577   :  { %1770 = vmatpush.msra.mxu2 %v6220_v48 }
 0x578   :  { %1936 = vmatpush.msrb.mxu3 %v6226_v49 }
 0x579   :  { %1771 = vmatpush.msra.mxu2 %v6221_v51  ;;  %5699 = vmatmul.msk.f32.vlgmr.msrb.gmra.mxu3 %vm1461_vm9, %v1829_v50 }
 0x57a   :  { %5685 = vmatmul.msk.f32.vlgmr.msra.gmra.mxu2 %vm1461_vm9, %v1664_v16  ;;  %5660 = vmatmul.msk.f32.gmra.mxu0 %vm1461_vm9, %v1402_v52 }
 0x57b   :  { %5682 = vmatmul.msk.f32.gmra.mxu1 %vm1461_vm9, %v1396_v13 }
 0x57c   :  { %v1622_v37 = vpop.f32.mrf.mxu1 }
 0x581   :  { %5700 = vmatmul.msk.f32.gmra.mxu3 %vm1461_vm9, %v1830_v32 }
 0x582   :  { %5686 = vmatmul.msk.f32.gmra.mxu2 %vm1461_vm9, %v1665_v54  ;;  %5661 = vmatmul.msk.f32.gmra.mxu0 %vm1461_vm9, %v1403_v55  ;;  %v1995_v54 = vld [vmem:[%s6805_s14 + $0x8] sm:$0xff] }
 0x583   :  { %5683 = vmatmul.msk.f32.gmra.mxu1 %vm1461_vm9, %v1397_v22 }
 0x584   :  { %v1625_v40 = vpop.f32.mrf.mxu1 }
 0x589   :  { %5701 = vmatmul.msk.f32.gmra.mxu3 %vm1461_vm9, %v1831_v57 }
 0x58a   :  { %5687 = vmatmul.msk.f32.gmra.mxu2 %vm1461_vm9, %v1666_v18  ;;  %5662 = vmatmul.msk.f32.gmra.mxu0 %vm1461_vm9, %v1404_v58 }
 0x58b   :  { %5684 = vmatmul.msk.f32.gmra.mxu1 %vm1461_vm9, %v1398_v17 }
 0x58c   :  { %v1628_v42 = vpop.f32.mrf.mxu1 }
 0x591   :  { %5702 = vmatmul.msk.f32.gmra.mxu3 %vm1461_vm9, %v1832_v60  ;;  %v1996_v60 = vld [vmem:[%s6805_s14 + $0x10] sm:$0xff] }
 0x592   :  { %5688 = vmatmul.msk.f32.gmra.mxu2 %vm1461_vm9, %v1667_v34  ;;  %5663 = vmatmul.msk.f32.gmra.mxu0 %vm1461_vm9, %v1405_v61  ;;  %v1994_v61 = vld [vmem:[%s6805_s14] sm:$0xff] }
 0x594   :  { %v1631_v44 = vpop.f32.mrf.mxu1 }
 0x599   :  { %5703 = vmatmul.msk.f32.gmra.mxu3 %vm1461_vm9, %v1833_v23 }
 0x59a   :  { %5689 = vmatmul.msk.f32.gmra.mxu2 %vm1461_vm9, %v1668_v63  ;;  %5664 = vmatmul.msk.f32.gmra.mxu0 %vm1461_vm9, %v1406_v0 }
 0x5a1   :  { %5704 = vmatmul.msk.f32.gmra.mxu3 %vm1461_vm9, %v1834_v2 }
 0x5a2   :  { %5690 = vmatmul.msk.f32.gmra.mxu2 %vm1461_vm9, %v1669_v3  ;;  %5665 = vmatmul.msk.f32.gmra.mxu0 %vm1461_vm9, %v1407_v4  ;;  %v1634_v48 = vpop.f32.mrf.mxu1 }
 0x5a9   :  { %5705 = vmatmul.msk.f32.gmra.mxu3 %vm1461_vm9, %v1835_v6 }
 0x5aa   :  { %5691 = vmatmul.msk.f32.gmra.mxu2 %vm1461_vm9, %v1670_v7  ;;  %5666 = vmatmul.msk.f32.gmra.mxu0 %vm1461_vm9, %v1408_v8 }
 0x5b1   :  { %5706 = vmatmul.msk.f32.gmra.mxu3 %vm1461_vm9, %v1836_v10 }
 0x5b2   :  { %5692 = vmatmul.msk.f32.gmra.mxu2 %vm1461_vm9, %v1671_v11  ;;  %5667 = vmatmul.msk.f32.gmra.mxu0 %vm1461_vm9, %v1409_v12 }
 0x5b9   :  { %5707 = vmatmul.msk.f32.gmra.mxu3 %vm1461_vm9, %v1837_v14 }
 0x5ba   :  { %5693 = vmatmul.msk.f32.gmra.mxu2 %vm1461_vm9, %v1672_v15  ;;  %5668 = vmatmul.msk.f32.gmra.mxu0 %vm1461_vm9, %v1410_v20 }
 0x5c1   :  { %5708 = vmatmul.msk.f32.gmra.mxu3 %vm1461_vm9, %v1838_v24 }
 0x5c2   :  { %5694 = vmatmul.msk.f32.gmra.mxu2 %vm1461_vm9, %v1673_v25  ;;  %5669 = vmatmul.msk.f32.gmra.mxu0 %vm1461_vm9, %v1411_v26 }
 0x5c6   :  { %v1637_v58 = vpop.f32.mrf.mxu1 }
 0x5c9   :  { %5709 = vmatmul.msk.f32.gmra.mxu3 %vm1461_vm9, %v1839_v28  ;;  %v1998_v28 = vld [vmem:[%s6805_s14 + $0x20] sm:$0xff] }
 0x5ca   :  { %5695 = vmatmul.msk.f32.gmra.mxu2 %vm1461_vm9, %v1674_v29  ;;  %5670 = vmatmul.msk.f32.gmra.mxu0 %vm1461_vm9, %v1412_v30 }
 0x5ce   :  { %v1640_v12 = vpop.f32.mrf.mxu1 }
 0x5d1   :  { %5710 = vmatmul.msk.f32.gmra.mxu3 %vm1461_vm9, %v1840_v31 }
 0x5d2   :  { %5696 = vmatmul.msk.f32.gmra.mxu2 %vm1461_vm9, %v1675_v33 }
 0x5d9   :  { %5711 = vmatmul.msk.f32.gmra.mxu3 %vm1461_vm9, %v1841_v35 }
 0x5da   :  { %5697 = vmatmul.msk.f32.gmra.mxu2 %vm1461_vm9, %v1676_v36  ;;  %v1643_v36 = vpop.f32.mrf.mxu1 }
 0x5de   :  { %v1521_v19 = vpop.f32.mrf.mxu0 }
 0x5df   :  { %v1623_v16 = vadd.f32 %v1622_v37, %v1521_v19 }
 0x5e1   :  { %5712 = vmatmul.msk.f32.gmra.mxu3 %vm1461_vm9, %v1842_v38 }
 0x5e2   :  { %5698 = vmatmul.msk.f32.gmra.mxu2 %vm1461_vm9, %v1677_v39 }
 0x5e6   :  { %v1524_v41 = vpop.f32.mrf.mxu0 }
 0x5e7   :  { %v1626_v47 = vadd.f32 %v1625_v40, %v1524_v41 }
 0x5ee   :  { %v1527_v43 = vpop.f32.mrf.mxu0 }
 0x5ef   :  { %v1629_v53 = vadd.f32 %v1628_v42, %v1527_v43  ;;  %v1999_v43 = vld [vmem:[%s6805_s14 + $0x28] sm:$0xff] }
 0x5f7   :  { %v1530_v21 = vpop.f32.mrf.mxu0 }
 0x5f8   :  { %v1632_v0 = vadd.f32 %v1631_v44, %v1530_v21 }
 0x5fc   :  { %v1938_v45 = vpop.f32.mrf.mxu3 }
 0x5fd   :  { %v1773_v46 = vpop.f32.mrf.mxu2 }
 0x5fe   :  { %v1815_v32 = vadd.f32 %v1773_v46, %v1623_v16 }
 0x5ff   :  { %v1533_v50 = vpop.f32.mrf.mxu0 }
 0x600   :  { %v1980_v59 = vadd.f32 %v1938_v45, %v1815_v32  ;;  %v1635_v20 = vadd.f32 %v1634_v48, %v1533_v50 }
 0x602   :  { %v7375_v1 = vadd.f32 %v1994_v61, %v1980_v59 }
 0x604   :  { %v1941_v27 = vpop.f32.mrf.mxu3  ;;  %v2022_v8 = vmax.f32 %v7375_v1, 0.0 }
 0x605   :  { %v1776_v49 = vpop.f32.mrf.mxu2 }
 0x606   :  { %v1816_v51 = vadd.f32 %v1776_v49, %v1626_v47  ;;  %v1646_v49 = vpop.f32.mrf.mxu1 }
 0x607   :  { %v1536_v34 = vpop.f32.mrf.mxu0 }
 0x608   :  { %v1981_v52 = vadd.f32 %v1941_v27, %v1816_v51  ;;  %v1638_v35 = vadd.f32 %v1637_v58, %v1536_v34 }
 0x60a   :  { %v2009_v57 = vadd.f32 %v1995_v54, %v1981_v52 }
 0x60c   :  { %v1944_v55 = vpop.f32.mrf.mxu3  ;;  %v7373_v23 = vmax.f32 %v2009_v57, 0.0 }
 0x60d   :  { %v1779_v56 = vpop.f32.mrf.mxu2 }
 0x60e   :  { %v1817_v18 = vadd.f32 %v1779_v56, %v1629_v53  ;;  %v2039_v5 = vrot.slane %v7373_v23, 6  ;;  %v2000_v53 = vld [vmem:[%s6805_s14 + $0x30] sm:$0xff] }
 0x60f   :  { %v1539_v14 = vpop.f32.mrf.mxu0 }
 0x610   :  { %v1982_v62 = vadd.f32 %v1944_v55, %v1817_v18  ;;  %v1641_v47 = vadd.f32 %v1640_v12, %v1539_v14 }
 0x612   :  { %v2010_v63 = vadd.f32 %v1996_v60, %v1982_v62  ;;  %v1649_v62 = vpop.f32.mrf.mxu1 }
 0x614   :  { %v2024_v2 = vmax.f32 %v2010_v63, 0.0  ;;  %v1947_v3 = vpop.f32.mrf.mxu3  ;;  %v2001_v63 = vld [vmem:[%s6805_s14 + $0x38] sm:$0xff] }
 0x615   :  { %v1782_v4 = vpop.f32.mrf.mxu2 }
 0x616   :  { %v2040_v6 = vrot.slane %v2024_v2, 6  ;;  %v1818_v7 = vadd.f32 %v1782_v4, %v1632_v0 }
 0x617   :  { %v1542_v37 = vpop.f32.mrf.mxu0 }
 0x618   :  { %v7381_v10 = vsel %vm671_vm4, %v2039_v5, %v2040_v6  ;;  %v1983_v11 = vadd.f32 %v1947_v3, %v1818_v7  ;;  %v1644_v57 = vadd.f32 %v1643_v36, %v1542_v37  ;;  %v2003_v36 = vld [vmem:[%s6805_s14 + $0x48] sm:$0xff] }
 0x619   :  { %v2048_v13 = vmax.f32 %v2022_v8, %v7381_v10 }
 0x61a   :  { %v2011_v15 = vadd.f32 %v1997_v9, %v1983_v11 }
 0x61c   :  { %v2025_v22 = vmax.f32 %v2011_v15, 0.0  ;;  %v1950_v24 = vpop.f32.mrf.mxu3  ;;  %v2002_v15 = vld [vmem:[%s6805_s14 + $0x40] sm:$0xff] }
 0x61d   :  { %v1785_v25 = vpop.f32.mrf.mxu2 }
 0x61e   :  { %v2042_v26 = vrot.slane %v2025_v22, 6  ;;  %v1819_v17 = vadd.f32 %v1785_v25, %v1635_v20  ;;  %v2053_v40 = vrot.slane %v2025_v22, 4  ;;  %v1652_v22 = vpop.f32.mrf.mxu1  ;;  %v7418_v25 = vld [vmem:[%s6820_s30 + $0x8] sm:$0xf] }
 0x61f   :  { %v1545_v51 = vpop.f32.mrf.mxu0  ;;  %5713 = vmatpush.msk.msra.mxu0 %vm2052_vm10, %v7418_v25 }
 0x620   :  { %v7388_v29 = vsel %vm671_vm4, %v2040_v6, %v2042_v26  ;;  %v1984_v30 = vadd.f32 %v1950_v24, %v1819_v17  ;;  %v1647_v7 = vadd.f32 %v1646_v49, %v1545_v51 }
 0x621   :  { %v2049_v31 = vmax.f32 %v7373_v23, %v7388_v29 }
 0x622   :  { %v2012_v33 = vadd.f32 %v1998_v28, %v1984_v30 }
 0x624   :  { %v2026_v38 = vmax.f32 %v2012_v33, 0.0  ;;  %v1953_v19 = vpop.f32.mrf.mxu3 }
 0x625   :  { %v1788_v39 = vpop.f32.mrf.mxu2 }
 0x626   :  { %v2054_v41 = vrot.slane %v2026_v38, 4  ;;  %v1820_v42 = vadd.f32 %v1788_v39, %v1638_v35  ;;  %v1655_v39 = vpop.f32.mrf.mxu1 }
 0x627   :  { %v1548_v0 = vpop.f32.mrf.mxu0 }
 0x628   :  { %v7394_v44 = vsel %vm2052_vm10, %v2053_v40, %v2054_v41  ;;  %v1985_v21 = vadd.f32 %v1953_v19, %v1820_v42  ;;  %v1650_v17 = vadd.f32 %v1649_v62, %v1548_v0 }
 0x629   :  { %v2062_v45 = vmax.f32 %v2048_v13, %v7394_v44 }
 0x62a   :  { %v2013_v46 = vadd.f32 %v1999_v43, %v1985_v21 }
 0x62c   :  { %v2027_v27 = vmax.f32 %v2013_v46, 0.0  ;;  %v1956_v48 = vpop.f32.mrf.mxu3 }
 0x62d   :  { %v1791_v50 = vpop.f32.mrf.mxu2 }
 0x62e   :  { %v2056_v16 = vrot.slane %v2027_v27, 4  ;;  %v1821_v52 = vadd.f32 %v1791_v50, %v1641_v47  ;;  %v2066_v60 = vrot.slane %v2027_v27, 2  ;;  %v2004_v47 = vld [vmem:[%s6805_s14 + $0x50] sm:$0xff] }
 0x62f   :  { %v1551_v24 = vpop.f32.mrf.mxu0 }
 0x630   :  { %v7399_v32 = vsel %vm2052_vm10, %v2054_v41, %v2056_v16  ;;  %v1986_v54 = vadd.f32 %v1956_v48, %v1821_v52  ;;  %v1653_v19 = vadd.f32 %v1652_v22, %v1551_v24  ;;  %v7430_v16 = vld [vmem:[%s6820_s30] sm:$0xff]  ;;  %s6742_s30 = smov 83  }
 0x631   :  { %v2063_v55 = vmax.f32 %v2049_v31, %v7399_v32  ;;  %2145 = vmatpush.msra.mxu0 %v7430_v16 }
 0x632   :  { %v2014_v56 = vadd.f32 %v2000_v53, %v1986_v54  ;;  %v1658_v54 = vpop.f32.mrf.mxu1 }
 0x634   :  { %v2028_v18 = vmax.f32 %v2014_v56, 0.0  ;;  %v1959_v58 = vpop.f32.mrf.mxu3 }
 0x635   :  { %v1794_v59 = vpop.f32.mrf.mxu2 }
 0x636   :  { %v7402_v34 = vrot.slane %v2028_v18, 2  ;;  %v1822_v61 = vadd.f32 %v1794_v59, %v1644_v57 }
 0x637   :  { %v1554_v40 = vpop.f32.mrf.mxu0 }
 0x638   :  { %v2074_v2 = vmax.f32 %v2063_v55, %v7402_v34  ;;  %v1987_v3 = vadd.f32 %v1959_v58, %v1822_v61  ;;  %v7408_v4 = vsel %vm2065_vm11, %v2066_v60, %v7402_v34  ;;  %v1656_v51 = vadd.f32 %v1655_v39, %v1554_v40  ;;  %v2005_v58 = vld [vmem:[%s6805_s14 + $0x58] sm:$0xff] }
 0x639   :  { %v2073_v5 = vmax.f32 %v2062_v45, %v7408_v4 }
 0x63a   :  { %v7411_v6 = vadd.f32 %v2001_v63, %v1987_v3 }
 0x63c   :  { %v2029_v9 = vmax.f32 %v7411_v6, 0.0  ;;  %v1962_v11 = vpop.f32.mrf.mxu3 }
 0x63d   :  { %v1797_v12 = vpop.f32.mrf.mxu2 }
 0x63e   :  { %v2077_v13 = vmax.f32 %v2073_v5, %v2029_v9  ;;  %v1823_v14 = vadd.f32 %v1797_v12, %v1647_v7  ;;  %v2006_v12 = vld [vmem:[%s6805_s14 + $0x60] sm:$0xff] }
 0x63f   :  { %v1557_v56 = vpop.f32.mrf.mxu0 }
 0x640   :  { %v1988_v20 = vadd.f32 %v1962_v11, %v1823_v14  ;;  %v1659_v63 = vadd.f32 %v1658_v54, %v1557_v56  ;;  %v1661_v14 = vpop.f32.mrf.mxu1  ;;  %v2155_v54 = vld [vmem:[%s6810_s19 + $0xe] sm:$0xff]  ;;  %v2156_v56 = vld [vmem:[%s6810_s19 + $0x16] sm:$0x3f] }
 0x642   :  { %v2016_v26 = vadd.f32 %v2002_v15, %v1988_v20 }
 0x644   :  { %v7422_v28 = vmax.f32 %v2016_v26, 0.0  ;;  %v1965_v30 = vpop.f32.mrf.mxu3 }
 0x645   :  { %v1800_v31 = vpop.f32.mrf.mxu2 }
 0x646   :  { %v2078_v33 = vmax.f32 %v2074_v2, %v7422_v28  ;;  %v1824_v35 = vadd.f32 %v1800_v31, %v1650_v17  ;;  %v2082_v21 = vrot.slane %v7422_v28, 6 }
 0x648   :  { %v1989_v37 = vadd.f32 %v1965_v30, %v1824_v35  ;;  %v2046_v30 = vadd.f32 %v7381_v10, %v2022_v8 }
 0x64a   :  { %v2017_v38 = vadd.f32 %v2003_v36, %v1989_v37  ;;  %v2060_v37 = vadd.f32 %v7394_v44, %v2046_v30 }
 0x64c   :  { %v2031_v41 = vmax.f32 %v2017_v38, 0.0  ;;  %v1968_v42 = vpop.f32.mrf.mxu3  ;;  %v2007_v38 = vld [vmem:[%s6805_s14 + $0x68] sm:$0xff]  ;;  %v2071_v40 = vadd.f32 %v7408_v4, %v2060_v37  ;;  %s6740_s14 = smov 101  }
 0x64d   :  { %v1803_v43 = vpop.f32.mrf.mxu2 }
 0x64e   :  { %v2083_v45 = vrot.slane %v2031_v41, 6  ;;  %v1825_v46 = vadd.f32 %v1803_v43, %v1653_v19  ;;  %v2047_v43 = vadd.f32 %v7388_v29, %v7373_v23  ;;  %v2075_v1 = vadd.f32 %v2071_v40, %v2029_v9 }
 0x650   :  { %v2084_v27 = vsel %vm671_vm4, %v2082_v21, %v2083_v45  ;;  %v1990_v48 = vadd.f32 %v1968_v42, %v1825_v46  ;;  %v2061_v10 = vadd.f32 %v7399_v32, %v2047_v43 }
 0x651   :  { %v2091_v49 = vmax.f32 %v2077_v13, %v2084_v27  ;;  %v1560_v13 = vpop.f32.mrf.mxu0  ;;  %v2089_v21 = vadd.f32 %v2084_v27, %v2075_v1 }
 0x652   :  { %v2018_v50 = vadd.f32 %v2004_v47, %v1990_v48  ;;  %v1662_v26 = vadd.f32 %v1661_v14, %v1560_v13  ;;  %v2072_v46 = vadd.f32 %v7402_v34, %v2061_v10  ;;  %v2370_v13 = vld [vmem:[%s6815_s24 + $0x24] sm:$0x3f] }
 0x654   :  { %v2032_v52 = vmax.f32 %v2018_v50, 0.0  ;;  %v1971_v53 = vpop.f32.mrf.mxu3 }
 0x655   :  { %v1806_v55 = vpop.f32.mrf.mxu2 }
 0x656   :  { %v2085_v57 = vrot.slane %v2032_v52, 6  ;;  %v1826_v18 = vadd.f32 %v1806_v55, %v1656_v51  ;;  %v2095_v5 = vrot.slane %v2032_v52, 4  ;;  %v2154_v52 = vld [vmem:[%s6810_s19 + $0x8] sm:$0x3f] }
 0x658   :  { %v2086_v59 = vsel %vm671_vm4, %v2083_v45, %v2085_v57  ;;  %v1991_v60 = vadd.f32 %v1971_v53, %v1826_v18  ;;  %v2227_v18 = vld [vmem:[%s6810_s19 + $0x1c] sm:$0xff] }
 0x659   :  { %v2092_v61 = vmax.f32 %v2078_v33, %v2086_v59 }
 0x65a   :  { %v2019_v62 = vadd.f32 %v2005_v58, %v1991_v60 }
 0x65c   :  { %v2033_v0 = vmax.f32 %v2019_v62, 0.0  ;;  %v1974_v2 = vpop.f32.mrf.mxu3  ;;  %v2296_v62 = vld [vmem:[%s6815_s24] sm:$0xff] }
 0x65d   :  { %v1809_v3 = vpop.f32.mrf.mxu2 }
 0x65e   :  { %v2096_v7 = vrot.slane %v2033_v0, 4  ;;  %v1827_v11 = vadd.f32 %v1809_v3, %v1659_v63  ;;  %v2297_v63 = vld [vmem:[%s6815_s24 + $0x8] sm:$0x3f] }
 0x660   :  { %v2097_v15 = vsel %vm2052_vm10, %v2095_v5, %v2096_v7  ;;  %v1992_v20 = vadd.f32 %v1974_v2, %v1827_v11  ;;  %v2298_v2 = vld [vmem:[%s6815_s24 + $0xe] sm:$0xff]  ;;  %v2299_v11 = vld [vmem:[%s6815_s24 + $0x16] sm:$0x3f] }
 0x661   :  { %v2104_v22 = vmax.f32 %v2091_v49, %v2097_v15  ;;  %v2102_v47 = vadd.f32 %v2097_v15, %v2089_v21  ;;  %v2076_v49 = vadd.f32 %v2072_v46, %v7422_v28  ;;  %v2153_v28 = vld [vmem:[%s6810_s19] sm:$0xff] }
 0x662   :  { %v2020_v24 = vadd.f32 %v2006_v12, %v1992_v20  ;;  %v2369_v12 = vld [vmem:[%s6815_s24 + $0x1c] sm:$0xff]  ;;  %s6741_s24 = smov 74  }
 0x663   :  { %v2090_v29 = vadd.f32 %v2086_v59, %v2076_v49  ;;  %v2228_v59 = vld [vmem:[%s6810_s19 + $0x24] sm:$0x3f]  ;;  %s8431_s19 = sld [smem:[#allocation9_spill]] }
 0x664   :  { %v2034_v17 = vmax.f32 %v2020_v24, 0.0  ;;  %v1977_v33 = vpop.f32.mrf.mxu3 }
 0x665   :  { %v1812_v31 = vpop.f32.mrf.mxu2 }
 0x666   :  { %v2098_v35 = vrot.slane %v2034_v17, 4  ;;  %v1828_v36 = vadd.f32 %v1812_v31, %v1662_v26  ;;  %v2107_v45 = vrot.slane %v2034_v17, 2  ;;  %v2424_v17 = vld [vmem:[%s6830_s12 + $0x8] sm:$0xf]  ;;  %v2423_v31 = vld [vmem:[%s6830_s12] sm:$0xff]  ;;  %s8432_s12 = sld [smem:[#allocation14_spill]] }
 0x667   :  { %5737 = vmatpush.msk.msrb.mxu2 %vm2052_vm10, %v2424_v17 }
 0x668   :  { %v2099_v19 = vsel %vm2052_vm10, %v2096_v7, %v2098_v35  ;;  %v1993_v39 = vadd.f32 %v1977_v33, %v1828_v36 }
 0x669   :  { %v2105_v41 = vmax.f32 %v2092_v61, %v2099_v19  ;;  %v2103_v32 = vadd.f32 %v2099_v19, %v2090_v29  ;;  %2449 = vmatpush.msrb.mxu2 %v2423_v31 }
 0x66a   :  { %v2021_v42 = vadd.f32 %v2007_v38, %v1993_v39 }
 0x66c   :  { %v2035_v8 = vmax.f32 %v2021_v42, 0.0 }
 0x66e   :  { %v2108_v44 = vrot.slane %v2035_v8, 2 }
 0x670   :  { %v2109_v48 = vsel %vm2065_vm11, %v2107_v45, %v2108_v44  ;;  %v2115_v4 = vmax.f32 %v2105_v41, %v2108_v44  ;;  %v2113_v9 = vadd.f32 %v2108_v44, %v2103_v32 }
 0x671   :  { %v2112_v50 = vadd.f32 %v2109_v48, %v2102_v47  ;;  %v2114_v23 = vmax.f32 %v2104_v22, %v2109_v48 }
 0x672   :  { %v2117_v27 = vmul.f32 0.125, %v2113_v9 }
 0x673   :  { %v2116_v6 = vmul.f32 0.125, %v2112_v50 }
 0x675   :  { %5714 = vmatmul.msk.f32.vlgmr.msra.gmra.mxu0 %vm2120_vm12, %v2116_v6 }
 0x67d   :  { %5715 = vmatmul.msk.f32.gmra.mxu0 %vm2120_vm12, %v2117_v27  ;;  %v2457_v27 = vld [vmem:[%s8431_s19] sm:$0x3] }
 0x6f2   :  { %v2147_v34 = vpop.f32.mrf.mxu0 }
 0x6f3   :  { %2159 = vrot.lane.b32.xlu1 %v2147_v34, %s6735_s21 }
 0x6fa   :  { %v2150_v51 = vpop.f32.mrf.mxu0 }
 0x6fb   :  { %2231 = vrot.lane.b32.xlu2 %v2150_v51, %s6737_s29  ;;  %2161 = vrot.lane.b32.xlu0 %v2150_v51, %s6735_s21 }
 0x6fc   :  { %5719 = vmatpush.msk.msrb.mxu0 %vm2065_vm11, %v2150_v51 }
 0x6fe   :  { %2219 = vmatpush.msrb.mxu0 %v2147_v34 }
 0x6ff   :  { %5720 = vmatmul.msk.f32.vlgmr.msrb.gmra.mxu0 %vm2164_vm13, %v2153_v28 }
 0x700   :  { %5725 = vmatpush.msk.msra.mxu0 %vm2052_vm10, %v7418_v25 }
 0x702   :  { %2288 = vmatpush.msra.mxu0 %v7430_v16 }
 0x703   :  { %2229 = vrot.lane.b32.xlu0 %v2147_v34, %s6737_s29 }
 0x707   :  { %5721 = vmatmul.msk.f32.gmra.mxu0 %vm2164_vm13, %v2154_v52  ;;  %v2516_v52 = vld [vmem:[%s8431_s19 + $0x4] sm:$0x3] }
 0x70f   :  { %5726 = vmatmul.msk.f32.vlgmr.msra.gmra.mxu0 %vm2120_vm12, %v2114_v23 }
 0x717   :  { %5727 = vmatmul.msk.f32.gmra.mxu0 %vm2120_vm12, %v2115_v4 }
 0x755   :  { %v2232_v25 = vpop.permute.xlu2 %2231 }
 0x765   :  { %v2160_v55 = vpop.permute.xlu1 %2159 }
 0x76d   :  { %v2162_v53 = vpop.permute.xlu0 %2161 }
 0x76e   :  { %5716 = vmatpush.msk.msrb.mxu1 %vm2065_vm11, %v2162_v53 }
 0x770   :  { %2188 = vmatpush.msrb.mxu1 %v2160_v55 }
 0x771   :  { %5717 = vmatmul.msk.f32.vlgmr.msrb.gmra.mxu1 %vm2164_vm13, %v2155_v54  ;;  %v2548_v54 = vld [vmem:[%s8431_s19 + $0x6] sm:$0x3] }
 0x772   :  { %5722 = vmatpush.msk.msra.mxu1 %vm2065_vm11, %v2232_v25 }
 0x775   :  { %v2230_v16 = vpop.permute.xlu0 %2229 }
 0x776   :  { %2257 = vmatpush.msra.mxu1 %v2230_v16  ;;  %v2458_v16 = vld [vmem:[%s8431_s19 + $0x2] sm:$0x3] }
 0x779   :  { %5718 = vmatmul.msk.f32.gmra.mxu1 %vm2164_vm13, %v2156_v56  ;;  %v2644_v56 = vld [vmem:[%s8431_s19 + $0xc] sm:$0x3] }
 0x77c   :  { %v2221_v57 = vpop.f32.mrf.mxu0 }
 0x781   :  { %5723 = vmatmul.msk.f32.vlgmr.msra.gmra.mxu1 %vm2164_vm13, %v2227_v18 }
 0x784   :  { %v2224_v58 = vpop.f32.mrf.mxu0 }
 0x789   :  { %5724 = vmatmul.msk.f32.gmra.mxu1 %vm2164_vm13, %v2228_v59 }
 0x78c   :  { %v2290_v60 = vpop.f32.mrf.mxu0 }
 0x78d   :  { %2302 = vrot.lane.b32.xlu2 %v2290_v60, %s6735_s21 }
 0x794   :  { %v2293_v61 = vpop.f32.mrf.mxu0 }
 0x795   :  { %2373 = vrot.lane.b32.xlu0 %v2293_v61, %s6737_s29  ;;  %2304 = vrot.lane.b32.xlu1 %v2293_v61, %s6735_s21 }
 0x796   :  { %5731 = vmatpush.msk.msrb.mxu0 %vm2065_vm11, %v2293_v61  ;;  %v2612_v61 = vld [vmem:[%s8431_s19 + $0xa] sm:$0x3] }
 0x798   :  { %2361 = vmatpush.msrb.mxu0 %v2290_v60 }
 0x799   :  { %5732 = vmatmul.msk.f32.vlgmr.msrb.gmra.mxu0 %vm2164_vm13, %v2296_v62 }
 0x79d   :  { %2371 = vrot.lane.b32.xlu1 %v2290_v60, %s6737_s29 }
 0x7a1   :  { %5733 = vmatmul.msk.f32.gmra.mxu0 %vm2164_vm13, %v2297_v63  ;;  %v2732_v63 = vld [vmem:[%s8432_s12 + $0x8] sm:$0x1] }
 0x7e7   :  { %v2303_v3 = vpop.permute.xlu2 %2302 }
 0x7ee   :  { %v2190_v14 = vpop.f32.mrf.mxu1 }
 0x7ef   :  { %v2222_v33 = vadd.f32 %v2221_v57, %v2190_v14 }
 0x7f6   :  { %v2193_v15 = vpop.f32.mrf.mxu1 }
 0x7f7   :  { %v2225_v41 = vadd.f32 %v2224_v58, %v2193_v15  ;;  %v2580_v58 = vld [vmem:[%s8431_s19 + $0x8] sm:$0x3]  ;;  %s5478_s19 = sshll.u32 %s6925_s4, 4  ;;  %s5479_s19 = int_to_ptr.hbm [resolvable:$true] %s5478_s19 }
 0x7fe   :  { %v2259_v20 = vpop.f32.mrf.mxu1 }
 0x7ff   :  { %v2265_v37 = vadd.f32 %v2259_v20, %v2222_v33 }
 0x806   :  { %v2262_v22 = vpop.f32.mrf.mxu1 }
 0x807   :  { %v2305_v0 = vpop.permute.xlu1 %2304  ;;  %v2374_v5 = vpop.permute.xlu0 %2373  ;;  %v2266_v8 = vadd.f32 %v2262_v22, %v2225_v41 }
 0x808   :  { %5728 = vmatpush.msk.msrb.mxu1 %vm2065_vm11, %v2305_v0  ;;  %v2685_v0 = vld [vmem:[%s8433_s15 + $0x8] sm:$0x1] }
 0x80a   :  { %2330 = vmatpush.msrb.mxu1 %v2303_v3  ;;  %v2684_v3 = vld [vmem:[%s8433_s15] sm:$0xff]  ;;  %s6632_s15 = sshra.s32 %s5479_s19, 4  ;;  %s6633_s15 = int_to_ptr.hbm [resolvable:$true] %s6632_s15 }
 0x80b   :  { %5729 = vmatmul.msk.f32.vlgmr.msrb.gmra.mxu1 %vm2164_vm13, %v2298_v2  ;;  %v2731_v2 = vld [vmem:[%s8432_s12] sm:$0xff]  ;;  %s5489_s12 = sshll.u32 %s6930_s6, 4  ;;  %p6637_p1 = scmp.lt.s32.totalorder %s6633_s15, %s6925_s4  ;;  %s5490_s12 = int_to_ptr.hbm [resolvable:$true] %s5489_s12 }
 0x80c   :  { %5734 = vmatpush.msk.msra.mxu1 %vm2065_vm11, %v2374_v5 }
 0x80f   :  { %v2372_v7 = vpop.permute.xlu1 %2371 }
 0x810   :  { %2399 = vmatpush.msra.mxu1 %v2372_v7 }
 0x813   :  { %5730 = vmatmul.msk.f32.gmra.mxu1 %vm2164_vm13, %v2299_v11 }
 0x816   :  { %v2363_v30 = vpop.f32.mrf.mxu0 }
 0x81b   :  { %5735 = vmatmul.msk.f32.vlgmr.msra.gmra.mxu1 %vm2164_vm13, %v2369_v12 }
 0x81e   :  { %v2366_v39 = vpop.f32.mrf.mxu0 }
 0x823   :  { %5736 = vmatmul.msk.f32.gmra.mxu1 %vm2164_vm13, %v2370_v13 }
 0x888   :  { %v2332_v24 = vpop.f32.mrf.mxu1 }
 0x889   :  { %v2364_v35 = vadd.f32 %v2363_v30, %v2332_v24  ;;  %v2676_v30 = vld [vmem:[%s8434_s16] sm:$0x3]  ;;  %s6636_s16 = scalar_lea.hbm %s6925_s4, 8 }
 0x890   :  { %v2335_v26 = vpop.f32.mrf.mxu1 }
 0x891   :  { %v2367_v42 = vadd.f32 %v2366_v39, %v2335_v26  ;;  %v2757_v39 = vld [vmem:[%s8435_s18 + $0x8] sm:$0x3f] }
 0x898   :  { %v2401_v36 = vpop.f32.mrf.mxu1 }
 0x899   :  { %v2407_v38 = vadd.f32 %v2401_v36, %v2364_v35 }
 0x89b   :  { %v2409_v19 = vadd.f32 %v2407_v38, %v2265_v37 }
 0x89d   :  { %v2411_v40 = vsub.f32 0.0, %v2409_v19 }
 0x89f   :  { %v2413_v43 = vmul.f32 1.442695, %v2411_v40  ;;  %v2826_v40 = vld [vmem:[%s8435_s18 + $0x1c] sm:$0xff] }
 0x8a0   :  { %v2404_v1 = vpop.f32.mrf.mxu1 }
 0x8a1   :  { %6608 = vpow2.f32 %v2413_v43  ;;  %v2408_v10 = vadd.f32 %v2404_v1, %v2367_v42  ;;  %v2827_v42 = vld [vmem:[%s8435_s18 + $0x24] sm:$0x3f]  ;;  %v2863_v43 = vld [vmem:[%s8435_s18 + $0x2a] sm:$0xff] }
 0x8a3   :  { %v2410_v21 = vadd.f32 %v2408_v10, %v2266_v8  ;;  %v2864_v8 = vld [vmem:[%s8435_s18 + $0x32] sm:$0x3f] }
 0x8a4   :  { %v2758_v10 = vld [vmem:[%s8435_s18 + $0xe] sm:$0xff] }
 0x8a5   :  { %v2412_v45 = vsub.f32 0.0, %v2410_v21 }
 0x8a7   :  { %v6609_v44 = vpop.eup %6608  ;;  %v2415_v46 = vmul.f32 1.442695, %v2412_v45 }
 0x8a8   :  { %v2417_v47 = vadd.f32 1.0, %v6609_v44 }
 0x8a9   :  { %6610 = vpow2.f32 %v2415_v46  ;;  %v2759_v46 = vld [vmem:[%s8435_s18 + $0x16] sm:$0x3f] }
 0x8aa   :  { %6612 = vrcp.f32 %v2417_v47  ;;  %v2974_v47 = vld [vmem:[%s8435_s18 + $0x54] sm:$0xff] }
 0x8af   :  { %v6611_v48 = vpop.eup %6610 }
 0x8b0   :  { %v6613_v4 = vpop.eup %6612  ;;  %v2418_v49 = vadd.f32 1.0, %v6611_v48 }
 0x8b1   :  { %v2421_v50 = vmul.f32 %v6613_v4, %v2409_v19  ;;  %v2756_v19 = vld [vmem:[%s8435_s18] sm:$0xff] }
 0x8b2   :  { %6614 = vrcp.f32 %v2418_v49  ;;  %v2938_v49 = vld [vmem:[%s8435_s18 + $0x4e] sm:$0x3f] }
 0x8b3   :  { %5738 = vmatmul.msk.f32.vlgmr.msrb.gmra.mxu2 %vm2120_vm12, %v2421_v50  ;;  %v2900_v50 = vld [vmem:[%s8435_s18 + $0x38] sm:$0xff] }
 0x8b8   :  { %v6615_v23 = vpop.eup %6614 }
 0x8b9   :  { %v2422_v29 = vmul.f32 %v6615_v23, %v2410_v21  ;;  %v2937_v21 = vld [vmem:[%s8435_s18 + $0x46] sm:$0xff]  ;;  %v2975_v23 = vld [vmem:[%s8435_s18 + $0x5c] sm:$0x3f] }
 0x8bb   :  { %5739 = vmatmul.msk.f32.gmra.mxu2 %vm2120_vm12, %v2422_v29  ;;  %v2901_v29 = vld [vmem:[%s8435_s18 + $0x40] sm:$0x3f] }
 0x936   :  { %v2451_v6 = vpop.f32.mrf.mxu2 }
 0x937   :  { %2461 = vrot.lane.b32.xlu0 %v2451_v6, %s6738_s3  ;;  %2517 = vrot.lane.b32.xlu1 %v2451_v6, %s6739_s8 }
 0x93e   :  { %v2454_v32 = vpop.f32.mrf.mxu2 }
 0x93f   :  { %2549 = vrot.lane.b32.xlu1 %v2451_v6, %s6740_s14  ;;  %2463 = vrot.lane.b32.xlu0 %v2454_v32, %s6738_s3  ;;  %s8447_s3 = sld [smem:[#allocation12_spill]] }
 0x940   :  { %2519 = vrot.lane.b32.xlu2 %v2454_v32, %s6739_s8  ;;  %5742 = vmatpush.msk.msrb.mxu1 %vm2065_vm11, %v2454_v32  ;;  %s6749_s8 = smov [#allocation4]  }
 0x942   :  { %2511 = vmatpush.msrb.mxu1 %v2451_v6 }
 0x943   :  { %5743 = vmatmul.msk.f32.vlgmr.msrb.gmra.mxu1 %vm2164_vm13, %v2457_v27 }
 0x947   :  { %2645 = vrot.lane.b32.xlu1 %v2451_v6, %s6741_s24  ;;  %2583 = vrot.lane.b32.xlu0 %v2454_v32, %s6736_s25 }
 0x948   :  { %2551 = vrot.lane.b32.xlu2 %v2454_v32, %s6740_s14  ;;  %s5476_s14 = sshll.u32 %s6749_s8, 4  ;;  %s5477_s14 = int_to_ptr.vmem [resolvable:$true] %s5476_s14 }
 0x94f   :  { %2613 = vrot.lane.b32.xlu1 %v2451_v6, %s6742_s30  ;;  %2615 = vrot.lane.b32.xlu0 %v2454_v32, %s6742_s30 }
 0x950   :  { %2647 = vrot.lane.b32.xlu2 %v2454_v32, %s6741_s24  ;;  %v3018_v32 = vld [vmem:[%s8436_s28 + $0x8] sm:$0xf]  ;;  %s6750_s24 = smov [#allocation6]  }
 0x951   :  { %s8385_s30 = sshll.u32 %s6750_s24, 4  ;;  %s5488_s30 = int_to_ptr.vmem [resolvable:$true] %s8385_s30 }
 0x958   :  { %2581 = vrot.lane.b32.xlu2 %v2451_v6, %s6736_s25 }
 0x99a   :  { %v2520_v9 = vpop.permute.xlu2 %2519 }
 0x99b   :  { %5744 = vmatpush.msk.msra.mxu2 %vm2065_vm11, %v2520_v9  ;;  %v3017_v9 = vld [vmem:[%s8436_s28] sm:$0xff] }
 0x9a2   :  { %v2552_v34 = vpop.permute.xlu2 %2551 }
 0x9a3   :  { %5746 = vmatpush.msk.msra.mxu3 %vm2065_vm11, %v2552_v34 }
 0x9a9   :  { %v2462_v51 = vpop.permute.xlu0 %2461  ;;  %v2518_v28 = vpop.permute.xlu1 %2517 }
 0x9aa   :  { %v2648_v53 = vpop.permute.xlu2 %2647  ;;  %2542 = vmatpush.msra.mxu2 %v2518_v28 }
 0x9ab   :  { %5745 = vmatmul.msk.f32.vlgmr.msra.gmra.mxu2 %vm2164_vm13, %v2516_v52 }
 0x9ac   :  { %5752 = vmatpush.msk.msrb.mxu2 %vm2065_vm11, %v2648_v53 }
 0x9b1   :  { %v2550_v55 = vpop.permute.xlu1 %2549  ;;  %v2464_v25 = vpop.permute.xlu0 %2463 }
 0x9b2   :  { %5740 = vmatpush.msk.msra.mxu0 %vm2065_vm11, %v2464_v25  ;;  %2574 = vmatpush.msra.mxu3 %v2550_v55  ;;  %v2582_v59 = vpop.permute.xlu2 %2581 }
 0x9b3   :  { %5747 = vmatmul.msk.f32.vlgmr.msra.gmra.mxu3 %vm2164_vm13, %v2548_v54 }
 0x9b4   :  { %2486 = vmatpush.msra.mxu0 %v2462_v51  ;;  %5754 = vmatpush.msk.msrb.mxu3 %vm1328_vm7, %v2685_v0 }
 0x9b5   :  { %5741 = vmatmul.msk.f32.vlgmr.msra.gmra.mxu0 %vm2164_vm13, %v2458_v16 }
 0x9b6   :  { %2708 = vmatpush.msrb.mxu3 %v2684_v3 }
 0x9b9   :  { %v2646_v57 = vpop.permute.xlu1 %2645  ;;  %v2584_v18 = vpop.permute.xlu0 %2583 }
 0x9ba   :  { %5748 = vmatpush.msk.msrb.mxu0 %vm2065_vm11, %v2584_v18  ;;  %2670 = vmatpush.msrb.mxu2 %v2646_v57 }
 0x9bb   :  { %5753 = vmatmul.msk.f32.vlgmr.msrb.gmra.mxu2 %vm2164_vm13, %v2644_v56 }
 0x9bc   :  { %2606 = vmatpush.msrb.mxu0 %v2582_v59 }
 0x9bd   :  { %5749 = vmatmul.msk.f32.vlgmr.msrb.gmra.mxu0 %vm2164_vm13, %v2580_v58 }
 0x9be   :  { %5756 = vmatpush.msk.msra.mxu0 %vm1328_vm7, %v2732_v63  ;;  %v3011_v63 = vld [vmem:[%s8437_s1] sm:$0xff] }
 0x9c0   :  { %2751 = vmatpush.msra.mxu0 %v2731_v2  ;;  %v2513_v5 = vpop.f32.mrf.mxu1 }
 0x9c1   :  { %v2616_v60 = vpop.permute.xlu0 %2615  ;;  %v2614_v62 = vpop.permute.xlu1 %2613 }
 0x9c2   :  { %5750 = vmatpush.msk.msra.mxu1 %vm2065_vm11, %v2616_v60 }
 0x9c4   :  { %2638 = vmatpush.msra.mxu1 %v2614_v62 }
 0x9c5   :  { %5751 = vmatmul.msk.f32.vlgmr.msra.gmra.mxu1 %vm2164_vm13, %v2612_v61 }
 0xa2e   :  { %v2544_v12 = vpop.f32.mrf.mxu2 }
 0xa32   :  { %v2488_v7 = vpop.f32.mrf.mxu0 }
 0xa33   :  { %v2514_v11 = vadd.f32 %v2513_v5, %v2488_v7 }
 0xa35   :  { %v2547_v13 = vadd.f32 %v2544_v12, %v2514_v11 }
 0xa36   :  { %v2576_v14 = vpop.f32.mrf.mxu3 }
 0xa37   :  { %v2579_v15 = vadd.f32 %v2576_v14, %v2547_v13 }
 0xa3a   :  { %v2608_v20 = vpop.f32.mrf.mxu0 }
 0xa3b   :  { %v2611_v22 = vadd.f32 %v2608_v20, %v2579_v15  ;;  %v3012_v15 = vld [vmem:[%s8437_s1 + $0x8] sm:$0x3f] }
 0xa3e   :  { %v2672_v26 = vpop.f32.mrf.mxu2 }
 0xa42   :  { %v2640_v24 = vpop.f32.mrf.mxu1 }
 0xa43   :  { %v2643_v17 = vadd.f32 %v2640_v24, %v2611_v22 }
 0xa45   :  { %v2675_v31 = vadd.f32 %v2672_v26, %v2643_v17 }
 0xa47   :  { %v2677_v33 = vadd.f32 %v2676_v30, %v2675_v31  ;;  %v3051_v30 = vld [vmem:[%s8438_s2] sm:$0xff]  ;;  %v3052_v31 = vld [vmem:[%s8438_s2 + $0x8] sm:$0xff] }
 0xa49   :  { %v2678_v35 = vmax.f32 %v2677_v33, 0.0 }
 0xa4b   :  { %5757 = vmatmul.msk.f32.vlgmr.msra.gmra.mxu0 %vm2686_vm14, %v2678_v35  ;;  %5755 = vmatmul.msk.f32.vlgmr.msrb.gmra.mxu3 %vm2686_vm14, %v2678_v35  ;;  %v2679_v36 = vmul.f32 %v2678_v35, %v2678_v35  ;;  %5458 = vst.msk [vmem:[#allocation6] sm:$0x3] %vm2680_vm15, %v2678_v35  ;;  %v3053_v35 = vld [vmem:[%s8438_s2 + $0x10] sm:$0xff] }
 0xa4d   :  { %v7532_v37 = vsel %vm2680_vm15, %v2679_v36, 0.0  ;;  %v3054_v36 = vld [vmem:[%s8438_s2 + $0x18] sm:$0xff] }
 0xac8   :  { %v2753_v38 = vpop.f32.mrf.mxu0 }
 0xac9   :  { %2939 = vrot.lane.b32.xlu1 %v2753_v38, %s6743_s22  ;;  %2761 = vrot.lane.b32.xlu0 %v2753_v38, %s6735_s21 }
 0xaca   :  { %2828 = vrot.lane.b32.xlu2 %v2753_v38, %s6737_s29  ;;  %5761 = vmatpush.msk.msra.mxu2 %vm671_vm4, %v2753_v38 }
 0xacb   :  { %5762 = vmatmul.msk.f32.vlgmr.msra.gmra.mxu2 %vm2763_vm0, %v2756_v19 }
 0xace   :  { %v7572_v6 = vpop.f32.mrf.mxu3 }
 0xad1   :  { %2902 = vrot.lane.b32.xlu1 %v2753_v38, %s6744_s23  ;;  %2976 = vrot.lane.b32.xlu0 %v2753_v38, %s6745_s26 }
 0xad2   :  { %2865 = vrot.lane.b32.xlu2 %v2753_v38, %s6736_s25  ;;  %v3292_v38 = vld [vmem:[%s8438_s2 + $0xe0] sm:$0xff]  ;;  %s6748_s25 = smov 54  }
 0xad3   :  { %5763 = vmatmul.msk.f32.gmra.mxu2 %vm2763_vm0, %v2757_v39  ;;  %v3055_v39 = vld [vmem:[%s8438_s2 + $0x20] sm:$0xff] }
 0xb24   :  { %v2829_v41 = vpop.permute.xlu2 %2828 }
 0xb25   :  { %5764 = vmatpush.msk.msra.mxu3 %vm671_vm4, %v2829_v41 }
 0xb26   :  { %5765 = vmatmul.msk.f32.vlgmr.msra.gmra.mxu3 %vm2763_vm0, %v2826_v40  ;;  %v3293_v40 = vld [vmem:[%s8438_s2 + $0xe8] sm:$0xff] }
 0xb2c   :  { %v2866_v1 = vpop.permute.xlu2 %2865 }
 0xb2d   :  { %5767 = vmatpush.msk.msrb.mxu0 %vm671_vm4, %v2866_v1  ;;  %v3056_v1 = vld [vmem:[%s8438_s2 + $0x28] sm:$0xff] }
 0xb2e   :  { %5766 = vmatmul.msk.f32.gmra.mxu3 %vm2763_vm0, %v2827_v42  ;;  %5768 = vmatmul.msk.f32.vlgmr.msrb.gmra.mxu0 %vm2763_vm0, %v2863_v43  ;;  %v3065_v42 = vld [vmem:[%s8438_s2 + $0x70] sm:$0xff] }
 0xb2f   :  { %5779 = vmatpush.msk.msra.mxu0 %vm2052_vm10, %v3018_v32  ;;  %v3070_v32 = vld [vmem:[%s8438_s2 + $0x98] sm:$0xff] }
 0xb31   :  { %3043 = vmatpush.msra.mxu0 %v3017_v9  ;;  %v3061_v9 = vld [vmem:[%s8438_s2 + $0x50] sm:$0xff] }
 0xb36   :  { %5769 = vmatmul.msk.f32.gmra.mxu0 %vm2763_vm0, %v2864_v8  ;;  %v3294_v8 = vld [vmem:[%s8438_s2 + $0xf0] sm:$0xff] }
 0xb3b   :  { %v2940_v45 = vpop.permute.xlu1 %2939  ;;  %v2762_v44 = vpop.permute.xlu0 %2761 }
 0xb3c   :  { %5758 = vmatpush.msk.msrb.mxu1 %vm671_vm4, %v2762_v44  ;;  %5773 = vmatpush.msk.msrb.mxu2 %vm671_vm4, %v2940_v45  ;;  %v3295_v45 = vld [vmem:[%s8438_s2 + $0xf8] sm:$0xff]  ;;  %v3067_v44 = vld [vmem:[%s8438_s2 + $0x80] sm:$0xff] }
 0xb3d   :  { %5759 = vmatmul.msk.f32.vlgmr.msrb.gmra.mxu1 %vm2763_vm0, %v2758_v10  ;;  %5774 = vmatmul.msk.f32.vlgmr.msrb.gmra.mxu2 %vm2763_vm0, %v2937_v21  ;;  %v3066_v10 = vld [vmem:[%s8438_s2 + $0x78] sm:$0xff]  ;;  %v3057_v21 = vld [vmem:[%s8438_s2 + $0x30] sm:$0xff] }
 0xb43   :  { %v2903_v48 = vpop.permute.xlu1 %2902  ;;  %v2977_v4 = vpop.permute.xlu0 %2976 }
 0xb44   :  { %5770 = vmatpush.msk.msra.mxu1 %vm671_vm4, %v2903_v48  ;;  %5776 = vmatpush.msk.msrb.mxu3 %vm671_vm4, %v2977_v4  ;;  %v3068_v48 = vld [vmem:[%s8438_s2 + $0x88] sm:$0xff]  ;;  %v3059_v4 = vld [vmem:[%s8438_s2 + $0x40] sm:$0xff] }
 0xb45   :  { %5760 = vmatmul.msk.f32.gmra.mxu1 %vm2763_vm0, %v2759_v46  ;;  %5777 = vmatmul.msk.f32.vlgmr.msrb.gmra.mxu3 %vm2763_vm0, %v2974_v47  ;;  %v3058_v46 = vld [vmem:[%s8438_s2 + $0x38] sm:$0xff]  ;;  %v3296_v47 = vld [vmem:[%s8438_s2 + $0x100] sm:$0xff] }
 0xb46   :  { %5775 = vmatmul.msk.f32.gmra.mxu2 %vm2763_vm0, %v2938_v49  ;;  %v3297_v49 = vld [vmem:[%s8438_s2 + $0x108] sm:$0xff] }
 0xb4d   :  { %5771 = vmatmul.msk.f32.vlgmr.msra.gmra.mxu1 %vm2763_vm0, %v2900_v50  ;;  %5778 = vmatmul.msk.f32.gmra.mxu3 %vm2763_vm0, %v2975_v23  ;;  %v3069_v50 = vld [vmem:[%s8438_s2 + $0x90] sm:$0xff]  ;;  %v3060_v23 = vld [vmem:[%s8438_s2 + $0x48] sm:$0xff] }
 0xb4e   :  { %v2820_v27 = vpop.f32.mrf.mxu2 }
 0xb55   :  { %5772 = vmatmul.msk.f32.gmra.mxu1 %vm2763_vm0, %v2901_v29  ;;  %v3298_v29 = vld [vmem:[%s8438_s2 + $0x110] sm:$0xff] }
 0xb56   :  { %v2823_v28 = vpop.f32.mrf.mxu2 }
 0xba9   :  { %v2855_v34 = vpop.f32.mrf.mxu3 }
 0xbab   :  { %v2892_v55 = vpop.f32.mrf.mxu0 }
 0xbb1   :  { %v2858_v54 = vpop.f32.mrf.mxu3 }
 0xbb3   :  { %v2895_v62 = vpop.f32.mrf.mxu0 }
 0xbba   :  { %v2789_v51 = vpop.f32.mrf.mxu1 }
 0xbbb   :  { %v2821_v52 = vadd.f32 %v2820_v27, %v2789_v51  ;;  %v3299_v27 = vld [vmem:[%s8438_s2 + $0x118] sm:$0xff] }
 0xbbc   :  { %v3062_v51 = vld [vmem:[%s8438_s2 + $0x58] sm:$0xff] }
 0xbbd   :  { %v2861_v25 = vadd.f32 %v2855_v34, %v2821_v52  ;;  %v3071_v34 = vld [vmem:[%s8438_s2 + $0xa0] sm:$0xff]  ;;  %v3072_v52 = vld [vmem:[%s8438_s2 + $0xa8] sm:$0xff] }
 0xbbf   :  { %v2898_v57 = vadd.f32 %v2892_v55, %v2861_v25  ;;  %v3073_v55 = vld [vmem:[%s8438_s2 + $0xb0] sm:$0xff]  ;;  %v3064_v25 = vld [vmem:[%s8438_s2 + $0x68] sm:$0xff] }
 0xbc0   :  { %v2966_v16 = vpop.f32.mrf.mxu2 }
 0xbc2   :  { %v2792_v53 = vpop.f32.mrf.mxu1 }
 0xbc3   :  { %v2824_v56 = vadd.f32 %v2823_v28, %v2792_v53  ;;  %v3300_v28 = vld [vmem:[%s8438_s2 + $0x120] sm:$0xff] }
 0xbc4   :  { %v3063_v53 = vld [vmem:[%s8438_s2 + $0x60] sm:$0xff] }
 0xbc5   :  { %v2862_v60 = vadd.f32 %v2858_v54, %v2824_v56  ;;  %v3301_v54 = vld [vmem:[%s8438_s2 + $0x128] sm:$0xff]  ;;  %v3074_v56 = vld [vmem:[%s8438_s2 + $0xb8] sm:$0xff] }
 0xbc7   :  { %v2899_v2 = vadd.f32 %v2895_v62, %v2862_v60  ;;  %v3305_v60 = vld [vmem:[%s8438_s2 + $0x148] sm:$0xff] }
 0xbc8   :  { %v3003_v58 = vpop.f32.mrf.mxu3 }
 0xbc9   :  { %v2969_v7 = vpop.f32.mrf.mxu2 }
 0xbca   :  { %v2929_v18 = vpop.f32.mrf.mxu1 }
 0xbcb   :  { %v2935_v59 = vadd.f32 %v2929_v18, %v2898_v57  ;;  %v3303_v57 = vld [vmem:[%s8438_s2 + $0x138] sm:$0xff]  ;;  %v3075_v18 = vld [vmem:[%s8438_s2 + $0xc0] sm:$0xff] }
 0xbcd   :  { %v2972_v61 = vadd.f32 %v2966_v16, %v2935_v59  ;;  %v3302_v16 = vld [vmem:[%s8438_s2 + $0x130] sm:$0xff]  ;;  %v3076_v59 = vld [vmem:[%s8438_s2 + $0xc8] sm:$0xff] }
 0xbcf   :  { %v3009_v0 = vadd.f32 %v3003_v58, %v2972_v61  ;;  %v3304_v58 = vld [vmem:[%s8438_s2 + $0x140] sm:$0xff]  ;;  %v3077_v61 = vld [vmem:[%s8438_s2 + $0xd0] sm:$0xff] }
 0xbd0   :  { %v3006_v13 = vpop.f32.mrf.mxu3 }
 0xbd1   :  { %v3013_v3 = vadd.f32 %v3011_v63, %v3009_v0  ;;  %v3443_v63 = vld [vmem:[%s8439_s7 + $0x8] sm:$0xf]  ;;  %v3442_v0 = vld [vmem:[%s8439_s7] sm:$0xff] }
 0xbd2   :  { %v2932_v5 = vpop.f32.mrf.mxu1  ;;  %5827 = vmatpush.msk.msrb.mxu0 %vm2052_vm10, %v3443_v63 }
 0xbd3   :  { %v3015_v11 = vmax.f32 %v3013_v3, 0.0  ;;  %v2936_v12 = vadd.f32 %v2932_v5, %v2899_v2  ;;  %v3078_v2 = vld [vmem:[%s8438_s2 + $0xd8] sm:$0xff] }
 0xbd4   :  { %3504 = vmatpush.msrb.mxu0 %v3442_v0 }
 0xbd5   :  { %v2973_v14 = vadd.f32 %v2969_v7, %v2936_v12  ;;  %5780 = vmatmul.msk.f32.vlgmr.msra.gmra.mxu0 %vm2120_vm12, %v3015_v11 }
 0xbd7   :  { %v3010_v20 = vadd.f32 %v3006_v13, %v2973_v14 }
 0xbd9   :  { %v3014_v22 = vadd.f32 %v3012_v15, %v3010_v20 }
 0xbdb   :  { %v3016_v24 = vmax.f32 %v3014_v22, 0.0 }
 0xbdd   :  { %5781 = vmatmul.msk.f32.gmra.mxu0 %vm2120_vm12, %v3016_v24 }
 0xc52   :  { %v3045_v26 = vpop.f32.mrf.mxu0 }
 0xc53   :  { %3306 = vrot.lane.b32.xlu0 %v3045_v26, %s6737_s29 }
 0xc5a   :  { %v3048_v17 = vpop.f32.mrf.mxu0 }
 0xc5b   :  { %3083 = vrot.lane.b32.xlu1 %v3048_v17, %s6735_s21  ;;  %3308 = vrot.lane.b32.xlu2 %v3048_v17, %s6737_s29  ;;  %s8446_s29 = sld [smem:[#allocation24_spill]] }
 0xc5c   :  { %5797 = vmatpush.msk.msra.mxu2 %vm2065_vm11, %v3048_v17 }
 0xc5e   :  { %3248 = vmatpush.msra.mxu2 %v3045_v26 }
 0xc5f   :  { %5798 = vmatmul.msk.f32.vlgmr.msra.gmra.mxu2 %vm2164_vm13, %v3051_v30 }
 0xc63   :  { %3081 = vrot.lane.b32.xlu2 %v3045_v26, %s6735_s21  ;;  %s6747_s21 = smov 81  }
 0xc67   :  { %5799 = vmatmul.msk.f32.gmra.mxu2 %vm2164_vm13, %v3052_v31 }
 0xc6f   :  { %5800 = vmatmul.msk.f32.gmra.mxu2 %vm2164_vm13, %v3053_v35 }
 0xc77   :  { %5801 = vmatmul.msk.f32.gmra.mxu2 %vm2164_vm13, %v3054_v36 }
 0xc7f   :  { %5802 = vmatmul.msk.f32.gmra.mxu2 %vm2164_vm13, %v3055_v39 }
 0xc87   :  { %5803 = vmatmul.msk.f32.gmra.mxu2 %vm2164_vm13, %v3056_v1 }
 0xc8f   :  { %5804 = vmatmul.msk.f32.gmra.mxu2 %vm2164_vm13, %v3057_v21 }
 0xc97   :  { %5805 = vmatmul.msk.f32.gmra.mxu2 %vm2164_vm13, %v3058_v46 }
 0xc9f   :  { %5806 = vmatmul.msk.f32.gmra.mxu2 %vm2164_vm13, %v3059_v4 }
 0xca7   :  { %5807 = vmatmul.msk.f32.gmra.mxu2 %vm2164_vm13, %v3060_v23 }
 0xcaf   :  { %5808 = vmatmul.msk.f32.gmra.mxu2 %vm2164_vm13, %v3061_v9 }
 0xcb5   :  { %v3309_v33 = vpop.permute.xlu2 %3308 }
 0xcb6   :  { %5812 = vmatpush.msk.msra.mxu3 %vm2065_vm11, %v3309_v33 }
 0xcb7   :  { %5809 = vmatmul.msk.f32.gmra.mxu2 %vm2164_vm13, %v3062_v51 }
 0xcbd   :  { %v3082_v43 = vpop.permute.xlu2 %3081 }
 0xcbf   :  { %5810 = vmatmul.msk.f32.gmra.mxu2 %vm2164_vm13, %v3063_v53 }
 0xcc5   :  { %v3307_v19 = vpop.permute.xlu0 %3306 }
 0xcc6   :  { %3370 = vmatpush.msra.mxu3 %v3307_v19 }
 0xcc7   :  { %5813 = vmatmul.msk.f32.vlgmr.msra.gmra.mxu3 %vm2164_vm13, %v3292_v38  ;;  %5811 = vmatmul.msk.f32.gmra.mxu2 %vm2164_vm13, %v3064_v25 }
 0xccd   :  { %v3084_v41 = vpop.permute.xlu1 %3083 }
 0xcce   :  { %5782 = vmatpush.msk.msrb.mxu1 %vm2065_vm11, %v3084_v41 }
 0xccf   :  { %5814 = vmatmul.msk.f32.gmra.mxu3 %vm2164_vm13, %v3293_v40 }
 0xcd0   :  { %3145 = vmatpush.msrb.mxu1 %v3082_v43 }
 0xcd1   :  { %5783 = vmatmul.msk.f32.vlgmr.msrb.gmra.mxu1 %vm2164_vm13, %v3065_v42 }
 0xcd7   :  { %5815 = vmatmul.msk.f32.gmra.mxu3 %vm2164_vm13, %v3294_v8 }
 0xcd9   :  { %5784 = vmatmul.msk.f32.gmra.mxu1 %vm2164_vm13, %v3066_v10 }
 0xcdf   :  { %5816 = vmatmul.msk.f32.gmra.mxu3 %vm2164_vm13, %v3295_v45 }
 0xce1   :  { %5785 = vmatmul.msk.f32.gmra.mxu1 %vm2164_vm13, %v3067_v44 }
 0xce2   :  { %v3250_v62 = vpop.f32.mrf.mxu2 }
 0xce7   :  { %5817 = vmatmul.msk.f32.gmra.mxu3 %vm2164_vm13, %v3296_v47 }
 0xce9   :  { %5786 = vmatmul.msk.f32.gmra.mxu1 %vm2164_vm13, %v3068_v48 }
 0xcea   :  { %v3253_v3 = vpop.f32.mrf.mxu2 }
 0xcef   :  { %5818 = vmatmul.msk.f32.gmra.mxu3 %vm2164_vm13, %v3297_v49 }
 0xcf1   :  { %5787 = vmatmul.msk.f32.gmra.mxu1 %vm2164_vm13, %v3069_v50 }
 0xcf2   :  { %v3256_v5 = vpop.f32.mrf.mxu2 }
 0xcf7   :  { %5819 = vmatmul.msk.f32.gmra.mxu3 %vm2164_vm13, %v3298_v29 }
 0xcf9   :  { %5788 = vmatmul.msk.f32.gmra.mxu1 %vm2164_vm13, %v3070_v32 }
 0xcfa   :  { %v3259_v13 = vpop.f32.mrf.mxu2 }
 0xcff   :  { %5820 = vmatmul.msk.f32.gmra.mxu3 %vm2164_vm13, %v3299_v27 }
 0xd01   :  { %5789 = vmatmul.msk.f32.gmra.mxu1 %vm2164_vm13, %v3071_v34 }
 0xd02   :  { %v3262_v30 = vpop.f32.mrf.mxu2 }
 0xd07   :  { %5821 = vmatmul.msk.f32.gmra.mxu3 %vm2164_vm13, %v3300_v28 }
 0xd09   :  { %5790 = vmatmul.msk.f32.gmra.mxu1 %vm2164_vm13, %v3072_v52 }
 0xd0a   :  { %v3265_v39 = vpop.f32.mrf.mxu2 }
 0xd0f   :  { %5822 = vmatmul.msk.f32.gmra.mxu3 %vm2164_vm13, %v3301_v54 }
 0xd11   :  { %5791 = vmatmul.msk.f32.gmra.mxu1 %vm2164_vm13, %v3073_v55 }
 0xd12   :  { %v3268_v10 = vpop.f32.mrf.mxu2 }
 0xd17   :  { %5823 = vmatmul.msk.f32.gmra.mxu3 %vm2164_vm13, %v3302_v16 }
 0xd19   :  { %5792 = vmatmul.msk.f32.gmra.mxu1 %vm2164_vm13, %v3074_v56 }
 0xd1a   :  { %v3271_v4 = vpop.f32.mrf.mxu2 }
 0xd1f   :  { %5824 = vmatmul.msk.f32.gmra.mxu3 %vm2164_vm13, %v3303_v57 }
 0xd21   :  { %5793 = vmatmul.msk.f32.gmra.mxu1 %vm2164_vm13, %v3075_v18 }
 0xd22   :  { %v3274_v34 = vpop.f32.mrf.mxu2 }
 0xd27   :  { %5825 = vmatmul.msk.f32.gmra.mxu3 %vm2164_vm13, %v3304_v58 }
 0xd29   :  { %5794 = vmatmul.msk.f32.gmra.mxu1 %vm2164_vm13, %v3076_v59 }
 0xd2a   :  { %v3277_v25 = vpop.f32.mrf.mxu2 }
 0xd2f   :  { %5826 = vmatmul.msk.f32.gmra.mxu3 %vm2164_vm13, %v3305_v60 }
 0xd31   :  { %5795 = vmatmul.msk.f32.gmra.mxu1 %vm2164_vm13, %v3077_v61 }
 0xd32   :  { %v3280_v60 = vpop.f32.mrf.mxu2 }
 0xd39   :  { %5796 = vmatmul.msk.f32.gmra.mxu1 %vm2164_vm13, %v3078_v2 }
 0xd4a   :  { %v3372_v7 = vpop.f32.mrf.mxu3 }
 0xd4e   :  { %v3147_v11 = vpop.f32.mrf.mxu1 }
 0xd4f   :  { %v3251_v12 = vadd.f32 %v3250_v62, %v3147_v11 }
 0xd51   :  { %v3414_v14 = vadd.f32 %v3372_v7, %v3251_v12 }
 0xd52   :  { %v3375_v15 = vpop.f32.mrf.mxu3 }
 0xd53   :  { %v3428_v20 = vmax.f32 %v3414_v14, 0.0 }
 0xd55   :  { %5828 = vmatmul.msk.f32.vlgmr.msrb.gmra.mxu0 %vm2120_vm12, %v3428_v20 }
 0xd56   :  { %v3150_v22 = vpop.f32.mrf.mxu1 }
 0xd57   :  { %v3254_v24 = vadd.f32 %v3253_v3, %v3150_v22 }
 0xd59   :  { %v3415_v26 = vadd.f32 %v3375_v15, %v3254_v24 }
 0xd5a   :  { %v3378_v17 = vpop.f32.mrf.mxu3 }
 0xd5b   :  { %v3429_v31 = vmax.f32 %v3415_v26, 0.0 }
 0xd5d   :  { %5829 = vmatmul.msk.f32.gmra.mxu0 %vm2120_vm12, %v3429_v31 }
 0xd5e   :  { %v3153_v33 = vpop.f32.mrf.mxu1 }
 0xd5f   :  { %v3257_v35 = vadd.f32 %v3256_v5, %v3153_v33  ;;  %v3283_v5 = vpop.f32.mrf.mxu2 }
 0xd61   :  { %v3416_v36 = vadd.f32 %v3378_v17, %v3257_v35 }
 0xd62   :  { %v3381_v38 = vpop.f32.mrf.mxu3 }
 0xd63   :  { %v3430_v19 = vmax.f32 %v3416_v36, 0.0 }
 0xd65   :  { %5830 = vmatmul.msk.f32.gmra.mxu0 %vm2120_vm12, %v3430_v19 }
 0xd66   :  { %v3156_v40 = vpop.f32.mrf.mxu1 }
 0xd67   :  { %v3260_v41 = vadd.f32 %v3259_v13, %v3156_v40  ;;  %v3286_v20 = vpop.f32.mrf.mxu2 }
 0xd69   :  { %v3417_v42 = vadd.f32 %v3381_v38, %v3260_v41 }
 0xd6a   :  { %v3384_v43 = vpop.f32.mrf.mxu3 }
 0xd6b   :  { %v3431_v1 = vmax.f32 %v3417_v42, 0.0 }
 0xd6d   :  { %5831 = vmatmul.msk.f32.gmra.mxu0 %vm2120_vm12, %v3431_v1 }
 0xd6e   :  { %v3159_v8 = vpop.f32.mrf.mxu1 }
 0xd6f   :  { %v3263_v21 = vadd.f32 %v3262_v30, %v3159_v8  ;;  %v3289_v33 = vpop.f32.mrf.mxu2 }
 0xd71   :  { %v3418_v45 = vadd.f32 %v3384_v43, %v3263_v21 }
 0xd72   :  { %v3387_v44 = vpop.f32.mrf.mxu3 }
 0xd73   :  { %v3432_v46 = vmax.f32 %v3418_v45, 0.0 }
 0xd75   :  { %5832 = vmatmul.msk.f32.gmra.mxu0 %vm2120_vm12, %v3432_v46 }
 0xd76   :  { %v3162_v47 = vpop.f32.mrf.mxu1 }
 0xd77   :  { %v3266_v48 = vadd.f32 %v3265_v39, %v3162_v47 }
 0xd79   :  { %v3419_v49 = vadd.f32 %v3387_v44, %v3266_v48 }
 0xd7a   :  { %v3390_v50 = vpop.f32.mrf.mxu3 }
 0xd7b   :  { %v3433_v23 = vmax.f32 %v3419_v49, 0.0 }
 0xd7d   :  { %5833 = vmatmul.msk.f32.gmra.mxu0 %vm2120_vm12, %v3433_v23 }
 0xd7e   :  { %v3165_v29 = vpop.f32.mrf.mxu1 }
 0xd7f   :  { %v3269_v32 = vadd.f32 %v3268_v10, %v3165_v29 }
 0xd81   :  { %v3420_v9 = vadd.f32 %v3390_v50, %v3269_v32 }
 0xd82   :  { %v3393_v27 = vpop.f32.mrf.mxu3 }
 0xd83   :  { %v3434_v51 = vmax.f32 %v3420_v9, 0.0 }
 0xd85   :  { %5834 = vmatmul.msk.f32.gmra.mxu0 %vm2120_vm12, %v3434_v51 }
 0xd86   :  { %v3168_v28 = vpop.f32.mrf.mxu1 }
 0xd87   :  { %v3272_v52 = vadd.f32 %v3271_v4, %v3168_v28 }
 0xd89   :  { %v3421_v53 = vadd.f32 %v3393_v27, %v3272_v52 }
 0xd8a   :  { %v3396_v54 = vpop.f32.mrf.mxu3 }
 0xd8b   :  { %v3435_v55 = vmax.f32 %v3421_v53, 0.0 }
 0xd8d   :  { %5835 = vmatmul.msk.f32.gmra.mxu0 %vm2120_vm12, %v3435_v55 }
 0xd8e   :  { %v3171_v16 = vpop.f32.mrf.mxu1 }
 0xd8f   :  { %v3275_v56 = vadd.f32 %v3274_v34, %v3171_v16 }
 0xd91   :  { %v3422_v57 = vadd.f32 %v3396_v54, %v3275_v56 }
 0xd92   :  { %v3399_v18 = vpop.f32.mrf.mxu3 }
 0xd93   :  { %v3436_v58 = vmax.f32 %v3422_v57, 0.0 }
 0xd95   :  { %5836 = vmatmul.msk.f32.gmra.mxu0 %vm2120_vm12, %v3436_v58 }
 0xd96   :  { %v3174_v59 = vpop.f32.mrf.mxu1 }
 0xd97   :  { %v3278_v61 = vadd.f32 %v3277_v25, %v3174_v59 }
 0xd99   :  { %v3423_v62 = vadd.f32 %v3399_v18, %v3278_v61 }
 0xd9a   :  { %v3402_v63 = vpop.f32.mrf.mxu3 }
 0xd9b   :  { %v3437_v0 = vmax.f32 %v3423_v62, 0.0 }
 0xd9d   :  { %5837 = vmatmul.msk.f32.gmra.mxu0 %vm2120_vm12, %v3437_v0 }
 0xd9e   :  { %v3177_v2 = vpop.f32.mrf.mxu1 }
 0xd9f   :  { %v3281_v3 = vadd.f32 %v3280_v60, %v3177_v2  ;;  %v3548_v2 = vld [vmem:[%s8440_s10] sm:$0xff] }
 0xda1   :  { %v3424_v7 = vadd.f32 %v3402_v63, %v3281_v3 }
 0xda2   :  { %v3405_v11 = vpop.f32.mrf.mxu3 }
 0xda3   :  { %v3438_v12 = vmax.f32 %v3424_v7, 0.0 }
 0xda5   :  { %5838 = vmatmul.msk.f32.gmra.mxu0 %vm2120_vm12, %v3438_v12 }
 0xda6   :  { %v3180_v13 = vpop.f32.mrf.mxu1 }
 0xda7   :  { %v3284_v14 = vadd.f32 %v3283_v5, %v3180_v13 }
 0xda9   :  { %v3425_v15 = vadd.f32 %v3405_v11, %v3284_v14 }
 0xdaa   :  { %v3408_v24 = vpop.f32.mrf.mxu3 }
 0xdab   :  { %v3439_v22 = vmax.f32 %v3425_v15, 0.0 }
 0xdad   :  { %5839 = vmatmul.msk.f32.gmra.mxu0 %vm2120_vm12, %v3439_v22 }
 0xdae   :  { %v3183_v26 = vpop.f32.mrf.mxu1 }
 0xdaf   :  { %v3287_v17 = vadd.f32 %v3286_v20, %v3183_v26  ;;  %v3549_v26 = vld [vmem:[%s8440_s10 + $0x8] sm:$0xff] }
 0xdb1   :  { %v3426_v30 = vadd.f32 %v3408_v24, %v3287_v17 }
 0xdb2   :  { %v3411_v36 = vpop.f32.mrf.mxu3 }
 0xdb3   :  { %v3440_v31 = vmax.f32 %v3426_v30, 0.0 }
 0xdb5   :  { %5840 = vmatmul.msk.f32.gmra.mxu0 %vm2120_vm12, %v3440_v31 }
 0xdb6   :  { %v3186_v35 = vpop.f32.mrf.mxu1 }
 0xdb7   :  { %v3290_v38 = vadd.f32 %v3289_v33, %v3186_v35 }
 0xdb9   :  { %v3427_v19 = vadd.f32 %v3411_v36, %v3290_v38 }
 0xdbb   :  { %v3441_v39 = vmax.f32 %v3427_v19, 0.0 }
 0xdbd   :  { %5841 = vmatmul.msk.f32.gmra.mxu0 %vm2120_vm12, %v3441_v39 }
 0xdd2   :  { %v3506_v40 = vpop.f32.mrf.mxu0 }
 0xdda   :  { %v3509_v41 = vpop.f32.mrf.mxu0 }
 0xddb   :  { %v6312_v27 = vpack.i.bf16 %v3506_v40, %v3509_v41 }
 0xde2   :  { %v3512_v42 = vpop.f32.mrf.mxu0 }
 0xdea   :  { %v3515_v43 = vpop.f32.mrf.mxu0 }
 0xdeb   :  { %v6292_v9 = vpack.i.bf16 %v3512_v42, %v3515_v43 }
 0xdf2   :  { %v3518_v1 = vpop.f32.mrf.mxu0 }
 0xdfa   :  { %v3521_v8 = vpop.f32.mrf.mxu0 }
 0xdfb   :  { %v6272_v4 = vpack.i.bf16 %v3518_v1, %v3521_v8 }
 0xe02   :  { %v3524_v10 = vpop.f32.mrf.mxu0 }
 0xe0a   :  { %v3527_v21 = vpop.f32.mrf.mxu0 }
 0xe0b   :  { %v6232_v45 = vpack.i.bf16 %v3524_v10, %v3527_v21 }
 0xe0d   :  { %6233 = vrot.lane.b32.xlu1 %v6232_v45, %s6730_s0 }
 0xe12   :  { %v3530_v44 = vpop.f32.mrf.mxu0 }
 0xe1a   :  { %v3533_v46 = vpop.f32.mrf.mxu0 }
 0xe1b   :  { %v6242_v47 = vpack.i.bf16 %v3530_v44, %v3533_v46 }
 0xe1d   :  { %6243 = vrot.lane.b32.xlu0 %v6242_v47, %s6733_s9  ;;  %6238 = vrot.lane.b32.xlu1 %v6242_v47, %s6730_s0 }
 0xe22   :  { %v3536_v48 = vpop.f32.mrf.mxu0 }
 0xe25   :  { %6273 = vrot.lane.b32.xlu1 %v6272_v4, %s6730_s0 }
 0xe2a   :  { %v3539_v49 = vpop.f32.mrf.mxu0 }
 0xe2b   :  { %v6252_v50 = vpack.i.bf16 %v3536_v48, %v3539_v49 }
 0xe2d   :  { %6253 = vrot.lane.b32.xlu0 %v6252_v50, %s6733_s9  ;;  %6248 = vrot.lane.b32.xlu2 %v6252_v50, %s6730_s0 }
 0xe32   :  { %v3542_v23 = vpop.f32.mrf.mxu0 }
 0xe35   :  { %6258 = vrot.lane.b32.xlu2 %v6252_v50, %s6734_s17 }
 0xe3a   :  { %v3545_v29 = vpop.f32.mrf.mxu0 }
 0xe3b   :  { %3756 = vmatpush.msrb.mxu2 %v3545_v29  ;;  %v6287_v32 = vpack.i.bf16 %v3542_v23, %v3545_v29 }
 0xe3d   :  { %6278 = vrot.lane.b32.xlu2 %v6242_v47, %s6734_s17  ;;  %6288 = vrot.lane.b32.xlu1 %v6287_v32, %s6733_s9 }
 0xe3e   :  { %6263 = vrot.lane.b32.xlu0 %v6287_v32, %s6730_s0  ;;  %3757 = vmatpush.msrb.mxu2 %v3542_v23 }
 0xe40   :  { %3758 = vmatpush.msrb.mxu2 %v3539_v49 }
 0xe42   :  { %3759 = vmatpush.msrb.mxu2 %v3536_v48 }
 0xe44   :  { %3760 = vmatpush.msrb.mxu2 %v3533_v46  ;;  %v3551_v46 = vld [vmem:[%s8440_s10 + $0x18] sm:$0xff] }
 0xe45   :  { %6298 = vrot.lane.b32.xlu2 %v6287_v32, %s6734_s17  ;;  %6293 = vrot.lane.b32.xlu1 %v6292_v9, %s6730_s0 }
 0xe46   :  { %6268 = vrot.lane.b32.xlu0 %v6232_v45, %s6733_s9  ;;  %3761 = vmatpush.msrb.mxu2 %v3530_v44 }
 0xe48   :  { %3762 = vmatpush.msrb.mxu2 %v3527_v21 }
 0xe4a   :  { %3763 = vmatpush.msrb.mxu2 %v3524_v10 }
 0xe4c   :  { %3764 = vmatpush.msrb.mxu2 %v3521_v8 }
 0xe4d   :  { %6303 = vrot.lane.b32.xlu2 %v6232_v45, %s6734_s17  ;;  %6313 = vrot.lane.b32.xlu1 %v6312_v27, %s6730_s0 }
 0xe4e   :  { %6283 = vrot.lane.b32.xlu0 %v6272_v4, %s6733_s9  ;;  %3765 = vmatpush.msrb.mxu2 %v3518_v1 }
 0xe50   :  { %3766 = vmatpush.msrb.mxu2 %v3515_v43 }
 0xe52   :  { %3767 = vmatpush.msrb.mxu2 %v3512_v42 }
 0xe54   :  { %3768 = vmatpush.msrb.mxu2 %v3509_v41  ;;  %v3550_v41 = vld [vmem:[%s8440_s10 + $0x10] sm:$0xff] }
 0xe55   :  { %6318 = vrot.lane.b32.xlu2 %v6272_v4, %s6734_s17  ;;  %6328 = vrot.lane.b32.xlu1 %v6292_v9, %s6734_s17 }
 0xe56   :  { %6308 = vrot.lane.b32.xlu0 %v6292_v9, %s6733_s9  ;;  %3769 = vmatpush.msrb.mxu2 %v3506_v40 }
 0xe57   :  { %5854 = vmatmul.msk.f32.vlgmr.msrb.gmra.mxu2 %vm3628_vm2, %v3548_v2  ;;  %v3555_v2 = vld [vmem:[%s8440_s10 + $0x38] sm:$0xff] }
 0xe5d   :  { %6333 = vrot.lane.b32.xlu2 %v6312_v27, %s6734_s17  ;;  %s6746_s17 = smov 27  }
 0xe5e   :  { %6323 = vrot.lane.b32.xlu0 %v6312_v27, %s6733_s9  ;;  %s8442_s9 = sld [smem:[#allocation20_spill]] }
 0xe5f   :  { %5855 = vmatmul.msk.f32.gmra.mxu2 %vm3628_vm2, %v3549_v26  ;;  %v3558_v26 = vld [vmem:[%s8440_s10 + $0x50] sm:$0xff] }
 0xe67   :  { %5856 = vmatmul.msk.f32.gmra.mxu2 %vm3628_vm2, %v3550_v41  ;;  %v3569_v41 = vld [vmem:[%s8440_s10 + $0xa8] sm:$0xff] }
 0xe6f   :  { %5857 = vmatmul.msk.f32.gmra.mxu2 %vm3628_vm2, %v3551_v46  ;;  %v4157_v46 = vld [vmem:[%s8441_s11 + $0x20] sm:$0xff] }
 0xe7f   :  { %v7710_v28 = vpop.permute.xlu1 %6233 }
 0xe80   :  { %v6235_v39 = vunpack.i.l.bf16 %v7710_v28  ;;  %v6236_v42 = vunpack.i.h.bf16 %v7710_v28 }
 0xe87   :  { %v6249_v34 = vpop.permute.xlu2 %6248 }
 0xe88   :  { %v6250_v22 = vunpack.i.l.bf16 %v6249_v34  ;;  %v6251_v17 = vunpack.i.h.bf16 %v6249_v34  ;;  %v3807_v34 = vld [vmem:[%s8440_s10 + $0xc0] sm:$0xff] }
 0xe8f   :  { %v6259_v51 = vpop.permute.xlu2 %6258  ;;  %v6239_v53 = vpop.permute.xlu1 %6238 }
 0xe90   :  { %v6244_v54 = vpop.permute.xlu0 %6243  ;;  %v6260_v56 = vunpack.i.l.bf16 %v6259_v51  ;;  %v6261_v57 = vunpack.i.h.bf16 %v6259_v51  ;;  %v6240_v35 = vunpack.i.l.bf16 %v6239_v53  ;;  %v6241_v38 = vunpack.i.h.bf16 %v6239_v53  ;;  %v3552_v53 = vld [vmem:[%s8440_s10 + $0x20] sm:$0xff] }
 0xe91   :  { %v6245_v31 = vunpack.i.l.bf16 %v6244_v54  ;;  %v6246_v36 = vunpack.i.h.bf16 %v6244_v54  ;;  %5858 = vmatmul.msk.f32.gmra.mxu2 %vm3628_vm2, %v3552_v53  ;;  %v4117_v53 = vld [vmem:[%s8442_s9] sm:$0xff] }
 0xe97   :  { %v6279_v52 = vpop.permute.xlu2 %6278  ;;  %v7712_v18 = vpop.permute.xlu1 %6273 }
 0xe98   :  { %v6280_v60 = vunpack.i.l.bf16 %v6279_v52  ;;  %v6281_v61 = vunpack.i.h.bf16 %v6279_v52  ;;  %v6275_v8 = vunpack.i.l.bf16 %v7712_v18  ;;  %v6276_v21 = vunpack.i.h.bf16 %v7712_v18  ;;  %v3962_v52 = vld [vmem:[%s8440_s10 + $0x120] sm:$0xff]  ;;  %v3553_v18 = vld [vmem:[%s8440_s10 + $0x28] sm:$0xff] }
 0xe99   :  { %5859 = vmatmul.msk.f32.gmra.mxu2 %vm3628_vm2, %v3553_v18 }
 0xe9f   :  { %v6299_v55 = vpop.permute.xlu2 %6298  ;;  %v6254_v58 = vpop.permute.xlu0 %6253 }
 0xea0   :  { %v6300_v25 = vunpack.i.l.bf16 %v6299_v55  ;;  %v6301_v16 = vunpack.i.h.bf16 %v6299_v55  ;;  %v6255_v20 = vunpack.i.l.bf16 %v6254_v58  ;;  %v6256_v24 = vunpack.i.h.bf16 %v6254_v58  ;;  %v3561_v58 = vld [vmem:[%s8440_s10 + $0x68] sm:$0xff] }
 0xea2   :  { %4054 = vmatpush.msra.mxu0 %v6300_v25 }
 0xea4   :  { %4055 = vmatpush.msra.mxu0 %v6301_v16  ;;  %v3560_v16 = vld [vmem:[%s8440_s10 + $0x60] sm:$0xff] }
 0xea6   :  { %4056 = vmatpush.msra.mxu0 %v6260_v56  ;;  %v3808_v56 = vld [vmem:[%s8440_s10 + $0xc8] sm:$0xff] }
 0xea7   :  { %v6304_v59 = vpop.permute.xlu2 %6303 }
 0xea8   :  { %4057 = vmatpush.msra.mxu0 %v6261_v57  ;;  %v6305_v62 = vunpack.i.l.bf16 %v6304_v59  ;;  %v6306_v63 = vunpack.i.h.bf16 %v6304_v59  ;;  %v3963_v57 = vld [vmem:[%s8440_s10 + $0x128] sm:$0xff]  ;;  %v3809_v59 = vld [vmem:[%s8440_s10 + $0xd0] sm:$0xff] }
 0xeaa   :  { %4058 = vmatpush.msra.mxu0 %v6280_v60  ;;  %v3964_v60 = vld [vmem:[%s8440_s10 + $0x130] sm:$0xff] }
 0xeac   :  { %4059 = vmatpush.msra.mxu0 %v6281_v61  ;;  %v3554_v61 = vld [vmem:[%s8440_s10 + $0x30] sm:$0xff] }
 0xead   :  { %5860 = vmatmul.msk.f32.gmra.mxu2 %vm3628_vm2, %v3554_v61 }
 0xeae   :  { %4060 = vmatpush.msra.mxu0 %v6305_v62  ;;  %v3562_v62 = vld [vmem:[%s8440_s10 + $0x70] sm:$0xff] }
 0xeaf   :  { %v6289_v0 = vpop.permute.xlu1 %6288  ;;  %v6319_v3 = vpop.permute.xlu2 %6318 }
 0xeb0   :  { %v6290_v5 = vunpack.i.l.bf16 %v6289_v0  ;;  %v6264_v7 = vpop.permute.xlu0 %6263  ;;  %v6320_v11 = vunpack.i.l.bf16 %v6319_v3  ;;  %4061 = vmatpush.msra.mxu0 %v6306_v63  ;;  %v6291_v13 = vunpack.i.h.bf16 %v6289_v0  ;;  %v6321_v14 = vunpack.i.h.bf16 %v6319_v3  ;;  %v3810_v63 = vld [vmem:[%s8440_s10 + $0xd8] sm:$0xff] }
 0xeb1   :  { %v6265_v12 = vunpack.i.l.bf16 %v6264_v7  ;;  %v6266_v15 = vunpack.i.h.bf16 %v6264_v7  ;;  %v3965_v0 = vld [vmem:[%s8440_s10 + $0x138] sm:$0xff]  ;;  %v3966_v7 = vld [vmem:[%s8440_s10 + $0x140] sm:$0xff] }
 0xeb2   :  { %3667 = vmatpush.msra.mxu1 %v6290_v5  ;;  %4062 = vmatpush.msra.mxu0 %v6320_v11  ;;  %v3563_v3 = vld [vmem:[%s8440_s10 + $0x78] sm:$0xff]  ;;  %v3811_v5 = vld [vmem:[%s8440_s10 + $0xe0] sm:$0xff] }
 0xeb3   :  { %3899 = vmatpush.msrb.mxu3 %v6265_v12  ;;  %v3556_v11 = vld [vmem:[%s8440_s10 + $0x40] sm:$0xff] }
 0xeb4   :  { %3668 = vmatpush.msra.mxu1 %v6291_v13  ;;  %4063 = vmatpush.msra.mxu0 %v6321_v14  ;;  %v3564_v12 = vld [vmem:[%s8440_s10 + $0x80] sm:$0xff]  ;;  %v3812_v13 = vld [vmem:[%s8440_s10 + $0xe8] sm:$0xff] }
 0xeb5   :  { %3900 = vmatpush.msrb.mxu3 %v6266_v15  ;;  %5861 = vmatmul.msk.f32.gmra.mxu2 %vm3628_vm2, %v3555_v2  ;;  %v3967_v14 = vld [vmem:[%s8440_s10 + $0x148] sm:$0xff] }
 0xeb6   :  { %3669 = vmatpush.msra.mxu1 %v6255_v20  ;;  %v3557_v15 = vld [vmem:[%s8440_s10 + $0x48] sm:$0xff] }
 0xeb7   :  { %3901 = vmatpush.msrb.mxu3 %v6250_v22  ;;  %v6294_v30 = vpop.permute.xlu1 %6293  ;;  %v6334_v50 = vpop.permute.xlu2 %6333  ;;  %v3565_v20 = vld [vmem:[%s8440_s10 + $0x88] sm:$0xff]  ;;  %v3813_v22 = vld [vmem:[%s8440_s10 + $0xf0] sm:$0xff] }
 0xeb8   :  { %v6269_v33 = vpop.permute.xlu0 %6268  ;;  %3670 = vmatpush.msra.mxu1 %v6256_v24  ;;  %v6295_v44 = vunpack.i.l.bf16 %v6294_v30  ;;  %v6296_v47 = vunpack.i.h.bf16 %v6294_v30  ;;  %v6335_v51 = vunpack.i.l.bf16 %v6334_v50  ;;  %v6336_v28 = vunpack.i.h.bf16 %v6334_v50  ;;  %v3968_v24 = vld [vmem:[%s8440_s10 + $0x150] sm:$0xff]  ;;  %v3814_v30 = vld [vmem:[%s8440_s10 + $0xf8] sm:$0xff]  ;;  %v4153_v50 = vld [vmem:[%s8441_s11] sm:$0xff] }
 0xeb9   :  { %3902 = vmatpush.msrb.mxu3 %v6251_v17  ;;  %v6270_v19 = vunpack.i.l.bf16 %v6269_v33  ;;  %v6271_v40 = vunpack.i.h.bf16 %v6269_v33  ;;  %v3566_v17 = vld [vmem:[%s8440_s10 + $0x90] sm:$0xff]  ;;  %v3559_v33 = vld [vmem:[%s8440_s10 + $0x58] sm:$0xff] }
 0xeba   :  { %3671 = vmatpush.msra.mxu1 %v6245_v31  ;;  %v3969_v31 = vld [vmem:[%s8440_s10 + $0x158] sm:$0xff] }
 0xebb   :  { %3903 = vmatpush.msrb.mxu3 %v6240_v35  ;;  %v3567_v35 = vld [vmem:[%s8440_s10 + $0x98] sm:$0xff] }
 0xebc   :  { %3672 = vmatpush.msra.mxu1 %v6246_v36  ;;  %v3815_v36 = vld [vmem:[%s8440_s10 + $0x100] sm:$0xff] }
 0xebd   :  { %3904 = vmatpush.msrb.mxu3 %v6241_v38  ;;  %5862 = vmatmul.msk.f32.gmra.mxu2 %vm3628_vm2, %v3556_v11  ;;  %v3970_v38 = vld [vmem:[%s8440_s10 + $0x160] sm:$0xff] }
 0xebe   :  { %3673 = vmatpush.msra.mxu1 %v6270_v19  ;;  %v3568_v19 = vld [vmem:[%s8440_s10 + $0xa0] sm:$0xff] }
 0xebf   :  { %3905 = vmatpush.msrb.mxu3 %v6235_v39  ;;  %v6314_v43 = vpop.permute.xlu1 %6313  ;;  %v3816_v39 = vld [vmem:[%s8440_s10 + $0x108] sm:$0xff] }
 0xec0   :  { %v6284_v1 = vpop.permute.xlu0 %6283  ;;  %3674 = vmatpush.msra.mxu1 %v6271_v40  ;;  %v6315_v23 = vunpack.i.l.bf16 %v6314_v43  ;;  %v6316_v9 = vunpack.i.h.bf16 %v6314_v43  ;;  %v3971_v40 = vld [vmem:[%s8440_s10 + $0x168] sm:$0xff]  ;;  %v3972_v43 = vld [vmem:[%s8440_s10 + $0x170] sm:$0xff] }
 0xec1   :  { %v6285_v10 = vunpack.i.l.bf16 %v6284_v1  ;;  %3906 = vmatpush.msrb.mxu3 %v6236_v42  ;;  %v6286_v45 = vunpack.i.h.bf16 %v6284_v1  ;;  %v3817_v42 = vld [vmem:[%s8440_s10 + $0x110] sm:$0xff] }
 0xec2   :  { %v3570_v1 = vld [vmem:[%s8440_s10 + $0xb0] sm:$0xff] }
 0xec3   :  { %3675 = vmatpush.msra.mxu1 %v6285_v10  ;;  %3907 = vmatpush.msrb.mxu3 %v6275_v8  ;;  %v3818_v8 = vld [vmem:[%s8440_s10 + $0x118] sm:$0xff] }
 0xec4   :  { %v3973_v10 = vld [vmem:[%s8440_s10 + $0x178] sm:$0xff] }
 0xec5   :  { %3676 = vmatpush.msra.mxu1 %v6286_v45  ;;  %3908 = vmatpush.msrb.mxu3 %v6276_v21  ;;  %v3571_v21 = vld [vmem:[%s8440_s10 + $0xb8] sm:$0xff]  ;;  %v4159_v45 = vld [vmem:[%s8441_s11 + $0x30] sm:$0x1] }
 0xec6   :  { %5863 = vmatmul.msk.f32.gmra.mxu2 %vm3628_vm2, %v3557_v15 }
 0xec7   :  { %3909 = vmatpush.msrb.mxu3 %v6295_v44  ;;  %v6329_v48 = vpop.permute.xlu1 %6328  ;;  %v4160_v44 = vld [vmem:[%s8441_s11 + $0x38] sm:$0x1] }
 0xec8   :  { %v6330_v4 = vunpack.i.l.bf16 %v6329_v48  ;;  %v6309_v49 = vpop.permute.xlu0 %6308  ;;  %v6331_v32 = vunpack.i.h.bf16 %v6329_v48  ;;  %5903 = vmatpush.msk.msra.mxu2 %vm1328_vm7, %v4160_v44  ;;  %v4155_v48 = vld [vmem:[%s8441_s11 + $0x10] sm:$0xff] }
 0xec9   :  { %v6310_v29 = vunpack.i.l.bf16 %v6309_v49  ;;  %3910 = vmatpush.msrb.mxu3 %v6296_v47  ;;  %v6311_v27 = vunpack.i.h.bf16 %v6309_v49  ;;  %v4158_v47 = vld [vmem:[%s8441_s11 + $0x28] sm:$0xff] }
 0xeca   :  { %4064 = vmatpush.msra.mxu0 %v6330_v4  ;;  %4269 = vmatpush.msra.mxu2 %v4158_v47  ;;  %v4156_v4 = vld [vmem:[%s8441_s11 + $0x18] sm:$0xff] }
 0xecb   :  { %3677 = vmatpush.msra.mxu1 %v6310_v29  ;;  %3911 = vmatpush.msrb.mxu3 %v6315_v23  ;;  %v4154_v23 = vld [vmem:[%s8441_s11 + $0x8] sm:$0xff] }
 0xecc   :  { %4065 = vmatpush.msra.mxu0 %v6331_v32  ;;  %4270 = vmatpush.msra.mxu2 %v4156_v4 }
 0xecd   :  { %3678 = vmatpush.msra.mxu1 %v6311_v27  ;;  %3912 = vmatpush.msrb.mxu3 %v6316_v9 }
 0xece   :  { %4066 = vmatpush.msra.mxu0 %v6335_v51  ;;  %5866 = vmatmul.msk.f32.vlgmr.msrb.gmra.mxu3 %vm3628_vm2, %v3807_v34 }
 0xecf   :  { %5864 = vmatmul.msk.f32.gmra.mxu2 %vm3628_vm2, %v3558_v26 }
 0xed0   :  { %v6324_v54 = vpop.permute.xlu0 %6323  ;;  %4067 = vmatpush.msra.mxu0 %v6336_v28  ;;  %4271 = vmatpush.msra.mxu2 %v4154_v23 }
 0xed1   :  { %v6325_v55 = vunpack.i.l.bf16 %v6324_v54  ;;  %5878 = vmatmul.msk.f32.vlgmr.msra.gmra.mxu0 %vm3628_vm2, %v3962_v52  ;;  %v6326_v25 = vunpack.i.h.bf16 %v6324_v54 }
 0xed3   :  { %3679 = vmatpush.msra.mxu1 %v6325_v55 }
 0xed5   :  { %3680 = vmatpush.msra.mxu1 %v6326_v25 }
 0xed6   :  { %5842 = vmatmul.msk.f32.vlgmr.msra.gmra.mxu1 %vm3628_vm2, %v3560_v16  ;;  %5867 = vmatmul.msk.f32.gmra.mxu3 %vm3628_vm2, %v3808_v56 }
 0xed7   :  { %5865 = vmatmul.msk.f32.gmra.mxu2 %vm3628_vm2, %v3559_v33  ;;  %5890 = vmatpush.msk.msrb.mxu1 %vm1328_vm7, %v4159_v45  ;;  %vm2722_vm7 = vcmask 33792  }
 0xed9   :  { %5879 = vmatmul.msk.f32.gmra.mxu0 %vm3628_vm2, %v3963_v57  ;;  %4216 = vmatpush.msrb.mxu1 %v4157_v46 }
 0xeda   :  { %v3771_v49 = vpop.f32.mrf.mxu2 }
 0xedb   :  { %4217 = vmatpush.msrb.mxu1 %v4155_v48  ;;  %v4122_v48 = vld [vmem:[%s8442_s9 + $0x28] sm:$0xff] }
 0xedd   :  { %4218 = vmatpush.msrb.mxu1 %v4153_v50 }
 0xede   :  { %5843 = vmatmul.msk.f32.gmra.mxu1 %vm3628_vm2, %v3561_v58  ;;  %5868 = vmatmul.msk.f32.gmra.mxu3 %vm3628_vm2, %v3809_v59 }
 0xee1   :  { %5880 = vmatmul.msk.f32.gmra.mxu0 %vm3628_vm2, %v3964_v60  ;;  %v4118_v60 = vld [vmem:[%s8442_s9 + $0x8] sm:$0xff] }
 0xee2   :  { %v3774_v29 = vpop.f32.mrf.mxu2 }
 0xee6   :  { %5844 = vmatmul.msk.f32.gmra.mxu1 %vm3628_vm2, %v3562_v62  ;;  %5869 = vmatmul.msk.f32.gmra.mxu3 %vm3628_vm2, %v3810_v63 }
 0xee9   :  { %5881 = vmatmul.msk.f32.gmra.mxu0 %vm3628_vm2, %v3965_v0 }
 0xeea   :  { %v3777_v9 = vpop.f32.mrf.mxu2 }
 0xeee   :  { %5845 = vmatmul.msk.f32.gmra.mxu1 %vm3628_vm2, %v3563_v3  ;;  %5870 = vmatmul.msk.f32.gmra.mxu3 %vm3628_vm2, %v3811_v5 }
 0xef1   :  { %5882 = vmatmul.msk.f32.gmra.mxu0 %vm3628_vm2, %v3966_v7 }
 0xef2   :  { %v3780_v25 = vpop.f32.mrf.mxu2 }
 0xef6   :  { %5846 = vmatmul.msk.f32.gmra.mxu1 %vm3628_vm2, %v3564_v12  ;;  %5871 = vmatmul.msk.f32.gmra.mxu3 %vm3628_vm2, %v3812_v13  ;;  %v4119_v12 = vld [vmem:[%s8442_s9 + $0x10] sm:$0xff] }
 0xef9   :  { %5883 = vmatmul.msk.f32.gmra.mxu0 %vm3628_vm2, %v3967_v14 }
 0xefe   :  { %5847 = vmatmul.msk.f32.gmra.mxu1 %vm3628_vm2, %v3565_v20  ;;  %5872 = vmatmul.msk.f32.gmra.mxu3 %vm3628_vm2, %v3813_v22 }
 0xf01   :  { %5884 = vmatmul.msk.f32.gmra.mxu0 %vm3628_vm2, %v3968_v24 }
 0xf06   :  { %5848 = vmatmul.msk.f32.gmra.mxu1 %vm3628_vm2, %v3566_v17  ;;  %5873 = vmatmul.msk.f32.gmra.mxu3 %vm3628_vm2, %v3814_v30 }
 0xf09   :  { %5885 = vmatmul.msk.f32.gmra.mxu0 %vm3628_vm2, %v3969_v31  ;;  %v4120_v31 = vld [vmem:[%s8442_s9 + $0x18] sm:$0xff] }
 0xf0e   :  { %5849 = vmatmul.msk.f32.gmra.mxu1 %vm3628_vm2, %v3567_v35  ;;  %5874 = vmatmul.msk.f32.gmra.mxu3 %vm3628_vm2, %v3815_v36 }
 0xf11   :  { %5886 = vmatmul.msk.f32.gmra.mxu0 %vm3628_vm2, %v3970_v38 }
 0xf14   :  { %v3783_v2 = vpop.f32.mrf.mxu2 }
 0xf16   :  { %5850 = vmatmul.msk.f32.gmra.mxu1 %vm3628_vm2, %v3568_v19  ;;  %5875 = vmatmul.msk.f32.gmra.mxu3 %vm3628_vm2, %v3816_v39 }
 0xf19   :  { %5887 = vmatmul.msk.f32.gmra.mxu0 %vm3628_vm2, %v3971_v40 }
 0xf1c   :  { %v3786_v26 = vpop.f32.mrf.mxu2 }
 0xf1e   :  { %5851 = vmatmul.msk.f32.gmra.mxu1 %vm3628_vm2, %v3569_v41  ;;  %5876 = vmatmul.msk.f32.gmra.mxu3 %vm3628_vm2, %v3817_v42  ;;  %v4121_v42 = vld [vmem:[%s8442_s9 + $0x20] sm:$0xff] }
 0xf21   :  { %5888 = vmatmul.msk.f32.gmra.mxu0 %vm3628_vm2, %v3972_v43 }
 0xf26   :  { %5852 = vmatmul.msk.f32.gmra.mxu1 %vm3628_vm2, %v3570_v1  ;;  %5877 = vmatmul.msk.f32.gmra.mxu3 %vm3628_vm2, %v3818_v8 }
 0xf29   :  { %5889 = vmatmul.msk.f32.gmra.mxu0 %vm3628_vm2, %v3973_v10 }
 0xf2e   :  { %5853 = vmatmul.msk.f32.gmra.mxu1 %vm3628_vm2, %v3571_v21 }
 0xf30   :  { %v3789_v43 = vpop.f32.mrf.mxu2 }
 0xf38   :  { %v3792_v50 = vpop.f32.mrf.mxu2 }
 0xf4e   :  { %v4069_v32 = vpop.f32.mrf.mxu0 }
 0xf51   :  { %v3914_v27 = vpop.f32.mrf.mxu3 }
 0xf53   :  { %v3682_v34 = vpop.f32.mrf.mxu1 }
 0xf54   :  { %v3772_v51 = vadd.f32 %v3771_v49, %v3682_v34 }
 0xf56   :  { %v3950_v28 = vadd.f32 %v3914_v27, %v3772_v51  ;;  %v4072_v52 = vpop.f32.mrf.mxu0  ;;  %v4123_v51 = vld [vmem:[%s8442_s9 + $0x30] sm:$0xff] }
 0xf58   :  { %v4105_v54 = vadd.f32 %v4069_v32, %v3950_v28 }
 0xf59   :  { %v3917_v55 = vpop.f32.mrf.mxu3 }
 0xf5a   :  { %v4129_v16 = vadd.f32 %v4117_v53, %v4105_v54 }
 0xf5b   :  { %v3685_v56 = vpop.f32.mrf.mxu1 }
 0xf5c   :  { %v4141_v57 = vmax.f32 %v4129_v16, 0.0  ;;  %v3775_v18 = vadd.f32 %v3774_v29, %v3685_v56 }
 0xf5e   :  { %v3951_v58 = vadd.f32 %v3917_v55, %v3775_v18  ;;  %5891 = vmatmul.msk.f32.vlgmr.msrb.gmra.mxu1 %vm1291_vm8, %v4141_v57  ;;  %5904 = vmatmul.msk.f32.vlgmr.msra.gmra.mxu2 %vm1291_vm8, %v4141_v57  ;;  %v4075_v59 = vpop.f32.mrf.mxu0  ;;  %v3795_v55 = vpop.f32.mrf.mxu2  ;;  %v4124_v57 = vld [vmem:[%s8442_s9 + $0x38] sm:$0xff] }
 0xf60   :  { %v4106_v61 = vadd.f32 %v4072_v52, %v3951_v58 }
 0xf61   :  { %v3920_v62 = vpop.f32.mrf.mxu3 }
 0xf62   :  { %v4130_v63 = vadd.f32 %v4118_v60, %v4106_v61 }
 0xf63   :  { %v3688_v0 = vpop.f32.mrf.mxu1 }
 0xf64   :  { %v4142_v3 = vmax.f32 %v4130_v63, 0.0  ;;  %v3778_v5 = vadd.f32 %v3777_v9, %v3688_v0 }
 0xf66   :  { %v3952_v7 = vadd.f32 %v3920_v62, %v3778_v5  ;;  %5892 = vmatmul.msk.f32.gmra.mxu1 %vm1291_vm8, %v4142_v3  ;;  %5905 = vmatmul.msk.f32.gmra.mxu2 %vm1291_vm8, %v4142_v3  ;;  %v4078_v11 = vpop.f32.mrf.mxu0  ;;  %v3798_v0 = vpop.f32.mrf.mxu2  ;;  %v4125_v3 = vld [vmem:[%s8442_s9 + $0x40] sm:$0xff] }
 0xf68   :  { %v4107_v13 = vadd.f32 %v4075_v59, %v3952_v7 }
 0xf69   :  { %v3923_v14 = vpop.f32.mrf.mxu3 }
 0xf6a   :  { %v4131_v15 = vadd.f32 %v4119_v12, %v4107_v13 }
 0xf6b   :  { %v3691_v20 = vpop.f32.mrf.mxu1 }
 0xf6c   :  { %v4143_v22 = vmax.f32 %v4131_v15, 0.0  ;;  %v3781_v24 = vadd.f32 %v3780_v25, %v3691_v20 }
 0xf6e   :  { %v3953_v17 = vadd.f32 %v3923_v14, %v3781_v24  ;;  %5893 = vmatmul.msk.f32.gmra.mxu1 %vm1291_vm8, %v4143_v22  ;;  %5906 = vmatmul.msk.f32.gmra.mxu2 %vm1291_vm8, %v4143_v22  ;;  %v4081_v30 = vpop.f32.mrf.mxu0  ;;  %v4126_v22 = vld [vmem:[%s8442_s9 + $0x48] sm:$0xff]  ;;  %v3801_v24 = vpop.f32.mrf.mxu2 }
 0xf70   :  { %v4108_v33 = vadd.f32 %v4078_v11, %v3953_v17 }
 0xf71   :  { %v3926_v35 = vpop.f32.mrf.mxu3 }
 0xf72   :  { %v4132_v36 = vadd.f32 %v4120_v31, %v4108_v33 }
 0xf73   :  { %v3694_v38 = vpop.f32.mrf.mxu1 }
 0xf74   :  { %v4144_v19 = vmax.f32 %v4132_v36, 0.0  ;;  %v3784_v39 = vadd.f32 %v3783_v2, %v3694_v38 }
 0xf76   :  { %v3954_v40 = vadd.f32 %v3926_v35, %v3784_v39  ;;  %5894 = vmatmul.msk.f32.gmra.mxu1 %vm1291_vm8, %v4144_v19  ;;  %5907 = vmatmul.msk.f32.gmra.mxu2 %vm1291_vm8, %v4144_v19  ;;  %v4084_v41 = vpop.f32.mrf.mxu0  ;;  %v4127_v19 = vld [vmem:[%s8442_s9 + $0x50] sm:$0xff] }
 0xf78   :  { %v4109_v1 = vadd.f32 %v4081_v30, %v3954_v40  ;;  %v3804_v40 = vpop.f32.mrf.mxu2 }
 0xf79   :  { %v3929_v8 = vpop.f32.mrf.mxu3 }
 0xf7a   :  { %v4133_v10 = vadd.f32 %v4121_v42, %v4109_v1 }
 0xf7b   :  { %v3697_v21 = vpop.f32.mrf.mxu1 }
 0xf7c   :  { %v4145_v45 = vmax.f32 %v4133_v10, 0.0  ;;  %v3787_v44 = vadd.f32 %v3786_v26, %v3697_v21 }
 0xf7e   :  { %v3955_v46 = vadd.f32 %v3929_v8, %v3787_v44  ;;  %5895 = vmatmul.msk.f32.gmra.mxu1 %vm1291_vm8, %v4145_v45  ;;  %5908 = vmatmul.msk.f32.gmra.mxu2 %vm1291_vm8, %v4145_v45  ;;  %v4087_v47 = vpop.f32.mrf.mxu0  ;;  %v4128_v45 = vld [vmem:[%s8442_s9 + $0x58] sm:$0xff] }
 0xf80   :  { %v4110_v4 = vadd.f32 %v4084_v41, %v3955_v46 }
 0xf81   :  { %v3932_v49 = vpop.f32.mrf.mxu3 }
 0xf82   :  { %v4134_v23 = vadd.f32 %v4122_v48, %v4110_v4 }
 0xf83   :  { %v3700_v29 = vpop.f32.mrf.mxu1 }
 0xf84   :  { %v4146_v32 = vmax.f32 %v4134_v23, 0.0  ;;  %v3790_v9 = vadd.f32 %v3789_v43, %v3700_v29 }
 0xf86   :  { %v3956_v27 = vadd.f32 %v3932_v49, %v3790_v9  ;;  %5896 = vmatmul.msk.f32.gmra.mxu1 %vm1291_vm8, %v4146_v32  ;;  %5909 = vmatmul.msk.f32.gmra.mxu2 %vm1291_vm8, %v4146_v32  ;;  %v4090_v34 = vpop.f32.mrf.mxu0 }
 0xf88   :  { %v4111_v28 = vadd.f32 %v4087_v47, %v3956_v27 }
 0xf89   :  { %v3935_v52 = vpop.f32.mrf.mxu3 }
 0xf8a   :  { %v4135_v53 = vadd.f32 %v4123_v51, %v4111_v28 }
 0xf8b   :  { %v3703_v54 = vpop.f32.mrf.mxu1 }
 0xf8c   :  { %v4147_v25 = vmax.f32 %v4135_v53, 0.0  ;;  %v3793_v16 = vadd.f32 %v3792_v50, %v3703_v54 }
 0xf8e   :  { %v3957_v56 = vadd.f32 %v3935_v52, %v3793_v16  ;;  %5897 = vmatmul.msk.f32.gmra.mxu1 %vm1291_vm8, %v4147_v25  ;;  %5910 = vmatmul.msk.f32.gmra.mxu2 %vm1291_vm8, %v4147_v25  ;;  %v4093_v18 = vpop.f32.mrf.mxu0 }
 0xf90   :  { %v4112_v58 = vadd.f32 %v4090_v34, %v3957_v56 }
 0xf91   :  { %v3938_v59 = vpop.f32.mrf.mxu3 }
 0xf92   :  { %v4136_v60 = vadd.f32 %v4124_v57, %v4112_v58 }
 0xf93   :  { %v3706_v61 = vpop.f32.mrf.mxu1 }
 0xf94   :  { %v4148_v62 = vmax.f32 %v4136_v60, 0.0  ;;  %v3796_v63 = vadd.f32 %v3795_v55, %v3706_v61 }
 0xf96   :  { %v3958_v2 = vadd.f32 %v3938_v59, %v3796_v63  ;;  %5898 = vmatmul.msk.f32.gmra.mxu1 %vm1291_vm8, %v4148_v62  ;;  %5911 = vmatmul.msk.f32.gmra.mxu2 %vm1291_vm8, %v4148_v62  ;;  %v4096_v11 = vpop.f32.mrf.mxu0 }
 0xf98   :  { %v4113_v5 = vadd.f32 %v4093_v18, %v3958_v2 }
 0xf99   :  { %v3941_v7 = vpop.f32.mrf.mxu3 }
 0xf9a   :  { %v4137_v12 = vadd.f32 %v4125_v3, %v4113_v5 }
 0xf9b   :  { %v3709_v13 = vpop.f32.mrf.mxu1 }
 0xf9c   :  { %v4149_v14 = vmax.f32 %v4137_v12, 0.0  ;;  %v3799_v15 = vadd.f32 %v3798_v0, %v3709_v13 }
 0xf9e   :  { %v3959_v20 = vadd.f32 %v3941_v7, %v3799_v15  ;;  %5899 = vmatmul.msk.f32.gmra.mxu1 %vm1291_vm8, %v4149_v14  ;;  %5912 = vmatmul.msk.f32.gmra.mxu2 %vm1291_vm8, %v4149_v14  ;;  %v4099_v33 = vpop.f32.mrf.mxu0 }
 0xfa0   :  { %v4114_v26 = vadd.f32 %v4096_v11, %v3959_v20 }
 0xfa1   :  { %v3944_v17 = vpop.f32.mrf.mxu3 }
 0xfa2   :  { %v4138_v30 = vadd.f32 %v4126_v22, %v4114_v26 }
 0xfa3   :  { %v3712_v31 = vpop.f32.mrf.mxu1 }
 0xfa4   :  { %v4150_v35 = vmax.f32 %v4138_v30, 0.0  ;;  %v3802_v36 = vadd.f32 %v3801_v24, %v3712_v31 }
 0xfa6   :  { %v3960_v38 = vadd.f32 %v3944_v17, %v3802_v36  ;;  %5900 = vmatmul.msk.f32.gmra.mxu1 %vm1291_vm8, %v4150_v35  ;;  %5913 = vmatmul.msk.f32.gmra.mxu2 %vm1291_vm8, %v4150_v35  ;;  %v4102_v10 = vpop.f32.mrf.mxu0 }
 0xfa8   :  { %v4115_v39 = vadd.f32 %v4099_v33, %v3960_v38 }
 0xfa9   :  { %v3947_v43 = vpop.f32.mrf.mxu3 }
 0xfaa   :  { %v4139_v41 = vadd.f32 %v4127_v19, %v4115_v39 }
 0xfab   :  { %v3715_v42 = vpop.f32.mrf.mxu1 }
 0xfac   :  { %v4151_v1 = vmax.f32 %v4139_v41, 0.0  ;;  %v3805_v8 = vadd.f32 %v3804_v40, %v3715_v42 }
 0xfae   :  { %v3961_v21 = vadd.f32 %v3947_v43, %v3805_v8  ;;  %5901 = vmatmul.msk.f32.gmra.mxu1 %vm1291_vm8, %v4151_v1  ;;  %5914 = vmatmul.msk.f32.gmra.mxu2 %vm1291_vm8, %v4151_v1 }
 0xfb0   :  { %v4116_v44 = vadd.f32 %v4102_v10, %v3961_v21 }
 0xfb2   :  { %v4140_v46 = vadd.f32 %v4128_v45, %v4116_v44 }
 0xfb4   :  { %v4152_v47 = vmax.f32 %v4140_v46, 0.0 }
 0xfb6   :  { %5902 = vmatmul.msk.f32.gmra.mxu1 %vm1291_vm8, %v4152_v47  ;;  %5915 = vmatmul.msk.f32.gmra.mxu2 %vm1291_vm8, %v4152_v47 }
 0xfdb   :  { %v7860_v48 = vpop.f32.mrf.mxu1 }
 0xfe1   :  { %v7862_v4 = vpop.f32.mrf.mxu2 }
 0xfe2   :  { %v6442_v38 = vpack.i.bf16 %v7862_v4, %v7860_v48 }
 0xfe3   :  { %v7864_v49 = vpop.f32.mrf.mxu1 }
 0xfe4   :  { %v6362_v58 = vpack.i.bf16 %v7860_v48, %v7864_v49 }
 0xfe9   :  { %v7866_v50 = vpop.f32.mrf.mxu2 }
 0xfea   :  { %v6452_v23 = vpack.i.bf16 %v7862_v4, %v7866_v50  ;;  %v6432_v31 = vpack.i.bf16 %v7866_v50, %v7864_v49 }
 0xfeb   :  { %v7870_v29 = vpop.f32.mrf.mxu1 }
 0xff1   :  { %v7872_v32 = vpop.f32.mrf.mxu2 }
 0xff2   :  { %v6427_v36 = vpack.i.bf16 %v7872_v32, %v7870_v29 }
 0xff3   :  { %v7874_v9 = vpop.f32.mrf.mxu1 }
 0xff4   :  { %v6357_v2 = vpack.i.bf16 %v7870_v29, %v7874_v9 }
 0xff9   :  { %v7876_v27 = vpop.f32.mrf.mxu2 }
 0xffa   :  { %v6447_v34 = vpack.i.bf16 %v7872_v32, %v7876_v27  ;;  %v6412_v17 = vpack.i.bf16 %v7876_v27, %v7874_v9 }
 0xffb   :  { %v7880_v51 = vpop.f32.mrf.mxu1 }
0x1001   :  { %v7882_v28 = vpop.f32.mrf.mxu2 }
0x1002   :  { %v6407_v35 = vpack.i.bf16 %v7882_v28, %v7880_v51 }
0x1003   :  { %v4235_v52 = vpop.f32.mrf.mxu1 }
0x1004   :  { %v6352_v15 = vpack.i.bf16 %v7880_v51, %v4235_v52 }
0x1009   :  { %v4288_v53 = vpop.f32.mrf.mxu2 }
0x100a   :  { %v6437_v54 = vpack.i.bf16 %v7882_v28, %v4288_v53  ;;  %v6392_v24 = vpack.i.bf16 %v4288_v53, %v4235_v52 }
0x100b   :  { %v4238_v55 = vpop.f32.mrf.mxu1 }
0x1011   :  { %v4291_v25 = vpop.f32.mrf.mxu2 }
0x1012   :  { %v6387_v30 = vpack.i.bf16 %v4291_v25, %v4238_v55 }
0x1013   :  { %v4241_v16 = vpop.f32.mrf.mxu1 }
0x1014   :  { %v6347_v56 = vpack.i.bf16 %v4238_v55, %v4241_v16 }
0x1016   :  { %6348 = vrot.lane.b32.xlu2 %v6347_v56, %s6730_s0 }
0x1019   :  { %v4294_v57 = vpop.f32.mrf.mxu2 }
0x101a   :  { %v6382_v20 = vpack.i.bf16 %v4294_v57, %v4241_v16  ;;  %v6422_v22 = vpack.i.bf16 %v4291_v25, %v4294_v57 }
0x101b   :  { %v4244_v18 = vpop.f32.mrf.mxu1 }
0x101e   :  { %6363 = vrot.lane.b32.xlu2 %v6362_v58, %s6730_s0 }
0x1021   :  { %v4297_v59 = vpop.f32.mrf.mxu2 }
0x1022   :  { %v6377_v26 = vpack.i.bf16 %v4297_v59, %v4244_v18 }
0x1023   :  { %v4247_v60 = vpop.f32.mrf.mxu1 }
0x1024   :  { %v6342_v61 = vpack.i.bf16 %v4244_v18, %v4247_v60 }
0x1026   :  { %6343 = vrot.lane.b32.xlu1 %v6342_v61, %s6730_s0 }
0x1029   :  { %v4300_v62 = vpop.f32.mrf.mxu2 }
0x102a   :  { %v6372_v63 = vpack.i.bf16 %v4300_v62, %v4247_v60  ;;  %v6397_v5 = vpack.i.bf16 %v4297_v59, %v4300_v62 }
0x102b   :  { %v4250_v0 = vpop.f32.mrf.mxu1 }
0x102c   :  { %6373 = vrot.lane.b32.xlu2 %v6372_v63, %s6732_s5 }
0x102e   :  { %6358 = vrot.lane.b32.xlu1 %v6357_v2, %s6730_s0 }
0x1031   :  { %v4303_v3 = vpop.f32.mrf.mxu2 }
0x1032   :  { %v6367_v11 = vpack.i.bf16 %v4303_v3, %v4250_v0 }
0x1033   :  { %v4253_v7 = vpop.f32.mrf.mxu1 }
0x1034   :  { %v6337_v12 = vpack.i.bf16 %v4250_v0, %v4253_v7  ;;  %6398 = vrot.lane.b32.xlu2 %v6397_v5, %s6731_s13  ;;  %4488 = vmatpush.msrb.mxu0 %v4253_v7 }
0x1036   :  { %6368 = vrot.lane.b32.xlu1 %v6367_v11, %s6732_s5  ;;  %6338 = vrot.lane.b32.xlu0 %v6337_v12, %s6730_s0 }
0x1037   :  { %4489 = vmatpush.msrb.mxu0 %v4250_v0 }
0x1039   :  { %4490 = vmatpush.msrb.mxu0 %v4247_v60  ;;  %v4306_v13 = vpop.f32.mrf.mxu2 }
0x103a   :  { %v6417_v14 = vpack.i.bf16 %v4303_v3, %v4306_v13  ;;  %v6402_v33 = vpack.i.bf16 %v4306_v13, %v4253_v7 }
0x103b   :  { %4491 = vmatpush.msrb.mxu0 %v4244_v18 }
0x103c   :  { %6418 = vrot.lane.b32.xlu2 %v6417_v14, %s6731_s13 }
0x103d   :  { %4492 = vmatpush.msrb.mxu0 %v4241_v16 }
0x103e   :  { %6383 = vrot.lane.b32.xlu1 %v6382_v20, %s6732_s5  ;;  %6353 = vrot.lane.b32.xlu0 %v6352_v15, %s6730_s0  ;;  %s8443_s0 = sld [smem:[#allocation21_spill]] }
0x103f   :  { %4493 = vmatpush.msrb.mxu0 %v4238_v55 }
0x1041   :  { %4494 = vmatpush.msrb.mxu0 %v4235_v52 }
0x1043   :  { %4495 = vmatpush.msrb.mxu0 %v7880_v51 }
0x1044   :  { %6423 = vrot.lane.b32.xlu2 %v6422_v22, %s6731_s13  ;;  %v4310_v52 = vld [vmem:[%s8443_s0 + $0x8] sm:$0xff]  ;;  %v4311_v57 = vld [vmem:[%s8443_s0 + $0x10] sm:$0xff]  ;;  %v4312_v0 = vld [vmem:[%s8443_s0 + $0x18] sm:$0xff] }
0x1045   :  { %4496 = vmatpush.msrb.mxu0 %v7874_v9  ;;  %v4319_v61 = vld [vmem:[%s8443_s0 + $0x50] sm:$0xff]  ;;  %v4320_v2 = vld [vmem:[%s8443_s0 + $0x58] sm:$0xff]  ;;  %v4313_v7 = vld [vmem:[%s8443_s0 + $0x20] sm:$0xff] }
0x1046   :  { %6393 = vrot.lane.b32.xlu1 %v6392_v24, %s6732_s5  ;;  %6378 = vrot.lane.b32.xlu0 %v6377_v26, %s6732_s5 }
0x1047   :  { %4497 = vmatpush.msrb.mxu0 %v7870_v29 }
0x1049   :  { %4498 = vmatpush.msrb.mxu0 %v7864_v49 }
0x104b   :  { %4499 = vmatpush.msrb.mxu0 %v7860_v48 }
0x104c   :  { %6438 = vrot.lane.b32.xlu2 %v6437_v54, %s6731_s13 }
0x104e   :  { %6413 = vrot.lane.b32.xlu1 %v6412_v17, %s6732_s5  ;;  %6388 = vrot.lane.b32.xlu0 %v6387_v30, %s6732_s5 }
0x1054   :  { %6453 = vrot.lane.b32.xlu2 %v6452_v23, %s6731_s13  ;;  %v4309_v23 = vld [vmem:[%s8443_s0] sm:$0xff] }
0x1055   :  { %5926 = vmatmul.msk.f32.vlgmr.msrb.gmra.mxu0 %vm1461_vm9, %v4309_v23 }
0x1056   :  { %6433 = vrot.lane.b32.xlu1 %v6432_v31, %s6732_s5  ;;  %6403 = vrot.lane.b32.xlu0 %v6402_v33, %s6732_s5  ;;  %v4321_v31 = vld [vmem:[%s8443_s0 + $0x60] sm:$0xff] }
0x105d   :  { %5927 = vmatmul.msk.f32.gmra.mxu0 %vm1461_vm9, %v4310_v52 }
0x105e   :  { %6448 = vrot.lane.b32.xlu1 %v6447_v34, %s6731_s13  ;;  %6408 = vrot.lane.b32.xlu0 %v6407_v35, %s6732_s5  ;;  %s8444_s13 = sld [smem:[#allocation25_spill]] }
0x1065   :  { %5928 = vmatmul.msk.f32.gmra.mxu0 %vm1461_vm9, %v4311_v57 }
0x1066   :  { %6428 = vrot.lane.b32.xlu0 %v6427_v36, %s6732_s5 }
0x106d   :  { %5929 = vmatmul.msk.f32.gmra.mxu0 %vm1461_vm9, %v4312_v0  ;;  %v4327_v0 = vld [vmem:[%s8443_s0 + $0x90] sm:$0xff] }
0x106e   :  { %6443 = vrot.lane.b32.xlu0 %v6442_v38, %s6732_s5  ;;  %s8445_s5 = sld [smem:[#allocation23_spill]] }
0x1070   :  { %v6349_v19 = vpop.permute.xlu2 %6348 }
0x1071   :  { %v6350_v53 = vunpack.i.l.bf16 %v6349_v19  ;;  %v6351_v54 = vunpack.i.h.bf16 %v6349_v19  ;;  %v4314_v19 = vld [vmem:[%s8443_s0 + $0x28] sm:$0xff] }
0x1075   :  { %5930 = vmatmul.msk.f32.gmra.mxu0 %vm1461_vm9, %v4313_v7  ;;  %v4531_v7 = vld [vmem:[%s8443_s0 + $0xa0] sm:$0xff] }
0x1078   :  { %v7935_v39 = vpop.permute.xlu2 %6363 }
0x1079   :  { %v6365_v59 = vunpack.i.l.bf16 %v7935_v39  ;;  %v6366_v60 = vunpack.i.h.bf16 %v7935_v39 }
0x107d   :  { %5931 = vmatmul.msk.f32.gmra.mxu0 %vm1461_vm9, %v4314_v19  ;;  %v4721_v19 = vld [vmem:[%s8443_s0 + $0x138] sm:$0xff] }
0x1086   :  { %v7937_v40 = vpop.permute.xlu2 %6373 }
0x1087   :  { %v6376_v15 = vunpack.i.h.bf16 %v7937_v40  ;;  %v6375_v20 = vunpack.i.l.bf16 %v7937_v40 }
0x1089   :  { %v4610_v30 = vsel %vm413_vm3, %v6375_v20, %v6376_v15  ;;  %v4717_v15 = vld [vmem:[%s8443_s0 + $0x118] sm:$0xff] }
0x108a   :  { %v4534_v20 = vld [vmem:[%s8443_s0 + $0xb8] sm:$0xff] }
0x108e   :  { %v6399_v41 = vpop.permute.xlu2 %6398 }
0x108f   :  { %v6400_v10 = vunpack.i.l.bf16 %v6399_v41  ;;  %v6401_v21 = vunpack.i.h.bf16 %v6399_v41 }
0x1096   :  { %v6419_v42 = vpop.permute.xlu2 %6418 }
0x1097   :  { %v6420_v43 = vunpack.i.l.bf16 %v6419_v42  ;;  %v6421_v8 = vunpack.i.h.bf16 %v6419_v42 }
0x1098   :  { %v6344_v1 = vpop.permute.xlu1 %6343 }
0x1099   :  { %4792 = vmatpush.msra.mxu0 %v6420_v43  ;;  %v6345_v27 = vunpack.i.l.bf16 %v6344_v1  ;;  %v6346_v34 = vunpack.i.h.bf16 %v6344_v1 }
0x109b   :  { %4793 = vmatpush.msra.mxu0 %v6421_v8 }
0x109d   :  { %4794 = vmatpush.msra.mxu0 %v6400_v10 }
0x109e   :  { %v6424_v45 = vpop.permute.xlu2 %6423 }
0x109f   :  { %v6425_v44 = vunpack.i.l.bf16 %v6424_v45  ;;  %4795 = vmatpush.msra.mxu0 %v6401_v21  ;;  %v6426_v47 = vunpack.i.h.bf16 %v6424_v45 }
0x10a0   :  { %v6359_v46 = vpop.permute.xlu1 %6358 }
0x10a1   :  { %4796 = vmatpush.msra.mxu0 %v6425_v44  ;;  %v6360_v18 = vunpack.i.l.bf16 %v6359_v46  ;;  %v6361_v58 = vunpack.i.h.bf16 %v6359_v46 }
0x10a3   :  { %4797 = vmatpush.msra.mxu0 %v6426_v47 }
0x10a6   :  { %v6439_v48 = vpop.permute.xlu2 %6438 }
0x10a7   :  { %v6440_v4 = vunpack.i.l.bf16 %v6439_v48  ;;  %v6441_v29 = vunpack.i.h.bf16 %v6439_v48 }
0x10a8   :  { %v6369_v49 = vpop.permute.xlu1 %6368  ;;  %v6339_v50 = vpop.permute.xlu0 %6338 }
0x10a9   :  { %v6340_v32 = vunpack.i.l.bf16 %v6339_v50  ;;  %4798 = vmatpush.msra.mxu0 %v6440_v4  ;;  %v6341_v9 = vunpack.i.h.bf16 %v6339_v50  ;;  %v6371_v11 = vunpack.i.h.bf16 %v6369_v49  ;;  %v6370_v12 = vunpack.i.l.bf16 %v6369_v49  ;;  %v4322_v4 = vld [vmem:[%s8443_s0 + $0x68] sm:$0xff] }
0x10ab   :  { %4411 = vmatpush.msra.mxu3 %v6340_v32  ;;  %4799 = vmatpush.msra.mxu0 %v6441_v29  ;;  %v4611_v24 = vsel %vm413_vm3, %v6370_v12, %v6371_v11  ;;  %v4315_v32 = vld [vmem:[%s8443_s0 + $0x30] sm:$0xff]  ;;  %v4715_v11 = vld [vmem:[%s8443_s0 + $0x108] sm:$0xff] }
0x10ac   :  { %5932 = vmatmul.msk.f32.gmra.mxu0 %vm1461_vm9, %v4315_v32  ;;  %v4532_v12 = vld [vmem:[%s8443_s0 + $0xa8] sm:$0xff]  ;;  %v4902_v32 = vld [vmem:[%s8444_s13 + $0xd8] sm:$0x3] }
0x10ad   :  { %4412 = vmatpush.msra.mxu3 %v6341_v9 }
0x10ae   :  { %v6454_v40 = vpop.permute.xlu2 %6453 }
0x10af   :  { %4413 = vmatpush.msra.mxu3 %v6345_v27  ;;  %v6455_v45 = vunpack.i.l.bf16 %v6454_v40  ;;  %v6456_v48 = vunpack.i.h.bf16 %v6454_v40  ;;  %v4538_v40 = vld [vmem:[%s8443_s0 + $0xd8] sm:$0xff] }
0x10b0   :  { %v7941_v51 = vpop.permute.xlu1 %6383  ;;  %v6354_v28 = vpop.permute.xlu0 %6353 }
0x10b1   :  { %4414 = vmatpush.msra.mxu3 %v6346_v34  ;;  %v6355_v55 = vunpack.i.l.bf16 %v6354_v28  ;;  %v6356_v25 = vunpack.i.h.bf16 %v6354_v28  ;;  %v6386_v33 = vunpack.i.h.bf16 %v7941_v51  ;;  %v6385_v35 = vunpack.i.l.bf16 %v7941_v51 }
0x10b3   :  { %4415 = vmatpush.msra.mxu3 %v6350_v53  ;;  %v4608_v21 = vsel %vm413_vm3, %v6385_v35, %v6386_v33  ;;  %v4720_v35 = vld [vmem:[%s8443_s0 + $0x130] sm:$0xff] }
0x10b5   :  { %4416 = vmatpush.msra.mxu3 %v6351_v54  ;;  %v4323_v54 = vld [vmem:[%s8443_s0 + $0x70] sm:$0xff] }
0x10b7   :  { %4417 = vmatpush.msra.mxu3 %v6355_v55 }
0x10b8   :  { %v7945_v16 = vpop.permute.xlu1 %6393  ;;  %v6379_v56 = vpop.permute.xlu0 %6378 }
0x10b9   :  { %4418 = vmatpush.msra.mxu3 %v6356_v25  ;;  %v6381_v26 = vunpack.i.h.bf16 %v6379_v56  ;;  %v6380_v17 = vunpack.i.l.bf16 %v6379_v56  ;;  %v6396_v8 = vunpack.i.h.bf16 %v7945_v16  ;;  %v6395_v10 = vunpack.i.l.bf16 %v7945_v16  ;;  %v4316_v16 = vld [vmem:[%s8443_s0 + $0x38] sm:$0xff] }
0x10ba   :  { %5933 = vmatmul.msk.f32.gmra.mxu0 %vm1461_vm9, %v4316_v16  ;;  %v4889_v16 = vld [vmem:[%s8444_s13 + $0x70] sm:$0xff] }
0x10bb   :  { %4419 = vmatpush.msra.mxu3 %v6360_v18  ;;  %v4609_v43 = vsel %vm413_vm3, %v6380_v17, %v6381_v26  ;;  %v4606_v29 = vsel %vm413_vm3, %v6395_v10, %v6396_v8  ;;  %v4535_v26 = vld [vmem:[%s8443_s0 + $0xc0] sm:$0xff]  ;;  %v4540_v10 = vld [vmem:[%s8443_s0 + $0xe8] sm:$0xff] }
0x10bd   :  { %4420 = vmatpush.msra.mxu3 %v6361_v58  ;;  %v4324_v58 = vld [vmem:[%s8443_s0 + $0x78] sm:$0xff] }
0x10bf   :  { %4421 = vmatpush.msra.mxu3 %v6365_v59  ;;  %v4317_v59 = vld [vmem:[%s8443_s0 + $0x40] sm:$0xff] }
0x10c0   :  { %v7952_v62 = vpop.permute.xlu1 %6413  ;;  %v6389_v63 = vpop.permute.xlu0 %6388 }
0x10c1   :  { %4422 = vmatpush.msra.mxu3 %v6366_v60  ;;  %v6391_v41 = vunpack.i.h.bf16 %v6389_v63  ;;  %v6390_v42 = vunpack.i.l.bf16 %v6389_v63  ;;  %v6416_v49 = vunpack.i.h.bf16 %v7952_v62  ;;  %v6415_v50 = vunpack.i.l.bf16 %v7952_v62  ;;  %v4325_v60 = vld [vmem:[%s8443_s0 + $0x80] sm:$0xff]  ;;  %v4326_v62 = vld [vmem:[%s8443_s0 + $0x88] sm:$0xff]  ;;  %v4712_v63 = vld [vmem:[%s8443_s0 + $0xf0] sm:$0xff] }
0x10c2   :  { %5916 = vmatmul.msk.f32.vlgmr.msra.gmra.mxu3 %vm1461_vm9, %v4319_v61  ;;  %5934 = vmatmul.msk.f32.gmra.mxu0 %vm1461_vm9, %v4317_v59  ;;  %v4318_v61 = vld [vmem:[%s8443_s0 + $0x48] sm:$0xff]  ;;  %v4886_v59 = vld [vmem:[%s8444_s13 + $0x58] sm:$0xff] }
0x10c3   :  { %v4607_v47 = vsel %vm413_vm3, %v6390_v42, %v6391_v41  ;;  %v4604_v52 = vsel %vm413_vm3, %v6415_v50, %v6416_v49  ;;  %v4901_v49 = vld [vmem:[%s8444_s13 + $0xd0] sm:$0x3]  ;;  %v4895_v50 = vld [vmem:[%s8444_s13 + $0xa0] sm:$0xff] }
0x10c8   :  { %v7958_v3 = vpop.permute.xlu1 %6433  ;;  %v6404_v5 = vpop.permute.xlu0 %6403 }
0x10c9   :  { %v6406_v13 = vunpack.i.h.bf16 %v6404_v5  ;;  %v6405_v14 = vunpack.i.l.bf16 %v6404_v5  ;;  %v6436_v51 = vunpack.i.h.bf16 %v7958_v3  ;;  %v6435_v28 = vunpack.i.l.bf16 %v7958_v3  ;;  %v4328_v3 = vld [vmem:[%s8443_s0 + $0x98] sm:$0xff]  ;;  %v4714_v5 = vld [vmem:[%s8443_s0 + $0x100] sm:$0xff] }
0x10ca   :  { %5917 = vmatmul.msk.f32.gmra.mxu3 %vm1461_vm9, %v4320_v2  ;;  %5935 = vmatmul.msk.f32.gmra.mxu0 %vm1461_vm9, %v4318_v61  ;;  %v4713_v2 = vld [vmem:[%s8443_s0 + $0xf8] sm:$0xff]  ;;  %v4879_v61 = vld [vmem:[%s8444_s13 + $0x20] sm:$0xff] }
0x10cb   :  { %v4612_v22 = vsel %vm413_vm3, %v6405_v14, %v6406_v13  ;;  %v4602_v25 = vsel %vm413_vm3, %v6435_v28, %v6436_v51  ;;  %v4716_v13 = vld [vmem:[%s8443_s0 + $0x110] sm:$0xff]  ;;  %v4891_v51 = vld [vmem:[%s8444_s13 + $0x80] sm:$0xff]  ;;  %v4892_v28 = vld [vmem:[%s8444_s13 + $0x88] sm:$0xff] }
0x10cc   :  { %4659 = vmatpush.msrb.mxu3 %v4612_v22  ;;  %v4533_v14 = vld [vmem:[%s8443_s0 + $0xb0] sm:$0xff] }
0x10ce   :  { %4660 = vmatpush.msrb.mxu3 %v4611_v24  ;;  %v4718_v24 = vld [vmem:[%s8443_s0 + $0x120] sm:$0xff] }
0x10d0   :  { %v6449_v36 = vpop.permute.xlu1 %6448  ;;  %v6409_v38 = vpop.permute.xlu0 %6408  ;;  %4661 = vmatpush.msrb.mxu3 %v4610_v30  ;;  %v4719_v30 = vld [vmem:[%s8443_s0 + $0x128] sm:$0xff] }
0x10d1   :  { %v6450_v39 = vunpack.i.l.bf16 %v6449_v36  ;;  %v6451_v1 = vunpack.i.h.bf16 %v6449_v36  ;;  %v6411_v44 = vunpack.i.h.bf16 %v6409_v38  ;;  %v6410_v46 = vunpack.i.l.bf16 %v6409_v38  ;;  %v4537_v36 = vld [vmem:[%s8443_s0 + $0xd0] sm:$0xff] }
0x10d2   :  { %5918 = vmatmul.msk.f32.gmra.mxu3 %vm1461_vm9, %v4321_v31  ;;  %v8030_v22 = vpop.f32.mrf.mxu0  ;;  %v4536_v31 = vld [vmem:[%s8443_s0 + $0xc8] sm:$0xff] }
0x10d3   :  { %4662 = vmatpush.msrb.mxu3 %v4609_v43  ;;  %4800 = vmatpush.msra.mxu0 %v6450_v39  ;;  %v4605_v34 = vsel %vm413_vm3, %v6410_v46, %v6411_v44  ;;  %v4539_v43 = vld [vmem:[%s8443_s0 + $0xe0] sm:$0xff] }
0x10d5   :  { %4663 = vmatpush.msrb.mxu3 %v4608_v21  ;;  %4801 = vmatpush.msra.mxu0 %v6451_v1 }
0x10d7   :  { %4664 = vmatpush.msrb.mxu3 %v4607_v47  ;;  %4802 = vmatpush.msra.mxu0 %v6455_v45 }
0x10d8   :  { %v6429_v23 = vpop.permute.xlu0 %6428 }
0x10d9   :  { %4665 = vmatpush.msrb.mxu3 %v4606_v29  ;;  %4803 = vmatpush.msra.mxu0 %v6456_v48  ;;  %v6431_v9 = vunpack.i.h.bf16 %v6429_v23  ;;  %v6430_v27 = vunpack.i.l.bf16 %v6429_v23  ;;  %v4899_v48 = vld [vmem:[%s8444_s13 + $0xc0] sm:$0x3]  ;;  %v4896_v23 = vld [vmem:[%s8444_s13 + $0xa8] sm:$0xff]  ;;  %v4897_v29 = vld [vmem:[%s8444_s13 + $0xb0] sm:$0xff] }
0x10da   :  { %5919 = vmatmul.msk.f32.gmra.mxu3 %vm1461_vm9, %v4322_v4  ;;  %5946 = vmatmul.msk.f32.vlgmr.msra.gmra.mxu0 %vm1461_vm9, %v4712_v63  ;;  %v8036_v17 = vpop.f32.mrf.mxu0  ;;  %v4900_v4 = vld [vmem:[%s8444_s13 + $0xc8] sm:$0x3]  ;;  %v4881_v63 = vld [vmem:[%s8444_s13 + $0x30] sm:$0xff] }
0x10db   :  { %4666 = vmatpush.msrb.mxu3 %v4605_v34  ;;  %v4603_v53 = vsel %vm413_vm3, %v6430_v27, %v6431_v9  ;;  %5956 = vmatpush.msk.msra.mxu1 %vm671_vm4, %v4899_v48  ;;  %v4898_v27 = vld [vmem:[%s8444_s13 + $0xb8] sm:$0xff] }
0x10dc   :  { %5967 = vmatpush.msk.msrb.mxu2 %vm671_vm4, %v4900_v4  ;;  %5989 = vmatpush.msk.msrb.mxu0 %vm671_vm4, %v4902_v32 }
0x10dd   :  { %4667 = vmatpush.msrb.mxu3 %v4604_v52  ;;  %4955 = vmatpush.msra.mxu1 %v4895_v50  ;;  %v4893_v52 = vld [vmem:[%s8444_s13 + $0x90] sm:$0xff] }
0x10de   :  { %5002 = vmatpush.msrb.mxu2 %v4896_v23  ;;  %5096 = vmatpush.msrb.mxu0 %v4898_v27 }
0x10df   :  { %4668 = vmatpush.msrb.mxu3 %v4603_v53  ;;  %4956 = vmatpush.msra.mxu1 %v4891_v51 }
0x10e0   :  { %v6444_v55 = vpop.permute.xlu0 %6443  ;;  %5003 = vmatpush.msrb.mxu2 %v4892_v28  ;;  %v4848_v28 = vld [vmem:[%s8445_s5 + $0x18] sm:$0xff] }
0x10e1   :  { %v6446_v56 = vunpack.i.h.bf16 %v6444_v55  ;;  %v6445_v57 = vunpack.i.l.bf16 %v6444_v55  ;;  %4669 = vmatpush.msrb.mxu3 %v4602_v25  ;;  %v4887_v55 = vld [vmem:[%s8444_s13 + $0x60] sm:$0xff]  ;;  %v4888_v25 = vld [vmem:[%s8444_s13 + $0x68] sm:$0xff] }
0x10e2   :  { %5920 = vmatmul.msk.f32.gmra.mxu3 %vm1461_vm9, %v4323_v54  ;;  %5947 = vmatmul.msk.f32.gmra.mxu0 %vm1461_vm9, %v4713_v2  ;;  %v8042_v33 = vpop.f32.mrf.mxu0  ;;  %v4894_v54 = vld [vmem:[%s8444_s13 + $0x98] sm:$0xff] }
0x10e3   :  { %v4601_v18 = vsel %vm413_vm3, %v6445_v57, %v6446_v56  ;;  %5097 = vmatpush.msrb.mxu0 %v4894_v54  ;;  %4957 = vmatpush.msra.mxu1 %v4887_v55  ;;  %v4890_v56 = vld [vmem:[%s8444_s13 + $0x78] sm:$0xff]  ;;  %v4883_v57 = vld [vmem:[%s8444_s13 + $0x40] sm:$0xff]  ;;  %vm5195_vm3 = vcmask 220160  }
0x10e4   :  { %4670 = vmatpush.msrb.mxu3 %v4601_v18  ;;  %5004 = vmatpush.msrb.mxu2 %v4888_v25  ;;  %v4884_v18 = vld [vmem:[%s8444_s13 + $0x48] sm:$0xff] }
0x10e5   :  { %5098 = vmatpush.msrb.mxu0 %v4890_v56  ;;  %4958 = vmatpush.msra.mxu1 %v4883_v57  ;;  %v4849_v56 = vld [vmem:[%s8445_s5 + $0x20] sm:$0xff] }
0x10e6   :  { %5978 = vmatpush.msk.msra.mxu3 %vm671_vm4, %v4901_v49  ;;  %5005 = vmatpush.msrb.mxu2 %v4884_v18  ;;  %vm5409_vm4 = vcmask 662528  }
0x10e7   :  { %5099 = vmatpush.msrb.mxu0 %v4886_v59  ;;  %4959 = vmatpush.msra.mxu1 %v4879_v61 }
0x10e8   :  { %5049 = vmatpush.msra.mxu3 %v4897_v29  ;;  %v4847_v29 = vld [vmem:[%s8445_s5 + $0x10] sm:$0xff] }
0x10ea   :  { %5921 = vmatmul.msk.f32.gmra.mxu3 %vm1461_vm9, %v4324_v58  ;;  %5948 = vmatmul.msk.f32.gmra.mxu0 %vm1461_vm9, %v4714_v5  ;;  %v8048_v38 = vpop.f32.mrf.mxu0  ;;  %v4885_v58 = vld [vmem:[%s8444_s13 + $0x50] sm:$0xff]  ;;  %v4876_v5 = vld [vmem:[%s8444_s13 + $0x8] sm:$0xff] }
0x10eb   :  { %5050 = vmatpush.msra.mxu3 %v4893_v52 }
0x10ed   :  { %5051 = vmatpush.msra.mxu3 %v4889_v16 }
0x10ef   :  { %5052 = vmatpush.msra.mxu3 %v4885_v58 }
0x10f1   :  { %5053 = vmatpush.msra.mxu3 %v4881_v63 }
0x10f2   :  { %5922 = vmatmul.msk.f32.gmra.mxu3 %vm1461_vm9, %v4325_v60  ;;  %5949 = vmatmul.msk.f32.gmra.mxu0 %vm1461_vm9, %v4715_v11  ;;  %v8056_v41 = vpop.f32.mrf.mxu0 }
0x10fa   :  { %5923 = vmatmul.msk.f32.gmra.mxu3 %vm1461_vm9, %v4326_v62  ;;  %5950 = vmatmul.msk.f32.gmra.mxu0 %vm1461_vm9, %v4716_v13  ;;  %v8063_v1 = vpop.f32.mrf.mxu0  ;;  %v4880_v62 = vld [vmem:[%s8444_s13 + $0x28] sm:$0xff] }
0x10fb   :  { %5006 = vmatpush.msrb.mxu2 %v4880_v62 }
0x10fd   :  { %5007 = vmatpush.msrb.mxu2 %v4876_v5 }
0x1102   :  { %5924 = vmatmul.msk.f32.gmra.mxu3 %vm1461_vm9, %v4327_v0  ;;  %5951 = vmatmul.msk.f32.gmra.mxu0 %vm1461_vm9, %v4717_v15  ;;  %v4882_v0 = vld [vmem:[%s8444_s13 + $0x38] sm:$0xff] }
0x1103   :  { %5100 = vmatpush.msrb.mxu0 %v4882_v0 }
0x110a   :  { %5925 = vmatmul.msk.f32.gmra.mxu3 %vm1461_vm9, %v4328_v3  ;;  %5952 = vmatmul.msk.f32.gmra.mxu0 %vm1461_vm9, %v4718_v24  ;;  %v4875_v3 = vld [vmem:[%s8444_s13] sm:$0xff] }
0x110b   :  { %4960 = vmatpush.msra.mxu1 %v4875_v3 }
0x1112   :  { %5936 = vmatmul.msk.f32.vlgmr.msrb.gmra.mxu3 %vm1461_vm9, %v4531_v7  ;;  %5953 = vmatmul.msk.f32.gmra.mxu0 %vm1461_vm9, %v4719_v30  ;;  %v4877_v7 = vld [vmem:[%s8444_s13 + $0x10] sm:$0xff] }
0x1113   :  { %5054 = vmatpush.msra.mxu3 %v4877_v7 }
0x111a   :  { %5937 = vmatmul.msk.f32.gmra.mxu3 %vm1461_vm9, %v4532_v12  ;;  %5954 = vmatmul.msk.f32.gmra.mxu0 %vm1461_vm9, %v4720_v35  ;;  %v4878_v12 = vld [vmem:[%s8444_s13 + $0x18] sm:$0xff] }
0x111b   :  { %5101 = vmatpush.msrb.mxu0 %v4878_v12 }
0x1122   :  { %5938 = vmatmul.msk.f32.gmra.mxu3 %vm1461_vm9, %v4533_v14  ;;  %5955 = vmatmul.msk.f32.gmra.mxu0 %vm1461_vm9, %v4721_v19 }
0x1129   :  { %v4519_v45 = vpop.f32.mrf.mxu0 }
0x112a   :  { %5939 = vmatmul.msk.f32.gmra.mxu3 %vm1461_vm9, %v4534_v20 }
0x1132   :  { %5940 = vmatmul.msk.f32.gmra.mxu3 %vm1461_vm9, %v4535_v26 }
0x1137   :  { %v4522_v46 = vpop.f32.mrf.mxu0 }
0x113a   :  { %5941 = vmatmul.msk.f32.gmra.mxu3 %vm1461_vm9, %v4536_v31 }
0x113f   :  { %v4525_v9 = vpop.f32.mrf.mxu0 }
0x1142   :  { %5942 = vmatmul.msk.f32.gmra.mxu3 %vm1461_vm9, %v4537_v36  ;;  %v4845_v36 = vld [vmem:[%s8445_s5] sm:$0xff] }
0x1145   :  { %v8053_v39 = vpop.f32.mrf.mxu3 }
0x1146   :  { %v4502_v30 = vadd.f32 %v8030_v22, %v8053_v39  ;;  %v4846_v22 = vld [vmem:[%s8445_s5 + $0x8] sm:$0xff] }
0x1147   :  { %v4528_v60 = vpop.f32.mrf.mxu0 }
0x114a   :  { %5943 = vmatmul.msk.f32.gmra.mxu3 %vm1461_vm9, %v4538_v40 }
0x114d   :  { %v8059_v42 = vpop.f32.mrf.mxu3 }
0x1152   :  { %5944 = vmatmul.msk.f32.gmra.mxu3 %vm1461_vm9, %v4539_v43 }
0x1155   :  { %v8065_v8 = vpop.f32.mrf.mxu3 }
0x1156   :  { %v4508_v50 = vadd.f32 %v8042_v33, %v8065_v8 }
0x1157   :  { %v4805_v13 = vpop.f32.mrf.mxu0 }
0x115a   :  { %5945 = vmatmul.msk.f32.gmra.mxu3 %vm1461_vm9, %v4540_v10  ;;  %v4505_v10 = vadd.f32 %v8036_v17, %v8059_v42 }
0x115d   :  { %v8069_v21 = vpop.f32.mrf.mxu3 }
0x115f   :  { %v4808_v24 = vpop.f32.mrf.mxu0 }
0x1165   :  { %v8071_v44 = vpop.f32.mrf.mxu3 }
0x1166   :  { %v4514_v55 = vadd.f32 %v8056_v41, %v8071_v44 }
0x1167   :  { %v4811_v19 = vpop.f32.mrf.mxu0 }
0x116d   :  { %v8073_v47 = vpop.f32.mrf.mxu3 }
0x116e   :  { %v4517_v58 = vadd.f32 %v8063_v1, %v8073_v47  ;;  %v4851_v47 = vld [vmem:[%s8445_s5 + $0x30] sm:$0xff] }
0x116f   :  { %v4814_v4 = vpop.f32.mrf.mxu0 }
0x1175   :  { %v4442_v34 = vpop.f32.mrf.mxu3 }
0x1176   :  { %v8090_v53 = vadd.f32 %v4519_v45, %v4442_v34  ;;  %v4511_v34 = vadd.f32 %v8048_v38, %v8069_v21 }
0x1177   :  { %v4817_v27 = vpop.f32.mrf.mxu0 }
0x117d   :  { %v4445_v2 = vpop.f32.mrf.mxu3 }
0x117e   :  { %v8108_v11 = vadd.f32 %v4522_v46, %v4445_v2 }
0x117f   :  { %v4820_v21 = vpop.f32.mrf.mxu0 }
0x1185   :  { %v4448_v14 = vpop.f32.mrf.mxu3 }
0x1186   :  { %v8111_v15 = vadd.f32 %v4525_v9, %v4448_v14 }
0x1187   :  { %v4823_v61 = vpop.f32.mrf.mxu0 }
0x118d   :  { %v4451_v20 = vpop.f32.mrf.mxu3 }
0x118e   :  { %v8113_v26 = vadd.f32 %v4528_v60, %v4451_v20  ;;  %v4850_v60 = vld [vmem:[%s8445_s5 + $0x28] sm:$0xff] }
0x118f   :  { %v4826_v5 = vpop.f32.mrf.mxu0 }
0x1195   :  { %v4672_v31 = vpop.f32.mrf.mxu3 }
0x1196   :  { %v4702_v35 = vadd.f32 %v4672_v31, %v4502_v30 }
0x1197   :  { %v4829_v30 = vpop.f32.mrf.mxu0 }
0x1198   :  { %v4835_v40 = vadd.f32 %v4805_v13, %v4702_v35 }
0x119a   :  { %v4855_v43 = vadd.f32 %v4845_v36, %v4835_v40 }
0x119c   :  { %v4865_v45 = vmax.f32 %v4855_v43, 0.0 }
0x119d   :  { %v4675_v46 = vpop.f32.mrf.mxu3 }
0x119e   :  { %v4703_v48 = vadd.f32 %v4675_v46, %v4505_v10  ;;  %5957 = vmatmul.msk.f32.vlgmr.msra.gmra.mxu1 %vm640_vm5, %v4865_v45  ;;  %5968 = vmatmul.msk.f32.vlgmr.msrb.gmra.mxu2 %vm640_vm5, %v4865_v45 }
0x119f   :  { %5979 = vmatmul.msk.f32.vlgmr.msra.gmra.mxu3 %vm640_vm5, %v4865_v45  ;;  %5990 = vmatmul.msk.f32.vlgmr.msrb.gmra.mxu0 %vm640_vm5, %v4865_v45  ;;  %v4832_v45 = vpop.f32.mrf.mxu0 }
0x11a0   :  { %v4836_v39 = vadd.f32 %v4808_v24, %v4703_v48 }
0x11a2   :  { %v4856_v49 = vadd.f32 %v4846_v22, %v4836_v39 }
0x11a4   :  { %v4866_v17 = vmax.f32 %v4856_v49, 0.0 }
0x11a5   :  { %v4678_v42 = vpop.f32.mrf.mxu3 }
0x11a6   :  { %v4704_v23 = vadd.f32 %v4678_v42, %v4508_v50  ;;  %5958 = vmatmul.msk.f32.gmra.mxu1 %vm640_vm5, %v4866_v17  ;;  %5969 = vmatmul.msk.f32.gmra.mxu2 %vm640_vm5, %v4866_v17 }
0x11a7   :  { %5980 = vmatmul.msk.f32.gmra.mxu3 %vm640_vm5, %v4866_v17  ;;  %5991 = vmatmul.msk.f32.gmra.mxu0 %vm640_vm5, %v4866_v17 }
0x11a8   :  { %v4837_v32 = vadd.f32 %v4811_v19, %v4704_v23 }
0x11aa   :  { %v4857_v9 = vadd.f32 %v4847_v29, %v4837_v32 }
0x11ac   :  { %v4867_v33 = vmax.f32 %v4857_v9, 0.0 }
0x11ad   :  { %v4681_v8 = vpop.f32.mrf.mxu3 }
0x11ae   :  { %v4705_v51 = vadd.f32 %v4681_v8, %v4511_v34  ;;  %5959 = vmatmul.msk.f32.gmra.mxu1 %vm640_vm5, %v4867_v33  ;;  %5970 = vmatmul.msk.f32.gmra.mxu2 %vm640_vm5, %v4867_v33 }
0x11af   :  { %5981 = vmatmul.msk.f32.gmra.mxu3 %vm640_vm5, %v4867_v33  ;;  %5992 = vmatmul.msk.f32.gmra.mxu0 %vm640_vm5, %v4867_v33 }
0x11b0   :  { %v4838_v52 = vadd.f32 %v4814_v4, %v4705_v51 }
0x11b2   :  { %v4858_v54 = vadd.f32 %v4848_v28, %v4838_v52 }
0x11b4   :  { %v4868_v25 = vmax.f32 %v4858_v54, 0.0 }
0x11b5   :  { %v4684_v38 = vpop.f32.mrf.mxu3 }
0x11b6   :  { %v4706_v16 = vadd.f32 %v4684_v38, %v4514_v55  ;;  %5960 = vmatmul.msk.f32.gmra.mxu1 %vm640_vm5, %v4868_v25  ;;  %5971 = vmatmul.msk.f32.gmra.mxu2 %vm640_vm5, %v4868_v25 }
0x11b7   :  { %5982 = vmatmul.msk.f32.gmra.mxu3 %vm640_vm5, %v4868_v25  ;;  %5993 = vmatmul.msk.f32.gmra.mxu0 %vm640_vm5, %v4868_v25 }
0x11b8   :  { %v4839_v57 = vadd.f32 %v4817_v27, %v4706_v16 }
0x11ba   :  { %v4859_v18 = vadd.f32 %v4849_v56, %v4839_v57 }
0x11bc   :  { %v4869_v41 = vmax.f32 %v4859_v18, 0.0 }
0x11bd   :  { %v4687_v44 = vpop.f32.mrf.mxu3 }
0x11be   :  { %v4707_v59 = vadd.f32 %v4687_v44, %v4517_v58  ;;  %5961 = vmatmul.msk.f32.gmra.mxu1 %vm640_vm5, %v4869_v41  ;;  %5972 = vmatmul.msk.f32.gmra.mxu2 %vm640_vm5, %v4869_v41 }
0x11bf   :  { %5983 = vmatmul.msk.f32.gmra.mxu3 %vm640_vm5, %v4869_v41  ;;  %5994 = vmatmul.msk.f32.gmra.mxu0 %vm640_vm5, %v4869_v41 }
0x11c0   :  { %v4840_v62 = vadd.f32 %v4820_v21, %v4707_v59 }
0x11c2   :  { %v4860_v63 = vadd.f32 %v4850_v60, %v4840_v62 }
0x11c4   :  { %v4870_v0 = vmax.f32 %v4860_v63, 0.0 }
0x11c5   :  { %v4690_v2 = vpop.f32.mrf.mxu3 }
0x11c6   :  { %v4708_v1 = vadd.f32 %v4690_v2, %v8090_v53  ;;  %5962 = vmatmul.msk.f32.gmra.mxu1 %vm640_vm5, %v4870_v0  ;;  %5973 = vmatmul.msk.f32.gmra.mxu2 %vm640_vm5, %v4870_v0  ;;  %v4852_v53 = vld [vmem:[%s8445_s5 + $0x38] sm:$0xff] }
0x11c7   :  { %5984 = vmatmul.msk.f32.gmra.mxu3 %vm640_vm5, %v4870_v0  ;;  %5995 = vmatmul.msk.f32.gmra.mxu0 %vm640_vm5, %v4870_v0 }
0x11c8   :  { %v4841_v3 = vadd.f32 %v4823_v61, %v4708_v1 }
0x11ca   :  { %v4861_v7 = vadd.f32 %v4851_v47, %v4841_v3 }
0x11cc   :  { %v4871_v12 = vmax.f32 %v4861_v7, 0.0 }
0x11cd   :  { %v4693_v13 = vpop.f32.mrf.mxu3 }
0x11ce   :  { %v4709_v14 = vadd.f32 %v4693_v13, %v8108_v11  ;;  %5963 = vmatmul.msk.f32.gmra.mxu1 %vm640_vm5, %v4871_v12  ;;  %5974 = vmatmul.msk.f32.gmra.mxu2 %vm640_vm5, %v4871_v12  ;;  %v4853_v11 = vld [vmem:[%s8445_s5 + $0x40] sm:$0xff] }
0x11cf   :  { %5985 = vmatmul.msk.f32.gmra.mxu3 %vm640_vm5, %v4871_v12  ;;  %5996 = vmatmul.msk.f32.gmra.mxu0 %vm640_vm5, %v4871_v12 }
0x11d0   :  { %v4842_v20 = vadd.f32 %v4826_v5, %v4709_v14 }
0x11d2   :  { %v4862_v24 = vadd.f32 %v4852_v53, %v4842_v20 }
0x11d4   :  { %v4872_v31 = vmax.f32 %v4862_v24, 0.0 }
0x11d5   :  { %v4696_v35 = vpop.f32.mrf.mxu3 }
0x11d6   :  { %v4710_v36 = vadd.f32 %v4696_v35, %v8111_v15  ;;  %5964 = vmatmul.msk.f32.gmra.mxu1 %vm640_vm5, %v4872_v31  ;;  %5975 = vmatmul.msk.f32.gmra.mxu2 %vm640_vm5, %v4872_v31  ;;  %v4854_v15 = vld [vmem:[%s8445_s5 + $0x48] sm:$0xff] }
0x11d7   :  { %5986 = vmatmul.msk.f32.gmra.mxu3 %vm640_vm5, %v4872_v31  ;;  %5997 = vmatmul.msk.f32.gmra.mxu0 %vm640_vm5, %v4872_v31 }
0x11d8   :  { %v4843_v19 = vadd.f32 %v4829_v30, %v4710_v36 }
0x11da   :  { %v4863_v40 = vadd.f32 %v4853_v11, %v4843_v19 }
0x11dc   :  { %v4873_v43 = vmax.f32 %v4863_v40, 0.0 }
0x11dd   :  { %v4699_v10 = vpop.f32.mrf.mxu3 }
0x11de   :  { %v4711_v46 = vadd.f32 %v4699_v10, %v8113_v26  ;;  %5965 = vmatmul.msk.f32.gmra.mxu1 %vm640_vm5, %v4873_v43  ;;  %5976 = vmatmul.msk.f32.gmra.mxu2 %vm640_vm5, %v4873_v43 }
0x11df   :  { %5987 = vmatmul.msk.f32.gmra.mxu3 %vm640_vm5, %v4873_v43  ;;  %5998 = vmatmul.msk.f32.gmra.mxu0 %vm640_vm5, %v4873_v43 }
0x11e0   :  { %v4844_v48 = vadd.f32 %v4832_v45, %v4711_v46 }
0x11e2   :  { %v4864_v22 = vadd.f32 %v4854_v15, %v4844_v48 }
0x11e4   :  { %v4874_v39 = vmax.f32 %v4864_v22, 0.0 }
0x11e6   :  { %5966 = vmatmul.msk.f32.gmra.mxu1 %vm640_vm5, %v4874_v39  ;;  %5977 = vmatmul.msk.f32.gmra.mxu2 %vm640_vm5, %v4874_v39 }
0x11e7   :  { %5988 = vmatmul.msk.f32.gmra.mxu3 %vm640_vm5, %v4874_v39  ;;  %5999 = vmatmul.msk.f32.gmra.mxu0 %vm640_vm5, %v4874_v39  ;;  %vm5313_vm5 = vcmask 441344  }
0x121b   :  { %v8181_v26 = vpop.f32.mrf.mxu1 }
0x121c   :  { %v8183_v4 = vpop.f32.mrf.mxu0 }
0x1221   :  { %v8185_v49 = vpop.f32.mrf.mxu2 }
0x1222   :  { %v8187_v50 = vpop.f32.mrf.mxu3 }
0x1223   :  { %v6592_v17 = vpack.i.bf16 %v8183_v4, %v8187_v50  ;;  %v6602_v42 = vpack.i.bf16 %v8187_v50, %v8185_v49  ;;  %v8193_v23 = vpop.f32.mrf.mxu1 }
0x1224   :  { %v8195_v29 = vpop.f32.mrf.mxu0 }
0x1229   :  { %v8197_v32 = vpop.f32.mrf.mxu2 }
0x122a   :  { %v6457_v9 = vpack.i.bf16 %v8197_v32, %v8193_v23  ;;  %v8201_v27 = vpop.f32.mrf.mxu3 }
0x122b   :  { %v6582_v34 = vpack.i.bf16 %v8195_v29, %v8201_v27  ;;  %v6597_v33 = vpack.i.bf16 %v8201_v27, %v8197_v32  ;;  %v8207_v8 = vpop.f32.mrf.mxu1 }
0x122c   :  { %6458 = vrot.lane.b32.xlu0 %v6457_v9, %s6746_s17  ;;  %v8210_v51 = vpop.f32.mrf.mxu0 }
0x1231   :  { %v8212_v28 = vpop.f32.mrf.mxu2 }
0x1232   :  { %v6462_v52 = vpack.i.bf16 %v8212_v28, %v8207_v8  ;;  %v8216_v54 = vpop.f32.mrf.mxu3 }
0x1233   :  { %v6567_v55 = vpack.i.bf16 %v8210_v51, %v8216_v54  ;;  %v6587_v25 = vpack.i.bf16 %v8216_v54, %v8212_v28  ;;  %v8222_v38 = vpop.f32.mrf.mxu1 }
0x1234   :  { %6463 = vrot.lane.b32.xlu0 %v6462_v52, %s6746_s17  ;;  %v5112_v21 = vpop.f32.mrf.mxu0 }
0x1239   :  { %v8225_v16 = vpop.f32.mrf.mxu2 }
0x123a   :  { %v6467_v56 = vpack.i.bf16 %v8225_v16, %v8222_v38  ;;  %v8229_v57 = vpop.f32.mrf.mxu3 }
0x123b   :  { %v6472_v18 = vpack.i.bf16 %v5112_v21, %v8229_v57  ;;  %v6572_v58 = vpack.i.bf16 %v8229_v57, %v8225_v16  ;;  %v4974_v41 = vpop.f32.mrf.mxu1 }
0x123c   :  { %6468 = vrot.lane.b32.xlu0 %v6467_v56, %s6746_s17  ;;  %v5115_v44 = vpop.f32.mrf.mxu0 }
0x123d   :  { %6473 = vrot.lane.b32.xlu2 %v6472_v18, %s6747_s21 }
0x1241   :  { %v8236_v59 = vpop.f32.mrf.mxu2 }
0x1242   :  { %v6477_v60 = vpack.i.bf16 %v8236_v59, %v4974_v41  ;;  %v8239_v61 = vpop.f32.mrf.mxu3 }
0x1243   :  { %v6482_v62 = vpack.i.bf16 %v5115_v44, %v8239_v61  ;;  %v4977_v63 = vpop.f32.mrf.mxu1 }
0x1244   :  { %6478 = vrot.lane.b32.xlu0 %v6477_v60, %s6746_s17  ;;  %v5118_v0 = vpop.f32.mrf.mxu0 }
0x1245   :  { %6483 = vrot.lane.b32.xlu2 %v6482_v62, %s6747_s21 }
0x1249   :  { %v5024_v2 = vpop.f32.mrf.mxu2 }
0x124a   :  { %v6487_v1 = vpack.i.bf16 %v5024_v2, %v4977_v63  ;;  %v5071_v47 = vpop.f32.mrf.mxu3 }
0x124b   :  { %v6492_v3 = vpack.i.bf16 %v5118_v0, %v5071_v47  ;;  %v6497_v5 = vpack.i.bf16 %v5071_v47, %v5024_v2  ;;  %v4980_v7 = vpop.f32.mrf.mxu1 }
0x124c   :  { %6488 = vrot.lane.b32.xlu0 %v6487_v1, %s6746_s17  ;;  %v5121_v13 = vpop.f32.mrf.mxu0 }
0x124d   :  { %6493 = vrot.lane.b32.xlu2 %v6492_v3, %s6747_s21  ;;  %6498 = vrot.lane.b32.xlu1 %v6497_v5, %s6748_s25 }
0x1251   :  { %v5027_v12 = vpop.f32.mrf.mxu2 }
0x1252   :  { %v6502_v14 = vpack.i.bf16 %v5027_v12, %v4980_v7  ;;  %v5074_v53 = vpop.f32.mrf.mxu3 }
0x1253   :  { %v6507_v20 = vpack.i.bf16 %v5121_v13, %v5074_v53  ;;  %v4983_v24 = vpop.f32.mrf.mxu1  ;;  %v6512_v35 = vpack.i.bf16 %v5074_v53, %v5027_v12 }
0x1254   :  { %v5124_v19 = vpop.f32.mrf.mxu0 }
0x1255   :  { %6508 = vrot.lane.b32.xlu2 %v6507_v20, %s6747_s21  ;;  %6503 = vrot.lane.b32.xlu1 %v6502_v14, %s6746_s17 }
0x1259   :  { %v5030_v30 = vpop.f32.mrf.mxu2 }
0x125a   :  { %v6517_v31 = vpack.i.bf16 %v5030_v30, %v4983_v24  ;;  %v5077_v36 = vpop.f32.mrf.mxu3 }
0x125b   :  { %v4986_v11 = vpop.f32.mrf.mxu1  ;;  %v6522_v43 = vpack.i.bf16 %v5124_v19, %v5077_v36  ;;  %v6527_v10 = vpack.i.bf16 %v5077_v36, %v5030_v30 }
0x125c   :  { %v5127_v15 = vpop.f32.mrf.mxu0 }
0x125d   :  { %6513 = vrot.lane.b32.xlu1 %v6512_v35, %s6748_s25  ;;  %6518 = vrot.lane.b32.xlu2 %v6517_v31, %s6746_s17 }
0x1261   :  { %v5033_v40 = vpop.f32.mrf.mxu2 }
0x1262   :  { %v5080_v46 = vpop.f32.mrf.mxu3  ;;  %v6532_v39 = vpack.i.bf16 %v5033_v40, %v4986_v11 }
0x1263   :  { %v4989_v45 = vpop.f32.mrf.mxu1  ;;  %v6537_v9 = vpack.i.bf16 %v5127_v15, %v5080_v46  ;;  %v6542_v18 = vpack.i.bf16 %v5080_v46, %v5033_v40 }
0x1264   :  { %5248 = vmatpush.msra.mxu2 %v4989_v45  ;;  %v5130_v21 = vpop.f32.mrf.mxu0 }
0x1265   :  { %6528 = vrot.lane.b32.xlu1 %v6527_v10, %s6748_s25  ;;  %6523 = vrot.lane.b32.xlu2 %v6522_v43, %s6747_s21 }
0x1266   :  { %5249 = vmatpush.msra.mxu2 %v4986_v11 }
0x1268   :  { %5250 = vmatpush.msra.mxu2 %v4983_v24 }
0x1269   :  { %v5036_v48 = vpop.f32.mrf.mxu2 }
0x126a   :  { %v6547_v22 = vpack.i.bf16 %v5036_v48, %v4989_v45  ;;  %5251 = vmatpush.msra.mxu2 %v4980_v7  ;;  %v5083_v52 = vpop.f32.mrf.mxu3 }
0x126b   :  { %v6552_v56 = vpack.i.bf16 %v5130_v21, %v5083_v52 }
0x126c   :  { %6548 = vrot.lane.b32.xlu0 %v6547_v22, %s6746_s17  ;;  %5252 = vmatpush.msra.mxu2 %v4977_v63 }
0x126d   :  { %6538 = vrot.lane.b32.xlu2 %v6537_v9, %s6747_s21  ;;  %6533 = vrot.lane.b32.xlu1 %v6532_v39, %s6746_s17 }
0x126e   :  { %5253 = vmatpush.msra.mxu2 %v4974_v41 }
0x1270   :  { %5254 = vmatpush.msra.mxu2 %v8222_v38  ;;  %v6557_v38 = vpack.i.bf16 %v8185_v49, %v8181_v26 }
0x1272   :  { %5255 = vmatpush.msra.mxu2 %v8207_v8  ;;  %v6562_v8 = vpack.i.bf16 %v8239_v61, %v8236_v59 }
0x1274   :  { %6553 = vrot.lane.b32.xlu0 %v6552_v56, %s6747_s21  ;;  %5256 = vmatpush.msra.mxu2 %v8193_v23  ;;  %v6577_v23 = vpack.i.bf16 %v5083_v52, %v5036_v48 }
0x1275   :  { %6568 = vrot.lane.b32.xlu2 %v6567_v55, %s6747_s21  ;;  %6543 = vrot.lane.b32.xlu1 %v6542_v18, %s6748_s25 }
0x1276   :  { %5257 = vmatpush.msra.mxu2 %v8181_v26 }
0x127c   :  { %6558 = vrot.lane.b32.xlu0 %v6557_v38, %s6746_s17 }
0x127d   :  { %6588 = vrot.lane.b32.xlu2 %v6587_v25, %s6748_s25  ;;  %6563 = vrot.lane.b32.xlu1 %v6562_v8, %s6748_s25 }
0x1284   :  { %6573 = vrot.lane.b32.xlu0 %v6572_v58, %s6748_s25 }
0x1285   :  { %6603 = vrot.lane.b32.xlu2 %v6602_v42, %s6748_s25  ;;  %6578 = vrot.lane.b32.xlu1 %v6577_v23, %s6748_s25 }
0x128c   :  { %6593 = vrot.lane.b32.xlu0 %v6592_v17, %s6747_s21 }
0x128d   :  { %6583 = vrot.lane.b32.xlu1 %v6582_v34, %s6747_s21 }
0x1295   :  { %6598 = vrot.lane.b32.xlu1 %v6597_v33, %s6748_s25 }
0x1297   :  { %v8297_v26 = vpop.permute.xlu2 %6473 }
0x129e   :  { %v8299_v49 = vpop.permute.xlu0 %6458 }
0x129f   :  { %v8301_v42 = vpop.permute.xlu2 %6483  ;;  %v6461_v48 = vunpack.i.h.bf16 %v8299_v49  ;;  %v6460_v22 = vunpack.i.l.bf16 %v8299_v49 }
0x12a0   :  { %v6486_v56 = vunpack.i.h.bf16 %v8301_v42  ;;  %v6485_v18 = vunpack.i.l.bf16 %v8301_v42 }
0x12a1   :  { %v5197_v42 = vsel %vm5195_vm3, %v6460_v22, %v6461_v48 }
0x12a6   :  { %v8304_v4 = vpop.permute.xlu0 %6463 }
0x12a7   :  { %v8306_v50 = vpop.permute.xlu2 %6493  ;;  %v6466_v40 = vunpack.i.h.bf16 %v8304_v4  ;;  %v6465_v43 = vunpack.i.l.bf16 %v8304_v4 }
0x12a8   :  { %v6496_v39 = vunpack.i.h.bf16 %v8306_v50  ;;  %v6495_v9 = vunpack.i.l.bf16 %v8306_v50 }
0x12a9   :  { %v5198_v4 = vsel %vm5195_vm3, %v6465_v43, %v6466_v40 }
0x12ae   :  { %v6469_v29 = vpop.permute.xlu0 %6468 }
0x12af   :  { %v8310_v34 = vpop.permute.xlu2 %6508  ;;  %v6471_v30 = vunpack.i.h.bf16 %v6469_v29  ;;  %v6470_v31 = vunpack.i.l.bf16 %v6469_v29 }
0x12b0   :  { %v6511_v10 = vunpack.i.h.bf16 %v8310_v34  ;;  %v6510_v45 = vunpack.i.l.bf16 %v8310_v34  ;;  %v6476_v34 = vunpack.i.h.bf16 %v8297_v26 }
0x12b1   :  { %v5199_v52 = vsel %vm5195_vm3, %v6470_v31, %v6471_v30 }
0x12b2   :  { %v5416_v29 = vsel %vm5409_vm4, %v6510_v45, %v6511_v10 }
0x12b6   :  { %2682 = vadd.xlane.f32.xlu0 %v7532_v37  ;;  %v6479_v32 = vpop.permute.xlu0 %6478 }
0x12b7   :  { %v6519_v27 = vpop.permute.xlu2 %6518  ;;  %v6481_v3 = vunpack.i.h.bf16 %v6479_v32  ;;  %v6480_v5 = vunpack.i.l.bf16 %v6479_v32  ;;  %v5415_v32 = vsel %vm5409_vm4, %v6495_v9, %v6496_v39 }
0x12b8   :  { %v6521_v44 = vunpack.i.h.bf16 %v6519_v27  ;;  %v6520_v59 = vunpack.i.l.bf16 %v6519_v27 }
0x12b9   :  { %v5200_v46 = vsel %vm5195_vm3, %v6480_v5, %v6481_v3 }
0x12ba   :  { %v5203_v47 = vsel %vm5195_vm3, %v6520_v59, %v6521_v44 }
0x12be   :  { %v6489_v28 = vpop.permute.xlu0 %6488 }
0x12bf   :  { %v8308_v17 = vpop.permute.xlu1 %6498  ;;  %v6524_v55 = vpop.permute.xlu2 %6523  ;;  %v6491_v2 = vunpack.i.h.bf16 %v6489_v28  ;;  %v6490_v1 = vunpack.i.l.bf16 %v6489_v28 }
0x12c0   :  { %v6526_v35 = vunpack.i.h.bf16 %v6524_v55  ;;  %v6525_v36 = vunpack.i.l.bf16 %v6524_v55  ;;  %v6500_v3 = vunpack.i.l.bf16 %v8308_v17 }
0x12c1   :  { %v5201_v11 = vsel %vm5195_vm3, %v6490_v1, %v6491_v2 }
0x12c2   :  { %v5417_v21 = vsel %vm5409_vm4, %v6525_v36, %v6526_v35  ;;  %v5133_v36 = vld [vmem:[%s8446_s29] sm:$0xff] }
0x12c3   :  { %6001 = vmatmul.msk.f32.vlgmr.msra.gmra.mxu2 %vm786_vm6, %v5133_v36 }
0x12c7   :  { %v6504_v51 = vpop.permute.xlu1 %6503  ;;  %v6539_v63 = vpop.permute.xlu2 %6538 }
0x12c8   :  { %v6506_v61 = vunpack.i.h.bf16 %v6504_v51  ;;  %v6505_v62 = vunpack.i.l.bf16 %v6504_v51  ;;  %v6541_v7 = vunpack.i.h.bf16 %v6539_v63  ;;  %v6540_v13 = vunpack.i.l.bf16 %v6539_v63 }
0x12c9   :  { %v6475_v51 = vunpack.i.l.bf16 %v8297_v26 }
0x12ca   :  { %v5202_v24 = vsel %vm5195_vm3, %v6505_v62, %v6506_v61  ;;  %v5418_v15 = vsel %vm5409_vm4, %v6540_v13, %v6541_v7 }
0x12cf   :  { %v8312_v33 = vpop.permute.xlu1 %6513  ;;  %v6569_v50 = vpop.permute.xlu2 %6568 }
0x12d0   :  { %v6571_v27 = vunpack.i.h.bf16 %v6569_v50  ;;  %v6570_v28 = vunpack.i.l.bf16 %v6569_v50  ;;  %v6516_v63 = vunpack.i.h.bf16 %v8312_v33 }
0x12d2   :  { %v5412_v26 = vsel %vm5409_vm4, %v6570_v28, %v6571_v27 }
0x12d7   :  { %v8314_v54 = vpop.permute.xlu1 %6528  ;;  %v6589_v2 = vpop.permute.xlu2 %6588 }
0x12d8   :  { %v6530_v61 = vunpack.i.l.bf16 %v8314_v54 }
0x12de   :  { %v6549_v25 = vpop.permute.xlu0 %6548 }
0x12df   :  { %v6534_v37 = vpop.permute.xlu1 %6533  ;;  %v6551_v16 = vunpack.i.h.bf16 %v6549_v25  ;;  %v6550_v57 = vunpack.i.l.bf16 %v6549_v25  ;;  %v5414_v25 = vsel %vm5409_vm4, %v6485_v18, %v6486_v56  ;;  %v6604_v10 = vpop.permute.xlu2 %6603  ;;  %v5358_v56 = vld [vmem:[%s8446_s29 + $0x18] sm:$0xff] }
0x12e0   :  { %v6536_v58 = vunpack.i.h.bf16 %v6534_v37  ;;  %v6535_v41 = vunpack.i.l.bf16 %v6534_v37  ;;  %v5413_v37 = vsel %vm5409_vm4, %v6475_v51, %v6476_v34  ;;  %v6606_v22 = vunpack.i.h.bf16 %v6604_v10 }
0x12e1   :  { %v5205_v60 = vsel %vm5195_vm3, %v6550_v57, %v6551_v16  ;;  %v6605_v39 = vunpack.i.l.bf16 %v6604_v10 }
0x12e2   :  { %5225 = vmatpush.msrb.mxu1 %v5205_v60  ;;  %v5204_v0 = vsel %vm5195_vm3, %v6535_v41, %v6536_v58  ;;  %v6531_v60 = vunpack.i.h.bf16 %v8314_v54 }
0x12e3   :  { %v5314_v18 = vsel %vm5313_vm5, %v6605_v39, %v6606_v22 }
0x12e4   :  { %5226 = vmatpush.msrb.mxu1 %v5204_v0  ;;  %v6515_v0 = vunpack.i.l.bf16 %v8312_v33  ;;  %v5321_v7 = vsel %vm5313_vm5, %v6530_v61, %v6531_v60 }
0x12e6   :  { %v6554_v12 = vpop.permute.xlu0 %6553  ;;  %5227 = vmatpush.msrb.mxu1 %v5203_v47  ;;  %v6501_v47 = vunpack.i.h.bf16 %v8308_v17  ;;  %v5320_v33 = vsel %vm5313_vm5, %v6515_v0, %v6516_v63 }
0x12e7   :  { %v8319_v14 = vpop.permute.xlu1 %6543  ;;  %v6556_v53 = vunpack.i.h.bf16 %v6554_v12  ;;  %v6555_v20 = vunpack.i.l.bf16 %v6554_v12 }
0x12e8   :  { %5228 = vmatpush.msrb.mxu1 %v5202_v24  ;;  %v6546_v58 = vunpack.i.h.bf16 %v8319_v14  ;;  %v6545_v41 = vunpack.i.l.bf16 %v8319_v14  ;;  %v5319_v31 = vsel %vm5313_vm5, %v6500_v3, %v6501_v47 }
0x12e9   :  { %v5419_v19 = vsel %vm5409_vm4, %v6555_v20, %v6556_v53 }
0x12ea   :  { %5229 = vmatpush.msrb.mxu1 %v5201_v11  ;;  %5439 = vmatpush.msrb.mxu2 %v5419_v19  ;;  %v5322_v1 = vsel %vm5313_vm5, %v6545_v41, %v6546_v58  ;;  %v6591_v11 = vunpack.i.h.bf16 %v6589_v2  ;;  %v6590_v19 = vunpack.i.l.bf16 %v6589_v2 }
0x12ec   :  { %5230 = vmatpush.msrb.mxu1 %v5200_v46  ;;  %5440 = vmatpush.msrb.mxu2 %v5418_v15  ;;  %v5134_v46 = vld [vmem:[%s8446_s29 + $0x8] sm:$0xff]  ;;  %v5316_v48 = vsel %vm5313_vm5, %v6590_v19, %v6591_v11 }
0x12ee   :  { %v6559_v38 = vpop.permute.xlu0 %6558  ;;  %5231 = vmatpush.msrb.mxu1 %v5199_v52  ;;  %5441 = vmatpush.msrb.mxu2 %v5417_v21 }
0x12ef   :  { %v8338_v8 = vpop.permute.xlu1 %6563  ;;  %v6561_v23 = vunpack.i.h.bf16 %v6559_v38  ;;  %v6560_v49 = vunpack.i.l.bf16 %v6559_v38  ;;  %v5262_v38 = vld [vmem:[%s8446_s29 + $0x10] sm:$0xff] }
0x12f0   :  { %5232 = vmatpush.msrb.mxu1 %v5198_v4  ;;  %5442 = vmatpush.msrb.mxu2 %v5416_v29  ;;  %v6566_v54 = vunpack.i.h.bf16 %v8338_v8  ;;  %v6565_v12 = vunpack.i.l.bf16 %v8338_v8  ;;  %v2713_v8 = vmul.f32 2.0, %v7572_v6 }
0x12f1   :  { %v5196_v55 = vsel %vm5195_vm3, %v6560_v49, %v6561_v23  ;;  %v6607_v23 = vld [vmem:[%s8447_s3] ss:$0 sm:$0xff] }
0x12f2   :  { %5233 = vmatpush.msrb.mxu1 %v5197_v42  ;;  %5443 = vmatpush.msrb.mxu2 %v5415_v32  ;;  %v5318_v40 = vsel %vm5313_vm5, %v6565_v12, %v6566_v54 }
0x12f4   :  { %5234 = vmatpush.msrb.mxu1 %v5196_v55  ;;  %5444 = vmatpush.msrb.mxu2 %v5414_v25 }
0x12f5   :  { %6000 = vmatmul.msk.f32.vlgmr.msrb.gmra.mxu1 %vm786_vm6, %v5134_v46 }
0x12f6   :  { %v6574_v16 = vpop.permute.xlu0 %6573  ;;  %5445 = vmatpush.msrb.mxu2 %v5413_v37  ;;  %v5454_v37 = vld [vmem:[%s6915_s20] sm:$0xff]  ;;  %s6634_s20 = scalar_lea.hbm %s6633_s15, 8 }
0x12f7   :  { %v6579_v57 = vpop.permute.xlu1 %6578  ;;  %v6576_v30 = vunpack.i.h.bf16 %v6574_v16  ;;  %v6575_v17 = vunpack.i.l.bf16 %v6574_v16  ;;  %p6635_p0 = scmp.ne.s32.totalorder %s6633_s15, %s6634_s20  ;;  %p6638_p2 = scmp.lt.s32.totalorder %s6636_s16, %s6634_s20 }
0x12f8   :  { %v6581_v44 = vunpack.i.h.bf16 %v6579_v57  ;;  %v6580_v59 = vunpack.i.l.bf16 %v6579_v57  ;;  %5446 = vmatpush.msrb.mxu2 %v5412_v26 }
0x12f9   :  { %v5317_v45 = vsel %vm5313_vm5, %v6575_v17, %v6576_v30  ;;  %p6639_p3 = por %p6638_p2, %p6637_p1 }
0x12fa   :  { %v5323_v62 = vsel %vm5313_vm5, %v6580_v59, %v6581_v44 }
0x12fb   :  { %5343 = vmatpush.msra.mxu1 %v5323_v62  ;;  %p6640_p4 = pnand %p6639_p3, %p6635_p0 }
0x12fd   :  { %5344 = vmatpush.msra.mxu1 %v5322_v1 }
0x12fe   :  { %v6594_v5 = vpop.permute.xlu0 %6593 }
0x12ff   :  { %v6584_v13 = vpop.permute.xlu1 %6583  ;;  %5345 = vmatpush.msra.mxu1 %v5321_v7  ;;  %v6596_v20 = vunpack.i.h.bf16 %v6594_v5  ;;  %v6595_v24 = vunpack.i.l.bf16 %v6594_v5 }
0x1300   :  { %v6586_v14 = vunpack.i.h.bf16 %v6584_v13  ;;  %v6585_v53 = vunpack.i.l.bf16 %v6584_v13 }
0x1301   :  { %5346 = vmatpush.msra.mxu1 %v5320_v33  ;;  %v5410_v43 = vsel %vm5409_vm4, %v6595_v24, %v6596_v20 }
0x1302   :  { %v5411_v35 = vsel %vm5409_vm4, %v6585_v53, %v6586_v14 }
0x1303   :  { %5347 = vmatpush.msra.mxu1 %v5319_v31  ;;  %5447 = vmatpush.msrb.mxu2 %v5411_v35 }
0x1305   :  { %5348 = vmatpush.msra.mxu1 %v5318_v40  ;;  %5448 = vmatpush.msrb.mxu2 %v5410_v43 }
0x1306   :  { %6003 = vmatmul.msk.f32.vlgmr.msrb.gmra.mxu2 %vm786_vm6, %v5358_v56 }
0x1307   :  { %v6599_v15 = vpop.permute.xlu1 %6598  ;;  %5349 = vmatpush.msra.mxu1 %v5317_v45 }
0x1308   :  { %v6601_v9 = vunpack.i.h.bf16 %v6599_v15  ;;  %v6600_v52 = vunpack.i.l.bf16 %v6599_v15 }
0x1309   :  { %5350 = vmatpush.msra.mxu1 %v5316_v48 }
0x130a   :  { %v5315_v21 = vsel %vm5313_vm5, %v6600_v52, %v6601_v9 }
0x130b   :  { %5351 = vmatpush.msra.mxu1 %v5315_v21 }
0x130d   :  { %5352 = vmatpush.msra.mxu1 %v5314_v18 }
0x130e   :  { %6002 = vmatmul.msk.f32.vlgmr.msra.gmra.mxu1 %vm786_vm6, %v5262_v38 }
0x1329   :  { %v2683_v49 = vpop.xlane.xlu0 %2682 }
0x132a   :  { %v2714_v4 = vsub.f32 %v2683_v49, %v2713_v8 }
0x132c   :  { %v2719_v29 = vadd.f32 %v6607_v23, %v2714_v4 }
0x132e   :  { %v2720_v50 = vadd.f32 1.0, %v2719_v29 }
0x1330   :  { %6616 = vrcp.f32 %v2720_v50 }
0x1336   :  { %v6617_v34 = vpop.eup %6616 }
0x1337   :  { %v2723_v51 = vsel %vm2722_vm7, %v6617_v34, 0.0 }
0x1338   :  { %2724 = vadd.xlane.f32.xlu1 %v2723_v51 }
0x1346   :  { %v5259_v32 = vpop.f32.mrf.mxu2 }
0x1372   :  { %v5236_v42 = vpop.f32.mrf.mxu1 }
0x1373   :  { %v5260_v27 = vadd.f32 %v5259_v32, %v5236_v42 }
0x1389   :  { %v5450_v6 = vpop.f32.mrf.mxu2 }
0x138b   :  { %v5354_v28 = vpop.f32.mrf.mxu1 }
0x138c   :  { %v5357_v55 = vadd.f32 %v5354_v28, %v5260_v27 }
0x138e   :  { %v5453_v25 = vadd.f32 %v5450_v6, %v5357_v55 }
0x1390   :  { %v5455_v16 = vadd.f32 %v5454_v37, %v5453_v25 }
0x1392   :  { %v5456_v57 = vmax.f32 %v5455_v16, 0.0 }
0x1394   :  { %5459 = vst.msk [vmem:[#allocation4] sm:$0xff] %vm168_vm1, %v5456_v57 }
0x1395   :  { %6643 = shalt.err (!%p6640_p4)
}
0x1396   :  { %5481 = dma.vmem_to_hbm [thread:$0]  %s5477_s14, 128, %s5479_s19, [#allocation5]  }
0x1397   :  { %s6656_s18 = sshra.s32 %s5490_s12, 4  ;;  %s6660_s23 = scalar_lea.hbm %s6930_s6, 2  ;;  %s6657_s18 = int_to_ptr.hbm [resolvable:$true] %s6656_s18 }
0x1398   :  { %s6658_s22 = scalar_lea.hbm %s6657_s18, 2  ;;  %p6661_p6 = scmp.lt.s32.totalorder %s6657_s18, %s6930_s6 }
0x1399   :  { %p6659_p5 = scmp.ne.s32.totalorder %s6657_s18, %s6658_s22  ;;  %p6662_p7 = scmp.lt.s32.totalorder %s6660_s23, %s6658_s22 }
0x139b   :  { %p6663_p8 = por %p6662_p7, %p6661_p6 }
0x139d   :  { %p6664_p9 = pnand %p6663_p8, %p6659_p5 }
0x139f   :  { %6667 = shalt.err (!%p6664_p9)
}
0x13a0   :  { %5492 = dma.vmem_to_hbm [thread:$0]  %s5488_s30, 32, %s5490_s12, [#allocation5]  }
0x13a1   :  { %s6751_s4 = smov [#allocation2]   ;;  %s5467_s28 = sshll.u32 %s6920_s27, 4  ;;  %s5468_s28 = int_to_ptr.hbm [resolvable:$true] %s5467_s28 }
0x13a2   :  { %s5465_s26 = sshll.u32 %s6751_s4, 4  ;;  %s6680_s6 = sshra.s32 %s5468_s28, 4  ;;  %s5466_s26 = int_to_ptr.vmem [resolvable:$true] %s5465_s26  ;;  %s6681_s6 = int_to_ptr.hbm [resolvable:$true] %s6680_s6 }
0x13a3   :  { %s6682_s1 = scalar_lea.hbm %s6681_s6, 2  ;;  %s6684_s2 = scalar_lea.hbm %s6920_s27, 2 }
0x13a4   :  { %p6683_p10 = scmp.ne.s32.totalorder %s6681_s6, %s6682_s1  ;;  %p6685_p11 = scmp.lt.s32.totalorder %s6681_s6, %s6920_s27 }
0x13a5   :  { %p6686_p12 = scmp.lt.s32.totalorder %s6684_s2, %s6682_s1 }
0x13a7   :  { %p6687_p13 = por %p6686_p12, %p6685_p11 }
0x13a9   :  { %p6688_p0 = pnand %p6687_p13, %p6683_p10 }
0x13ab   :  { %v2725_v26 = vpop.xlane.xlu1 %2724 }
0x13ac   :  { %6618 = vrcp.f32 %v2725_v26 }
0x13b2   :  { %v6619_v58 = vpop.eup %6618 }
0x13b3   :  { %v2727_v41 = vmul.f32 %v6619_v58, %v2725_v26 }
0x13b5   :  { %v2728_v44 = vsub.f32 2.0, %v2727_v41 }
0x13b7   :  { %v2729_v59 = vmul.f32 %v6619_v58, %v2728_v44 }
0x13b9   :  { %v2730_v60 = vmul.f32 %v6617_v34, %v2729_v59 }
0x13bb   :  { %5457 = vst.msk [vmem:[#allocation2] sm:$0x3] %vm2722_vm7, %v2730_v60 }
0x13bc   :  { %6691 = shalt.err (!%p6688_p0)
}
0x13bd   :  { %5470 = dma.vmem_to_hbm [thread:$0]  %s5466_s26, 32, %s5468_s28, [#allocation3]  }
0x13be   :  { %6692 = dma.done.wait [#allocation3], 32  }
0x13bf   :  { %6693 = vsyncadd [#allocation3], 4294967264 }
0x13c0   :  { %6694 = dma.done.wait [#allocation5], 160  }
0x13c1   :  { %6695 = vsyncadd [#allocation5], 4294967136 }
0x13c2   :  { %5505 = vsyncpa [#allocation3], 1 }
0x13c3   :  { %5506 = vsyncpa [#allocation5], 1 }

</bundles_post_ra>
